<compile_context>
chip_gen: v6e
topology: v6e:2x2x1
jax: 0.10.0
libtpu: 0.0.40
codegen_flags: <defaults>
</compile_context>

<pallas_src>
from functools import partial

import jax
import jax.numpy as jnp
from jax import lax
from jax.experimental import pallas as pl
from jax.experimental.pallas import tpu as pltpu

MAX_NUM_STEPS = 1000


# ----------------------------------------------------------------------------
# Fused kernel: full dopri5 integration of dy/dt = conv3(relu(conv2(relu(conv1 y))))
# ----------------------------------------------------------------------------
def _fused_dopri5_kernel(y0_ref, w1_ref, b1_ref, wb_ref, b2_ref, w3_ref, b3_ref,
                         sup_ref, sdn_ref, o_ref, steps_ref, k1_ref,
                         *, rtol, atol, t0, t1, h0, max_steps):
    f32 = jnp.float32

    def odefunc(y):
        # conv1 (1x1) as block-diagonal (WC,WC) matmul, then ReLU
        h1 = jnp.dot(y, w1_ref[...], preferred_element_type=f32) + b1_ref[...]
        h1 = jnp.maximum(h1, 0.0)
        # row shifts in H (with per-image zero boundary baked into sup/sdn)
        up = jnp.dot(sup_ref[...], h1, preferred_element_type=f32)   # row h-1
        dn = jnp.dot(sdn_ref[...], h1, preferred_element_type=f32)   # row h+1
        # conv2 (3x3, pad=1): three banded (WC,WC) matmuls (x-shifts + channels
        # folded into the band), then ReLU
        h2 = (jnp.dot(up, wb_ref[0], preferred_element_type=f32)
              + jnp.dot(h1, wb_ref[1], preferred_element_type=f32)
              + jnp.dot(dn, wb_ref[2], preferred_element_type=f32)
              + b2_ref[...])
        h2 = jnp.maximum(h2, 0.0)
        # conv3 (1x1)
        return jnp.dot(h2, w3_ref[...], preferred_element_type=f32) + b3_ref[...]

    # dopri5 Butcher tableau (stage times unused: autonomous ODE)
    a21 = 1 / 5
    a31, a32 = 3 / 40, 9 / 40
    a41, a42, a43 = 44 / 45, -56 / 15, 32 / 9
    a51, a52, a53, a54 = 19372 / 6561, -25360 / 2187, 64448 / 6561, -212 / 729
    a61, a62, a63, a64, a65 = (9017 / 3168, -355 / 33, 46732 / 5247,
                               49 / 176, -5103 / 18656)
    cb1, cb3, cb4, cb5, cb6 = 35 / 384, 500 / 1113, 125 / 192, -2187 / 6784, 11 / 84
    e1 = cb1 - 5179 / 57600
    e3 = cb3 - 7571 / 16695
    e4 = cb4 - 393 / 640
    e5 = cb5 + 92097 / 339200
    e6 = cb6 - 187 / 2100
    e7 = -1 / 40

    inv_n = 1.0 / float(o_ref.shape[0] * o_ref.shape[1])

    y0 = y0_ref[...].astype(f32)
    o_ref[...] = y0
    k1_ref[...] = odefunc(y0)                 # FSAL seed

    def cond(carry):
        t, h, n = carry
        return jnp.logical_and(t < t1 - 1e-7, n < max_steps)

    def body(carry):
        t, h, n = carry
        y = o_ref[...]
        k1 = k1_ref[...]
        h = jnp.minimum(h, t1 - t)

        k2 = odefunc(y + h * (a21 * k1))
        k3 = odefunc(y + h * (a31 * k1 + a32 * k2))
        k4 = odefunc(y + h * (a41 * k1 + a42 * k2 + a43 * k3))
        k5 = odefunc(y + h * (a51 * k1 + a52 * k2 + a53 * k3 + a54 * k4))
        k6 = odefunc(y + h * (a61 * k1 + a62 * k2 + a63 * k3 + a64 * k4
                              + a65 * k5))
        y5 = y + h * (cb1 * k1 + cb3 * k3 + cb4 * k4 + cb5 * k5 + cb6 * k6)
        k7 = odefunc(y5)                       # FSAL: next step's k1 if accepted
        yerr = h * (e1 * k1 + e3 * k3 + e4 * k4 + e5 * k5 + e6 * k6 + e7 * k7)

        scale = atol + rtol * jnp.maximum(jnp.abs(y), jnp.abs(y5))
        r = yerr / scale
        err2 = jnp.sum(r * r) * inv_n          # mean-square error ratio (scalar)
        accept = err2 <= 1.0

        # factor = 0.9 * err^(-1/5) = 0.9 * err2^(-1/10); computed on one vreg
        # so exp/log run on the EUP (scalar transcendentals are not TPU-friendly).
        e2v = jnp.full((8, 128), jnp.maximum(err2, 1e-12), f32)
        fac_v = 0.9 * jnp.exp(-0.1 * jnp.log(e2v))
        factor = jnp.clip(jnp.max(fac_v), 0.2, 10.0)

        sel = jnp.where(accept, jnp.float32(1.0), jnp.float32(0.0))
        o_ref[...] = y + sel * (y5 - y)
        k1_ref[...] = k1 + sel * (k7 - k1)

        t_next = t + sel * h
        h_next = jnp.maximum(h * factor, 1e-6)
        return t_next, h_next, n + 1

    carry0 = (jnp.float32(t0), jnp.float32(h0), jnp.int32(0))
    _, _, n_final = lax.while_loop(cond, body, carry0)
    # surface the attempted-step count (n_final == max_steps => unconverged)
    steps_ref[...] = jnp.full((1, 1), n_final, jnp.int32)


# ----------------------------------------------------------------------------
# Wrapper: build lane-dense fused weights and call the kernel once
# ----------------------------------------------------------------------------
def _build_fused_weights(params, N, H, W, C):
    w1, b1, w2, b2, w3, b3 = params
    WC, NH = W * C, N * H
    f32 = jnp.float32

    eye_w = jnp.eye(W, dtype=f32)
    w1bd = jnp.kron(eye_w, w1.astype(f32))                 # (WC, WC) block-diag
    w3bd = jnp.kron(eye_w, w3.astype(f32))
    b1row = jnp.tile(b1.astype(f32).reshape(1, C), (1, W))  # (1, WC)
    b2row = jnp.tile(b2.astype(f32).reshape(1, C), (1, W))
    b3row = jnp.tile(b3.astype(f32).reshape(1, C), (1, W))

    # banded 3x3 weights: band[ky][w_in*C+ci, w_out*C+co] = w2[ky, kx, ci, co]
    # with kx = w_in - w_out + 1 (|w_in - w_out| <= 1), zero elsewhere -> the
    # x-direction zero padding is implicit.
    w_in = jnp.arange(W)[:, None]
    w_out = jnp.arange(W)[None, :]
    bands = []
    for ky in range(3):
        band = jnp.zeros((W, C, W, C), f32)
        for kx in range(3):
            mask = (w_in == w_out + (kx - 1)).astype(f32)            # (W, W)
            band = band + mask[:, None, :, None] * w2[ky, kx][None, :, None, :]
        bands.append(band.reshape(WC, WC))
    wband = jnp.stack(bands, axis=0)                                 # (3, WC, WC)

    # row-shift matrices over N*H rows with per-image zero boundary in H
    r_out = jnp.arange(NH)[:, None]
    r_in = jnp.arange(NH)[None, :]
    sup = ((r_in == r_out - 1) & (r_out % H != 0)).astype(f32)        # picks h-1
    sdn = ((r_in == r_out + 1) & (r_out % H != H - 1)).astype(f32)    # picks h+1
    return w1bd, b1row, wband, b2row, w3bd, b3row, sup, sdn


def odeblock_forward(x_nchw, params, tol=1e-3, with_stats=False):
    # TODO(synk): odefunc.nfe side-effect counter has no functional analogue;
    #             the attempted-step count is returned when with_stats=True.
    # TODO(synk): torchdiffeq's exact dopri5 controller / dense output is not
    #             reproduced bit-exactly; this is a standard RK45 controller.
    N, C, H, W = x_nchw.shape
    NH, WC = N * H, W * C
    y0 = jnp.transpose(x_nchw, (0, 2, 3, 1)).astype(jnp.float32).reshape(NH, WC)
    fused = _build_fused_weights(params, N, H, W, C)

    kernel = partial(_fused_dopri5_kernel, rtol=tol, atol=tol,
                     t0=0.0, t1=1.0, h0=0.05, max_steps=MAX_NUM_STEPS)
    y1, steps = pl.pallas_call(
        kernel,
        out_shape=(jax.ShapeDtypeStruct((NH, WC), jnp.float32),
                   jax.ShapeDtypeStruct((1, 1), jnp.int32)),
        scratch_shapes=[pltpu.VMEM((NH, WC), jnp.float32)],   # FSAL k1 buffer
    )(y0, *fused)

    out = y1.reshape(N, H, W, C).transpose(0, 3, 1, 2).astype(x_nchw.dtype)
    if with_stats:
        return out, steps[0, 0]
    return out


def init_params(C, key):
    # synthetic ConvODEFunc weights; w*[ci, co], w2[ky, kx, ci, co]
    k1, k2, k3 = jax.random.split(key, 3)
    scale = 0.1
    w1 = jax.random.normal(k1, (C, C), jnp.float32) * scale
    b1 = jnp.zeros((C,), jnp.float32)
    w2 = jax.random.normal(k2, (3, 3, C, C), jnp.float32) * scale
    b2 = jnp.zeros((C,), jnp.float32)
    w3 = jax.random.normal(k3, (C, C), jnp.float32) * scale
    b3 = jnp.zeros((C,), jnp.float32)
    return (w1, b1, w2, b2, w3, b3)


if __name__ == "__main__":
    key = jax.random.PRNGKey(0)
    kx, kp = jax.random.split(key)
    N, C, H, W = 2, 8, 16, 16     # -> state layout (N*H, W*C) = (32, 128)
    x = jax.random.normal(kx, (N, C, H, W), jnp.float32)
    params = init_params(C, kp)

    fwd = jax.jit(partial(odeblock_forward, tol=1e-3, with_stats=True))
    out, nsteps = fwd(x, params)
    out, nsteps = jax.block_until_ready((out, nsteps))

    assert out.shape == (N, C, H, W)
    assert bool(jnp.all(jnp.isfinite(out)))
    assert int(nsteps) < MAX_NUM_STEPS   # solver converged before the step cap
    print("KERNEL_OK")
</pallas_src>

<mosaic_0001>
module attributes {stable_mosaic.version = 11 : i64} {
  func.func @_fused_dopri5_kernel(%arg0: memref<32x128xf32, #tpu.memory_space<vmem>>, %arg1: memref<128x128xf32, #tpu.memory_space<vmem>>, %arg2: memref<1x128xf32, #tpu.memory_space<vmem>>, %arg3: memref<3x128x128xf32, #tpu.memory_space<vmem>>, %arg4: memref<1x128xf32, #tpu.memory_space<vmem>>, %arg5: memref<128x128xf32, #tpu.memory_space<vmem>>, %arg6: memref<1x128xf32, #tpu.memory_space<vmem>>, %arg7: memref<32x32xf32, #tpu.memory_space<vmem>>, %arg8: memref<32x32xf32, #tpu.memory_space<vmem>>, %arg9: memref<32x128xf32, #tpu.memory_space<vmem>>, %arg10: memref<1x1xi32, #tpu.memory_space<vmem>>, %arg11: memref<32x128xf32, #tpu.memory_space<vmem>>) attributes {dimension_semantics = [], scalar_prefetch = 0 : i64, scratch_operands = 1 : i64, tpu.core_type = #tpu.core_type<tc>} {
    %c0 = arith.constant 0 : index
    %c0_0 = arith.constant 0 : index
    %0 = vector.load %arg0[%c0, %c0_0] : memref<32x128xf32, #tpu.memory_space<vmem>>, vector<32x128xf32>
    %c0_1 = arith.constant 0 : index
    %c0_2 = arith.constant 0 : index
    %1 = vector.load %arg9[%c0_1, %c0_2] : memref<32x128xf32, #tpu.memory_space<vmem>>, vector<32x128xf32>
    tpu.vector_store %arg9[%c0_1, %c0_2], %0 {strides = array<i32>} : memref<32x128xf32, #tpu.memory_space<vmem>>, vector<32x128xf32>,
    %c0_3 = arith.constant 0 : index
    %c0_4 = arith.constant 0 : index
    %2 = vector.load %arg1[%c0_3, %c0_4] : memref<128x128xf32, #tpu.memory_space<vmem>>, vector<128x128xf32>
    %cst = arith.constant dense<0.000000e+00> : vector<32x128xf32>
    %3 = tpu.matmul %0, %2, %cst {dimension_numbers = #tpu.dot_dimension_numbers<[1], [0], [0], [1], [0, 0, 1, 1], [], []>} : vector<32x128xf32>, vector<128x128xf32>, vector<32x128xf32> -> vector<32x128xf32>
    %c0_5 = arith.constant 0 : index
    %c0_6 = arith.constant 0 : index
    %4 = vector.load %arg2[%c0_5, %c0_6] : memref<1x128xf32, #tpu.memory_space<vmem>>, vector<1x128xf32>
    %5 = vector.broadcast %4 : vector<1x128xf32> to vector<32x128xf32>
    %6 = arith.addf %3, %5 : vector<32x128xf32>
    %cst_7 = arith.constant 0.000000e+00 : f32
    %7 = vector.broadcast %cst_7 : f32 to vector<32x128xf32>
    %8 = arith.maximumf %6, %7 : vector<32x128xf32>
    %c0_8 = arith.constant 0 : index
    %c0_9 = arith.constant 0 : index
    %9 = vector.load %arg7[%c0_8, %c0_9] : memref<32x32xf32, #tpu.memory_space<vmem>>, vector<32x32xf32>
    %cst_10 = arith.constant dense<0.000000e+00> : vector<32x128xf32>
    %10 = tpu.matmul %9, %8, %cst_10 {dimension_numbers = #tpu.dot_dimension_numbers<[1], [0], [0], [1], [0, 0, 1, 1], [], []>} : vector<32x32xf32>, vector<32x128xf32>, vector<32x128xf32> -> vector<32x128xf32>
    %c0_11 = arith.constant 0 : index
    %c0_12 = arith.constant 0 : index
    %11 = vector.load %arg8[%c0_11, %c0_12] : memref<32x32xf32, #tpu.memory_space<vmem>>, vector<32x32xf32>
    %cst_13 = arith.constant dense<0.000000e+00> : vector<32x128xf32>
    %12 = tpu.matmul %11, %8, %cst_13 {dimension_numbers = #tpu.dot_dimension_numbers<[1], [0], [0], [1], [0, 0, 1, 1], [], []>} : vector<32x32xf32>, vector<32x128xf32>, vector<32x128xf32> -> vector<32x128xf32>
    %c0_14 = arith.constant 0 : index
    %c0_15 = arith.constant 0 : index
    %c0_16 = arith.constant 0 : index
    %13 = vector.load %arg3[%c0_14, %c0_15, %c0_16] : memref<3x128x128xf32, #tpu.memory_space<vmem>>, vector<1x128x128xf32>
    %14 = vector.shape_cast %13 : vector<1x128x128xf32> to vector<128x128xf32>
    %cst_17 = arith.constant dense<0.000000e+00> : vector<32x128xf32>
    %15 = tpu.matmul %10, %14, %cst_17 {dimension_numbers = #tpu.dot_dimension_numbers<[1], [0], [0], [1], [0, 0, 1, 1], [], []>} : vector<32x128xf32>, vector<128x128xf32>, vector<32x128xf32> -> vector<32x128xf32>
    %c1 = arith.constant 1 : index
    %c0_18 = arith.constant 0 : index
    %c0_19 = arith.constant 0 : index
    %16 = vector.load %arg3[%c1, %c0_18, %c0_19] : memref<3x128x128xf32, #tpu.memory_space<vmem>>, vector<1x128x128xf32>
    %17 = vector.shape_cast %16 : vector<1x128x128xf32> to vector<128x128xf32>
    %cst_20 = arith.constant dense<0.000000e+00> : vector<32x128xf32>
    %18 = tpu.matmul %8, %17, %cst_20 {dimension_numbers = #tpu.dot_dimension_numbers<[1], [0], [0], [1], [0, 0, 1, 1], [], []>} : vector<32x128xf32>, vector<128x128xf32>, vector<32x128xf32> -> vector<32x128xf32>
    %19 = arith.addf %15, %18 : vector<32x128xf32>
    %c2 = arith.constant 2 : index
    %c0_21 = arith.constant 0 : index
    %c0_22 = arith.constant 0 : index
    %20 = vector.load %arg3[%c2, %c0_21, %c0_22] : memref<3x128x128xf32, #tpu.memory_space<vmem>>, vector<1x128x128xf32>
    %21 = vector.shape_cast %20 : vector<1x128x128xf32> to vector<128x128xf32>
    %cst_23 = arith.constant dense<0.000000e+00> : vector<32x128xf32>
    %22 = tpu.matmul %12, %21, %cst_23 {dimension_numbers = #tpu.dot_dimension_numbers<[1], [0], [0], [1], [0, 0, 1, 1], [], []>} : vector<32x128xf32>, vector<128x128xf32>, vector<32x128xf32> -> vector<32x128xf32>
    %23 = arith.addf %19, %22 : vector<32x128xf32>
    %c0_24 = arith.constant 0 : index
    %c0_25 = arith.constant 0 : index
    %24 = vector.load %arg4[%c0_24, %c0_25] : memref<1x128xf32, #tpu.memory_space<vmem>>, vector<1x128xf32>
    %25 = vector.broadcast %24 : vector<1x128xf32> to vector<32x128xf32>
    %26 = arith.addf %23, %25 : vector<32x128xf32>
    %cst_26 = arith.constant 0.000000e+00 : f32
    %27 = vector.broadcast %cst_26 : f32 to vector<32x128xf32>
    %28 = arith.maximumf %26, %27 : vector<32x128xf32>
    %c0_27 = arith.constant 0 : index
    %c0_28 = arith.constant 0 : index
    %29 = vector.load %arg5[%c0_27, %c0_28] : memref<128x128xf32, #tpu.memory_space<vmem>>, vector<128x128xf32>
    %cst_29 = arith.constant dense<0.000000e+00> : vector<32x128xf32>
    %30 = tpu.matmul %28, %29, %cst_29 {dimension_numbers = #tpu.dot_dimension_numbers<[1], [0], [0], [1], [0, 0, 1, 1], [], []>} : vector<32x128xf32>, vector<128x128xf32>, vector<32x128xf32> -> vector<32x128xf32>
    %c0_30 = arith.constant 0 : index
    %c0_31 = arith.constant 0 : index
    %31 = vector.load %arg6[%c0_30, %c0_31] : memref<1x128xf32, #tpu.memory_space<vmem>>, vector<1x128xf32>
    %32 = vector.broadcast %31 : vector<1x128xf32> to vector<32x128xf32>
    %33 = arith.addf %30, %32 : vector<32x128xf32>
    %c0_32 = arith.constant 0 : index
    %c0_33 = arith.constant 0 : index
    %34 = vector.load %arg11[%c0_32, %c0_33] : memref<32x128xf32, #tpu.memory_space<vmem>>, vector<32x128xf32>
    tpu.vector_store %arg11[%c0_32, %c0_33], %33 {strides = array<i32>} : memref<32x128xf32, #tpu.memory_space<vmem>>, vector<32x128xf32>,
    %cst_34 = arith.constant 0.000000e+00 : f32
    %cst_35 = arith.constant 5.000000e-02 : f32
    %c0_i32 = arith.constant 0 : i32
    %35:3 = scf.while (%arg12 = %cst_34, %arg13 = %cst_35, %arg14 = %c0_i32) : (f32, f32, i32) -> (f32, f32, i32) {
      %cst_38 = arith.constant 0.99999988 : f32
      %38 = arith.cmpf olt, %arg12, %cst_38 : f32
      %c1000_i32 = arith.constant 1000 : i32
      %39 = arith.cmpi slt, %arg14, %c1000_i32 : i32
      %40 = arith.andi %38, %39 : i1
      scf.condition(%40) %arg12, %arg13, %arg14 : f32, f32, i32
    } do {
    ^bb0(%arg12: f32, %arg13: f32, %arg14: i32):
      %c0_38 = arith.constant 0 : index
      %c0_39 = arith.constant 0 : index
      %38 = vector.load %arg9[%c0_38, %c0_39] : memref<32x128xf32, #tpu.memory_space<vmem>>, vector<32x128xf32>
      %c0_40 = arith.constant 0 : index
      %c0_41 = arith.constant 0 : index
      %39 = vector.load %arg11[%c0_40, %c0_41] : memref<32x128xf32, #tpu.memory_space<vmem>>, vector<32x128xf32>
      %cst_42 = arith.constant 1.000000e+00 : f32
      %40 = arith.subf %cst_42, %arg12 : f32
      %41 = arith.minimumf %arg13, %40 : f32
      %cst_43 = arith.constant 2.000000e-01 : f32
      %42 = vector.broadcast %cst_43 : f32 to vector<32x128xf32>
      %43 = arith.mulf %42, %39 : vector<32x128xf32>
      %44 = vector.broadcast %41 : f32 to vector<32x128xf32>
      %45 = arith.mulf %44, %43 : vector<32x128xf32>
      %46 = arith.addf %38, %45 : vector<32x128xf32>
      %c0_44 = arith.constant 0 : index
      %c0_45 = arith.constant 0 : index
      %47 = vector.load %arg1[%c0_44, %c0_45] : memref<128x128xf32, #tpu.memory_space<vmem>>, vector<128x128xf32>
      %cst_46 = arith.constant dense<0.000000e+00> : vector<32x128xf32>
      %48 = tpu.matmul %46, %47, %cst_46 {dimension_numbers = #tpu.dot_dimension_numbers<[1], [0], [0], [1], [0, 0, 1, 1], [], []>} : vector<32x128xf32>, vector<128x128xf32>, vector<32x128xf32> -> vector<32x128xf32>
      %c0_47 = arith.constant 0 : index
      %c0_48 = arith.constant 0 : index
      %49 = vector.load %arg2[%c0_47, %c0_48] : memref<1x128xf32, #tpu.memory_space<vmem>>, vector<1x128xf32>
      %50 = vector.broadcast %49 : vector<1x128xf32> to vector<32x128xf32>
      %51 = arith.addf %48, %50 : vector<32x128xf32>
      %cst_49 = arith.constant 0.000000e+00 : f32
      %52 = vector.broadcast %cst_49 : f32 to vector<32x128xf32>
      %53 = arith.maximumf %51, %52 : vector<32x128xf32>
      %c0_50 = arith.constant 0 : index
      %c0_51 = arith.constant 0 : index
      %54 = vector.load %arg7[%c0_50, %c0_51] : memref<32x32xf32, #tpu.memory_space<vmem>>, vector<32x32xf32>
      %cst_52 = arith.constant dense<0.000000e+00> : vector<32x128xf32>
      %55 = tpu.matmul %54, %53, %cst_52 {dimension_numbers = #tpu.dot_dimension_numbers<[1], [0], [0], [1], [0, 0, 1, 1], [], []>} : vector<32x32xf32>, vector<32x128xf32>, vector<32x128xf32> -> vector<32x128xf32>
      %c0_53 = arith.constant 0 : index
      %c0_54 = arith.constant 0 : index
      %56 = vector.load %arg8[%c0_53, %c0_54] : memref<32x32xf32, #tpu.memory_space<vmem>>, vector<32x32xf32>
      %cst_55 = arith.constant dense<0.000000e+00> : vector<32x128xf32>
      %57 = tpu.matmul %56, %53, %cst_55 {dimension_numbers = #tpu.dot_dimension_numbers<[1], [0], [0], [1], [0, 0, 1, 1], [], []>} : vector<32x32xf32>, vector<32x128xf32>, vector<32x128xf32> -> vector<32x128xf32>
      %c0_56 = arith.constant 0 : index
      %c0_57 = arith.constant 0 : index
      %c0_58 = arith.constant 0 : index
      %58 = vector.load %arg3[%c0_56, %c0_57, %c0_58] : memref<3x128x128xf32, #tpu.memory_space<vmem>>, vector<1x128x128xf32>
      %59 = vector.shape_cast %58 : vector<1x128x128xf32> to vector<128x128xf32>
      %cst_59 = arith.constant dense<0.000000e+00> : vector<32x128xf32>
      %60 = tpu.matmul %55, %59, %cst_59 {dimension_numbers = #tpu.dot_dimension_numbers<[1], [0], [0], [1], [0, 0, 1, 1], [], []>} : vector<32x128xf32>, vector<128x128xf32>, vector<32x128xf32> -> vector<32x128xf32>
      %c1_60 = arith.constant 1 : index
      %c0_61 = arith.constant 0 : index
      %c0_62 = arith.constant 0 : index
      %61 = vector.load %arg3[%c1_60, %c0_61, %c0_62] : memref<3x128x128xf32, #tpu.memory_space<vmem>>, vector<1x128x128xf32>
      %62 = vector.shape_cast %61 : vector<1x128x128xf32> to vector<128x128xf32>
      %cst_63 = arith.constant dense<0.000000e+00> : vector<32x128xf32>
      %63 = tpu.matmul %53, %62, %cst_63 {dimension_numbers = #tpu.dot_dimension_numbers<[1], [0], [0], [1], [0, 0, 1, 1], [], []>} : vector<32x128xf32>, vector<128x128xf32>, vector<32x128xf32> -> vector<32x128xf32>
      %64 = arith.addf %60, %63 : vector<32x128xf32>
      %c2_64 = arith.constant 2 : index
      %c0_65 = arith.constant 0 : index
      %c0_66 = arith.constant 0 : index
      %65 = vector.load %arg3[%c2_64, %c0_65, %c0_66] : memref<3x128x128xf32, #tpu.memory_space<vmem>>, vector<1x128x128xf32>
      %66 = vector.shape_cast %65 : vector<1x128x128xf32> to vector<128x128xf32>
      %cst_67 = arith.constant dense<0.000000e+00> : vector<32x128xf32>
      %67 = tpu.matmul %57, %66, %cst_67 {dimension_numbers = #tpu.dot_dimension_numbers<[1], [0], [0], [1], [0, 0, 1, 1], [], []>} : vector<32x128xf32>, vector<128x128xf32>, vector<32x128xf32> -> vector<32x128xf32>
      %68 = arith.addf %64, %67 : vector<32x128xf32>
      %c0_68 = arith.constant 0 : index
      %c0_69 = arith.constant 0 : index
      %69 = vector.load %arg4[%c0_68, %c0_69] : memref<1x128xf32, #tpu.memory_space<vmem>>, vector<1x128xf32>
      %70 = vector.broadcast %69 : vector<1x128xf32> to vector<32x128xf32>
      %71 = arith.addf %68, %70 : vector<32x128xf32>
      %cst_70 = arith.constant 0.000000e+00 : f32
      %72 = vector.broadcast %cst_70 : f32 to vector<32x128xf32>
      %73 = arith.maximumf %71, %72 : vector<32x128xf32>
      %c0_71 = arith.constant 0 : index
      %c0_72 = arith.constant 0 : index
      %74 = vector.load %arg5[%c0_71, %c0_72] : memref<128x128xf32, #tpu.memory_space<vmem>>, vector<128x128xf32>
      %cst_73 = arith.constant dense<0.000000e+00> : vector<32x128xf32>
      %75 = tpu.matmul %73, %74, %cst_73 {dimension_numbers = #tpu.dot_dimension_numbers<[1], [0], [0], [1], [0, 0, 1, 1], [], []>} : vector<32x128xf32>, vector<128x128xf32>, vector<32x128xf32> -> vector<32x128xf32>
      %c0_74 = arith.constant 0 : index
      %c0_75 = arith.constant 0 : index
      %76 = vector.load %arg6[%c0_74, %c0_75] : memref<1x128xf32, #tpu.memory_space<vmem>>, vector<1x128xf32>
      %77 = vector.broadcast %76 : vector<1x128xf32> to vector<32x128xf32>
      %78 = arith.addf %75, %77 : vector<32x128xf32>
      %cst_76 = arith.constant 7.500000e-02 : f32
      %79 = vector.broadcast %cst_76 : f32 to vector<32x128xf32>
      %80 = arith.mulf %79, %39 : vector<32x128xf32>
      %cst_77 = arith.constant 2.250000e-01 : f32
      %81 = vector.broadcast %cst_77 : f32 to vector<32x128xf32>
      %82 = arith.mulf %81, %78 : vector<32x128xf32>
      %83 = arith.addf %80, %82 : vector<32x128xf32>
      %84 = vector.broadcast %41 : f32 to vector<32x128xf32>
      %85 = arith.mulf %84, %83 : vector<32x128xf32>
      %86 = arith.addf %38, %85 : vector<32x128xf32>
      %c0_78 = arith.constant 0 : index
      %c0_79 = arith.constant 0 : index
      %87 = vector.load %arg1[%c0_78, %c0_79] : memref<128x128xf32, #tpu.memory_space<vmem>>, vector<128x128xf32>
      %cst_80 = arith.constant dense<0.000000e+00> : vector<32x128xf32>
      %88 = tpu.matmul %86, %87, %cst_80 {dimension_numbers = #tpu.dot_dimension_numbers<[1], [0], [0], [1], [0, 0, 1, 1], [], []>} : vector<32x128xf32>, vector<128x128xf32>, vector<32x128xf32> -> vector<32x128xf32>
      %c0_81 = arith.constant 0 : index
      %c0_82 = arith.constant 0 : index
      %89 = vector.load %arg2[%c0_81, %c0_82] : memref<1x128xf32, #tpu.memory_space<vmem>>, vector<1x128xf32>
      %90 = vector.broadcast %89 : vector<1x128xf32> to vector<32x128xf32>
      %91 = arith.addf %88, %90 : vector<32x128xf32>
      %cst_83 = arith.constant 0.000000e+00 : f32
      %92 = vector.broadcast %cst_83 : f32 to vector<32x128xf32>
      %93 = arith.maximumf %91, %92 : vector<32x128xf32>
      %c0_84 = arith.constant 0 : index
      %c0_85 = arith.constant 0 : index
      %94 = vector.load %arg7[%c0_84, %c0_85] : memref<32x32xf32, #tpu.memory_space<vmem>>, vector<32x32xf32>
      %cst_86 = arith.constant dense<0.000000e+00> : vector<32x128xf32>
      %95 = tpu.matmul %94, %93, %cst_86 {dimension_numbers = #tpu.dot_dimension_numbers<[1], [0], [0], [1], [0, 0, 1, 1], [], []>} : vector<32x32xf32>, vector<32x128xf32>, vector<32x128xf32> -> vector<32x128xf32>
      %c0_87 = arith.constant 0 : index
      %c0_88 = arith.constant 0 : index
      %96 = vector.load %arg8[%c0_87, %c0_88] : memref<32x32xf32, #tpu.memory_space<vmem>>, vector<32x32xf32>
      %cst_89 = arith.constant dense<0.000000e+00> : vector<32x128xf32>
      %97 = tpu.matmul %96, %93, %cst_89 {dimension_numbers = #tpu.dot_dimension_numbers<[1], [0], [0], [1], [0, 0, 1, 1], [], []>} : vector<32x32xf32>, vector<32x128xf32>, vector<32x128xf32> -> vector<32x128xf32>
      %c0_90 = arith.constant 0 : index
      %c0_91 = arith.constant 0 : index
      %c0_92 = arith.constant 0 : index
      %98 = vector.load %arg3[%c0_90, %c0_91, %c0_92] : memref<3x128x128xf32, #tpu.memory_space<vmem>>, vector<1x128x128xf32>
      %99 = vector.shape_cast %98 : vector<1x128x128xf32> to vector<128x128xf32>
      %cst_93 = arith.constant dense<0.000000e+00> : vector<32x128xf32>
      %100 = tpu.matmul %95, %99, %cst_93 {dimension_numbers = #tpu.dot_dimension_numbers<[1], [0], [0], [1], [0, 0, 1, 1], [], []>} : vector<32x128xf32>, vector<128x128xf32>, vector<32x128xf32> -> vector<32x128xf32>
      %c1_94 = arith.constant 1 : index
      %c0_95 = arith.constant 0 : index
      %c0_96 = arith.constant 0 : index
      %101 = vector.load %arg3[%c1_94, %c0_95, %c0_96] : memref<3x128x128xf32, #tpu.memory_space<vmem>>, vector<1x128x128xf32>
      %102 = vector.shape_cast %101 : vector<1x128x128xf32> to vector<128x128xf32>
      %cst_97 = arith.constant dense<0.000000e+00> : vector<32x128xf32>
      %103 = tpu.matmul %93, %102, %cst_97 {dimension_numbers = #tpu.dot_dimension_numbers<[1], [0], [0], [1], [0, 0, 1, 1], [], []>} : vector<32x128xf32>, vector<128x128xf32>, vector<32x128xf32> -> vector<32x128xf32>
      %104 = arith.addf %100, %103 : vector<32x128xf32>
      %c2_98 = arith.constant 2 : index
      %c0_99 = arith.constant 0 : index
      %c0_100 = arith.constant 0 : index
      %105 = vector.load %arg3[%c2_98, %c0_99, %c0_100] : memref<3x128x128xf32, #tpu.memory_space<vmem>>, vector<1x128x128xf32>
      %106 = vector.shape_cast %105 : vector<1x128x128xf32> to vector<128x128xf32>
      %cst_101 = arith.constant dense<0.000000e+00> : vector<32x128xf32>
      %107 = tpu.matmul %97, %106, %cst_101 {dimension_numbers = #tpu.dot_dimension_numbers<[1], [0], [0], [1], [0, 0, 1, 1], [], []>} : vector<32x128xf32>, vector<128x128xf32>, vector<32x128xf32> -> vector<32x128xf32>
      %108 = arith.addf %104, %107 : vector<32x128xf32>
      %c0_102 = arith.constant 0 : index
      %c0_103 = arith.constant 0 : index
      %109 = vector.load %arg4[%c0_102, %c0_103] : memref<1x128xf32, #tpu.memory_space<vmem>>, vector<1x128xf32>
      %110 = vector.broadcast %109 : vector<1x128xf32> to vector<32x128xf32>
      %111 = arith.addf %108, %110 : vector<32x128xf32>
      %cst_104 = arith.constant 0.000000e+00 : f32
      %112 = vector.broadcast %cst_104 : f32 to vector<32x128xf32>
      %113 = arith.maximumf %111, %112 : vector<32x128xf32>
      %c0_105 = arith.constant 0 : index
      %c0_106 = arith.constant 0 : index
      %114 = vector.load %arg5[%c0_105, %c0_106] : memref<128x128xf32, #tpu.memory_space<vmem>>, vector<128x128xf32>
      %cst_107 = arith.constant dense<0.000000e+00> : vector<32x128xf32>
      %115 = tpu.matmul %113, %114, %cst_107 {dimension_numbers = #tpu.dot_dimension_numbers<[1], [0], [0], [1], [0, 0, 1, 1], [], []>} : vector<32x128xf32>, vector<128x128xf32>, vector<32x128xf32> -> vector<32x128xf32>
      %c0_108 = arith.constant 0 : index
      %c0_109 = arith.constant 0 : index
      %116 = vector.load %arg6[%c0_108, %c0_109] : memref<1x128xf32, #tpu.memory_space<vmem>>, vector<1x128xf32>
      %117 = vector.broadcast %116 : vector<1x128xf32> to vector<32x128xf32>
      %118 = arith.addf %115, %117 : vector<32x128xf32>
      %cst_110 = arith.constant 0.977777779 : f32
      %119 = vector.broadcast %cst_110 : f32 to vector<32x128xf32>
      %120 = arith.mulf %119, %39 : vector<32x128xf32>
      %cst_111 = arith.constant -3.73333335 : f32
      %121 = vector.broadcast %cst_111 : f32 to vector<32x128xf32>
      %122 = arith.mulf %121, %78 : vector<32x128xf32>
      %123 = arith.addf %120, %122 : vector<32x128xf32>
      %cst_112 = arith.constant 3.55555558 : f32
      %124 = vector.broadcast %cst_112 : f32 to vector<32x128xf32>
      %125 = arith.mulf %124, %118 : vector<32x128xf32>
      %126 = arith.addf %123, %125 : vector<32x128xf32>
      %127 = vector.broadcast %41 : f32 to vector<32x128xf32>
      %128 = arith.mulf %127, %126 : vector<32x128xf32>
      %129 = arith.addf %38, %128 : vector<32x128xf32>
      %c0_113 = arith.constant 0 : index
      %c0_114 = arith.constant 0 : index
      %130 = vector.load %arg1[%c0_113, %c0_114] : memref<128x128xf32, #tpu.memory_space<vmem>>, vector<128x128xf32>
      %cst_115 = arith.constant dense<0.000000e+00> : vector<32x128xf32>
      %131 = tpu.matmul %129, %130, %cst_115 {dimension_numbers = #tpu.dot_dimension_numbers<[1], [0], [0], [1], [0, 0, 1, 1], [], []>} : vector<32x128xf32>, vector<128x128xf32>, vector<32x128xf32> -> vector<32x128xf32>
      %c0_116 = arith.constant 0 : index
      %c0_117 = arith.constant 0 : index
      %132 = vector.load %arg2[%c0_116, %c0_117] : memref<1x128xf32, #tpu.memory_space<vmem>>, vector<1x128xf32>
      %133 = vector.broadcast %132 : vector<1x128xf32> to vector<32x128xf32>
      %134 = arith.addf %131, %133 : vector<32x128xf32>
      %cst_118 = arith.constant 0.000000e+00 : f32
      %135 = vector.broadcast %cst_118 : f32 to vector<32x128xf32>
      %136 = arith.maximumf %134, %135 : vector<32x128xf32>
      %c0_119 = arith.constant 0 : index
      %c0_120 = arith.constant 0 : index
      %137 = vector.load %arg7[%c0_119, %c0_120] : memref<32x32xf32, #tpu.memory_space<vmem>>, vector<32x32xf32>
      %cst_121 = arith.constant dense<0.000000e+00> : vector<32x128xf32>
      %138 = tpu.matmul %137, %136, %cst_121 {dimension_numbers = #tpu.dot_dimension_numbers<[1], [0], [0], [1], [0, 0, 1, 1], [], []>} : vector<32x32xf32>, vector<32x128xf32>, vector<32x128xf32> -> vector<32x128xf32>
      %c0_122 = arith.constant 0 : index
      %c0_123 = arith.constant 0 : index
      %139 = vector.load %arg8[%c0_122, %c0_123] : memref<32x32xf32, #tpu.memory_space<vmem>>, vector<32x32xf32>
      %cst_124 = arith.constant dense<0.000000e+00> : vector<32x128xf32>
      %140 = tpu.matmul %139, %136, %cst_124 {dimension_numbers = #tpu.dot_dimension_numbers<[1], [0], [0], [1], [0, 0, 1, 1], [], []>} : vector<32x32xf32>, vector<32x128xf32>, vector<32x128xf32> -> vector<32x128xf32>
      %c0_125 = arith.constant 0 : index
      %c0_126 = arith.constant 0 : index
      %c0_127 = arith.constant 0 : index
      %141 = vector.load %arg3[%c0_125, %c0_126, %c0_127] : memref<3x128x128xf32, #tpu.memory_space<vmem>>, vector<1x128x128xf32>
      %142 = vector.shape_cast %141 : vector<1x128x128xf32> to vector<128x128xf32>
      %cst_128 = arith.constant dense<0.000000e+00> : vector<32x128xf32>
      %143 = tpu.matmul %138, %142, %cst_128 {dimension_numbers = #tpu.dot_dimension_numbers<[1], [0], [0], [1], [0, 0, 1, 1], [], []>} : vector<32x128xf32>, vector<128x128xf32>, vector<32x128xf32> -> vector<32x128xf32>
      %c1_129 = arith.constant 1 : index
      %c0_130 = arith.constant 0 : index
      %c0_131 = arith.constant 0 : index
      %144 = vector.load %arg3[%c1_129, %c0_130, %c0_131] : memref<3x128x128xf32, #tpu.memory_space<vmem>>, vector<1x128x128xf32>
      %145 = vector.shape_cast %144 : vector<1x128x128xf32> to vector<128x128xf32>
      %cst_132 = arith.constant dense<0.000000e+00> : vector<32x128xf32>
      %146 = tpu.matmul %136, %145, %cst_132 {dimension_numbers = #tpu.dot_dimension_numbers<[1], [0], [0], [1], [0, 0, 1, 1], [], []>} : vector<32x128xf32>, vector<128x128xf32>, vector<32x128xf32> -> vector<32x128xf32>
      %147 = arith.addf %143, %146 : vector<32x128xf32>
      %c2_133 = arith.constant 2 : index
      %c0_134 = arith.constant 0 : index
      %c0_135 = arith.constant 0 : index
      %148 = vector.load %arg3[%c2_133, %c0_134, %c0_135] : memref<3x128x128xf32, #tpu.memory_space<vmem>>, vector<1x128x128xf32>
      %149 = vector.shape_cast %148 : vector<1x128x128xf32> to vector<128x128xf32>
      %cst_136 = arith.constant dense<0.000000e+00> : vector<32x128xf32>
      %150 = tpu.matmul %140, %149, %cst_136 {dimension_numbers = #tpu.dot_dimension_numbers<[1], [0], [0], [1], [0, 0, 1, 1], [], []>} : vector<32x128xf32>, vector<128x128xf32>, vector<32x128xf32> -> vector<32x128xf32>
      %151 = arith.addf %147, %150 : vector<32x128xf32>
      %c0_137 = arith.constant 0 : index
      %c0_138 = arith.constant 0 : index
      %152 = vector.load %arg4[%c0_137, %c0_138] : memref<1x128xf32, #tpu.memory_space<vmem>>, vector<1x128xf32>
      %153 = vector.broadcast %152 : vector<1x128xf32> to vector<32x128xf32>
      %154 = arith.addf %151, %153 : vector<32x128xf32>
      %cst_139 = arith.constant 0.000000e+00 : f32
      %155 = vector.broadcast %cst_139 : f32 to vector<32x128xf32>
      %156 = arith.maximumf %154, %155 : vector<32x128xf32>
      %c0_140 = arith.constant 0 : index
      %c0_141 = arith.constant 0 : index
      %157 = vector.load %arg5[%c0_140, %c0_141] : memref<128x128xf32, #tpu.memory_space<vmem>>, vector<128x128xf32>
      %cst_142 = arith.constant dense<0.000000e+00> : vector<32x128xf32>
      %158 = tpu.matmul %156, %157, %cst_142 {dimension_numbers = #tpu.dot_dimension_numbers<[1], [0], [0], [1], [0, 0, 1, 1], [], []>} : vector<32x128xf32>, vector<128x128xf32>, vector<32x128xf32> -> vector<32x128xf32>
      %c0_143 = arith.constant 0 : index
      %c0_144 = arith.constant 0 : index
      %159 = vector.load %arg6[%c0_143, %c0_144] : memref<1x128xf32, #tpu.memory_space<vmem>>, vector<1x128xf32>
      %160 = vector.broadcast %159 : vector<1x128xf32> to vector<32x128xf32>
      %161 = arith.addf %158, %160 : vector<32x128xf32>
      %cst_145 = arith.constant 2.95259857 : f32
      %162 = vector.broadcast %cst_145 : f32 to vector<32x128xf32>
      %163 = arith.mulf %162, %39 : vector<32x128xf32>
      %cst_146 = arith.constant -11.5957937 : f32
      %164 = vector.broadcast %cst_146 : f32 to vector<32x128xf32>
      %165 = arith.mulf %164, %78 : vector<32x128xf32>
      %166 = arith.addf %163, %165 : vector<32x128xf32>
      %cst_147 = arith.constant 9.82289314 : f32
      %167 = vector.broadcast %cst_147 : f32 to vector<32x128xf32>
      %168 = arith.mulf %167, %118 : vector<32x128xf32>
      %169 = arith.addf %166, %168 : vector<32x128xf32>
      %cst_148 = arith.constant -0.290809333 : f32
      %170 = vector.broadcast %cst_148 : f32 to vector<32x128xf32>
      %171 = arith.mulf %170, %161 : vector<32x128xf32>
      %172 = arith.addf %169, %171 : vector<32x128xf32>
      %173 = vector.broadcast %41 : f32 to vector<32x128xf32>
      %174 = arith.mulf %173, %172 : vector<32x128xf32>
      %175 = arith.addf %38, %174 : vector<32x128xf32>
      %c0_149 = arith.constant 0 : index
      %c0_150 = arith.constant 0 : index
      %176 = vector.load %arg1[%c0_149, %c0_150] : memref<128x128xf32, #tpu.memory_space<vmem>>, vector<128x128xf32>
      %cst_151 = arith.constant dense<0.000000e+00> : vector<32x128xf32>
      %177 = tpu.matmul %175, %176, %cst_151 {dimension_numbers = #tpu.dot_dimension_numbers<[1], [0], [0], [1], [0, 0, 1, 1], [], []>} : vector<32x128xf32>, vector<128x128xf32>, vector<32x128xf32> -> vector<32x128xf32>
      %c0_152 = arith.constant 0 : index
      %c0_153 = arith.constant 0 : index
      %178 = vector.load %arg2[%c0_152, %c0_153] : memref<1x128xf32, #tpu.memory_space<vmem>>, vector<1x128xf32>
      %179 = vector.broadcast %178 : vector<1x128xf32> to vector<32x128xf32>
      %180 = arith.addf %177, %179 : vector<32x128xf32>
      %cst_154 = arith.constant 0.000000e+00 : f32
      %181 = vector.broadcast %cst_154 : f32 to vector<32x128xf32>
      %182 = arith.maximumf %180, %181 : vector<32x128xf32>
      %c0_155 = arith.constant 0 : index
      %c0_156 = arith.constant 0 : index
      %183 = vector.load %arg7[%c0_155, %c0_156] : memref<32x32xf32, #tpu.memory_space<vmem>>, vector<32x32xf32>
      %cst_157 = arith.constant dense<0.000000e+00> : vector<32x128xf32>
      %184 = tpu.matmul %183, %182, %cst_157 {dimension_numbers = #tpu.dot_dimension_numbers<[1], [0], [0], [1], [0, 0, 1, 1], [], []>} : vector<32x32xf32>, vector<32x128xf32>, vector<32x128xf32> -> vector<32x128xf32>
      %c0_158 = arith.constant 0 : index
      %c0_159 = arith.constant 0 : index
      %185 = vector.load %arg8[%c0_158, %c0_159] : memref<32x32xf32, #tpu.memory_space<vmem>>, vector<32x32xf32>
      %cst_160 = arith.constant dense<0.000000e+00> : vector<32x128xf32>
      %186 = tpu.matmul %185, %182, %cst_160 {dimension_numbers = #tpu.dot_dimension_numbers<[1], [0], [0], [1], [0, 0, 1, 1], [], []>} : vector<32x32xf32>, vector<32x128xf32>, vector<32x128xf32> -> vector<32x128xf32>
      %c0_161 = arith.constant 0 : index
      %c0_162 = arith.constant 0 : index
      %c0_163 = arith.constant 0 : index
      %187 = vector.load %arg3[%c0_161, %c0_162, %c0_163] : memref<3x128x128xf32, #tpu.memory_space<vmem>>, vector<1x128x128xf32>
      %188 = vector.shape_cast %187 : vector<1x128x128xf32> to vector<128x128xf32>
      %cst_164 = arith.constant dense<0.000000e+00> : vector<32x128xf32>
      %189 = tpu.matmul %184, %188, %cst_164 {dimension_numbers = #tpu.dot_dimension_numbers<[1], [0], [0], [1], [0, 0, 1, 1], [], []>} : vector<32x128xf32>, vector<128x128xf32>, vector<32x128xf32> -> vector<32x128xf32>
      %c1_165 = arith.constant 1 : index
      %c0_166 = arith.constant 0 : index
      %c0_167 = arith.constant 0 : index
      %190 = vector.load %arg3[%c1_165, %c0_166, %c0_167] : memref<3x128x128xf32, #tpu.memory_space<vmem>>, vector<1x128x128xf32>
      %191 = vector.shape_cast %190 : vector<1x128x128xf32> to vector<128x128xf32>
      %cst_168 = arith.constant dense<0.000000e+00> : vector<32x128xf32>
      %192 = tpu.matmul %182, %191, %cst_168 {dimension_numbers = #tpu.dot_dimension_numbers<[1], [0], [0], [1], [0, 0, 1, 1], [], []>} : vector<32x128xf32>, vector<128x128xf32>, vector<32x128xf32> -> vector<32x128xf32>
      %193 = arith.addf %189, %192 : vector<32x128xf32>
      %c2_169 = arith.constant 2 : index
      %c0_170 = arith.constant 0 : index
      %c0_171 = arith.constant 0 : index
      %194 = vector.load %arg3[%c2_169, %c0_170, %c0_171] : memref<3x128x128xf32, #tpu.memory_space<vmem>>, vector<1x128x128xf32>
      %195 = vector.shape_cast %194 : vector<1x128x128xf32> to vector<128x128xf32>
      %cst_172 = arith.constant dense<0.000000e+00> : vector<32x128xf32>
      %196 = tpu.matmul %186, %195, %cst_172 {dimension_numbers = #tpu.dot_dimension_numbers<[1], [0], [0], [1], [0, 0, 1, 1], [], []>} : vector<32x128xf32>, vector<128x128xf32>, vector<32x128xf32> -> vector<32x128xf32>
      %197 = arith.addf %193, %196 : vector<32x128xf32>
      %c0_173 = arith.constant 0 : index
      %c0_174 = arith.constant 0 : index
      %198 = vector.load %arg4[%c0_173, %c0_174] : memref<1x128xf32, #tpu.memory_space<vmem>>, vector<1x128xf32>
      %199 = vector.broadcast %198 : vector<1x128xf32> to vector<32x128xf32>
      %200 = arith.addf %197, %199 : vector<32x128xf32>
      %cst_175 = arith.constant 0.000000e+00 : f32
      %201 = vector.broadcast %cst_175 : f32 to vector<32x128xf32>
      %202 = arith.maximumf %200, %201 : vector<32x128xf32>
      %c0_176 = arith.constant 0 : index
      %c0_177 = arith.constant 0 : index
      %203 = vector.load %arg5[%c0_176, %c0_177] : memref<128x128xf32, #tpu.memory_space<vmem>>, vector<128x128xf32>
      %cst_178 = arith.constant dense<0.000000e+00> : vector<32x128xf32>
      %204 = tpu.matmul %202, %203, %cst_178 {dimension_numbers = #tpu.dot_dimension_numbers<[1], [0], [0], [1], [0, 0, 1, 1], [], []>} : vector<32x128xf32>, vector<128x128xf32>, vector<32x128xf32> -> vector<32x128xf32>
      %c0_179 = arith.constant 0 : index
      %c0_180 = arith.constant 0 : index
      %205 = vector.load %arg6[%c0_179, %c0_180] : memref<1x128xf32, #tpu.memory_space<vmem>>, vector<1x128xf32>
      %206 = vector.broadcast %205 : vector<1x128xf32> to vector<32x128xf32>
      %207 = arith.addf %204, %206 : vector<32x128xf32>
      %cst_181 = arith.constant 2.84627533 : f32
      %208 = vector.broadcast %cst_181 : f32 to vector<32x128xf32>
      %209 = arith.mulf %208, %39 : vector<32x128xf32>
      %cst_182 = arith.constant -10.757576 : f32
      %210 = vector.broadcast %cst_182 : f32 to vector<32x128xf32>
      %211 = arith.mulf %210, %78 : vector<32x128xf32>
      %212 = arith.addf %209, %211 : vector<32x128xf32>
      %cst_183 = arith.constant 8.90642261 : f32
      %213 = vector.broadcast %cst_183 : f32 to vector<32x128xf32>
      %214 = arith.mulf %213, %118 : vector<32x128xf32>
      %215 = arith.addf %212, %214 : vector<32x128xf32>
      %cst_184 = arith.constant 0.278409094 : f32
      %216 = vector.broadcast %cst_184 : f32 to vector<32x128xf32>
      %217 = arith.mulf %216, %161 : vector<32x128xf32>
      %218 = arith.addf %215, %217 : vector<32x128xf32>
      %cst_185 = arith.constant -0.273531318 : f32
      %219 = vector.broadcast %cst_185 : f32 to vector<32x128xf32>
      %220 = arith.mulf %219, %207 : vector<32x128xf32>
      %221 = arith.addf %218, %220 : vector<32x128xf32>
      %222 = vector.broadcast %41 : f32 to vector<32x128xf32>
      %223 = arith.mulf %222, %221 : vector<32x128xf32>
      %224 = arith.addf %38, %223 : vector<32x128xf32>
      %c0_186 = arith.constant 0 : index
      %c0_187 = arith.constant 0 : index
      %225 = vector.load %arg1[%c0_186, %c0_187] : memref<128x128xf32, #tpu.memory_space<vmem>>, vector<128x128xf32>
      %cst_188 = arith.constant dense<0.000000e+00> : vector<32x128xf32>
      %226 = tpu.matmul %224, %225, %cst_188 {dimension_numbers = #tpu.dot_dimension_numbers<[1], [0], [0], [1], [0, 0, 1, 1], [], []>} : vector<32x128xf32>, vector<128x128xf32>, vector<32x128xf32> -> vector<32x128xf32>
      %c0_189 = arith.constant 0 : index
      %c0_190 = arith.constant 0 : index
      %227 = vector.load %arg2[%c0_189, %c0_190] : memref<1x128xf32, #tpu.memory_space<vmem>>, vector<1x128xf32>
      %228 = vector.broadcast %227 : vector<1x128xf32> to vector<32x128xf32>
      %229 = arith.addf %226, %228 : vector<32x128xf32>
      %cst_191 = arith.constant 0.000000e+00 : f32
      %230 = vector.broadcast %cst_191 : f32 to vector<32x128xf32>
      %231 = arith.maximumf %229, %230 : vector<32x128xf32>
      %c0_192 = arith.constant 0 : index
      %c0_193 = arith.constant 0 : index
      %232 = vector.load %arg7[%c0_192, %c0_193] : memref<32x32xf32, #tpu.memory_space<vmem>>, vector<32x32xf32>
      %cst_194 = arith.constant dense<0.000000e+00> : vector<32x128xf32>
      %233 = tpu.matmul %232, %231, %cst_194 {dimension_numbers = #tpu.dot_dimension_numbers<[1], [0], [0], [1], [0, 0, 1, 1], [], []>} : vector<32x32xf32>, vector<32x128xf32>, vector<32x128xf32> -> vector<32x128xf32>
      %c0_195 = arith.constant 0 : index
      %c0_196 = arith.constant 0 : index
      %234 = vector.load %arg8[%c0_195, %c0_196] : memref<32x32xf32, #tpu.memory_space<vmem>>, vector<32x32xf32>
      %cst_197 = arith.constant dense<0.000000e+00> : vector<32x128xf32>
      %235 = tpu.matmul %234, %231, %cst_197 {dimension_numbers = #tpu.dot_dimension_numbers<[1], [0], [0], [1], [0, 0, 1, 1], [], []>} : vector<32x32xf32>, vector<32x128xf32>, vector<32x128xf32> -> vector<32x128xf32>
      %c0_198 = arith.constant 0 : index
      %c0_199 = arith.constant 0 : index
      %c0_200 = arith.constant 0 : index
      %236 = vector.load %arg3[%c0_198, %c0_199, %c0_200] : memref<3x128x128xf32, #tpu.memory_space<vmem>>, vector<1x128x128xf32>
      %237 = vector.shape_cast %236 : vector<1x128x128xf32> to vector<128x128xf32>
      %cst_201 = arith.constant dense<0.000000e+00> : vector<32x128xf32>
      %238 = tpu.matmul %233, %237, %cst_201 {dimension_numbers = #tpu.dot_dimension_numbers<[1], [0], [0], [1], [0, 0, 1, 1], [], []>} : vector<32x128xf32>, vector<128x128xf32>, vector<32x128xf32> -> vector<32x128xf32>
      %c1_202 = arith.constant 1 : index
      %c0_203 = arith.constant 0 : index
      %c0_204 = arith.constant 0 : index
      %239 = vector.load %arg3[%c1_202, %c0_203, %c0_204] : memref<3x128x128xf32, #tpu.memory_space<vmem>>, vector<1x128x128xf32>
      %240 = vector.shape_cast %239 : vector<1x128x128xf32> to vector<128x128xf32>
      %cst_205 = arith.constant dense<0.000000e+00> : vector<32x128xf32>
      %241 = tpu.matmul %231, %240, %cst_205 {dimension_numbers = #tpu.dot_dimension_numbers<[1], [0], [0], [1], [0, 0, 1, 1], [], []>} : vector<32x128xf32>, vector<128x128xf32>, vector<32x128xf32> -> vector<32x128xf32>
      %242 = arith.addf %238, %241 : vector<32x128xf32>
      %c2_206 = arith.constant 2 : index
      %c0_207 = arith.constant 0 : index
      %c0_208 = arith.constant 0 : index
      %243 = vector.load %arg3[%c2_206, %c0_207, %c0_208] : memref<3x128x128xf32, #tpu.memory_space<vmem>>, vector<1x128x128xf32>
      %244 = vector.shape_cast %243 : vector<1x128x128xf32> to vector<128x128xf32>
      %cst_209 = arith.constant dense<0.000000e+00> : vector<32x128xf32>
      %245 = tpu.matmul %235, %244, %cst_209 {dimension_numbers = #tpu.dot_dimension_numbers<[1], [0], [0], [1], [0, 0, 1, 1], [], []>} : vector<32x128xf32>, vector<128x128xf32>, vector<32x128xf32> -> vector<32x128xf32>
      %246 = arith.addf %242, %245 : vector<32x128xf32>
      %c0_210 = arith.constant 0 : index
      %c0_211 = arith.constant 0 : index
      %247 = vector.load %arg4[%c0_210, %c0_211] : memref<1x128xf32, #tpu.memory_space<vmem>>, vector<1x128xf32>
      %248 = vector.broadcast %247 : vector<1x128xf32> to vector<32x128xf32>
      %249 = arith.addf %246, %248 : vector<32x128xf32>
      %cst_212 = arith.constant 0.000000e+00 : f32
      %250 = vector.broadcast %cst_212 : f32 to vector<32x128xf32>
      %251 = arith.maximumf %249, %250 : vector<32x128xf32>
      %c0_213 = arith.constant 0 : index
      %c0_214 = arith.constant 0 : index
      %252 = vector.load %arg5[%c0_213, %c0_214] : memref<128x128xf32, #tpu.memory_space<vmem>>, vector<128x128xf32>
      %cst_215 = arith.constant dense<0.000000e+00> : vector<32x128xf32>
      %253 = tpu.matmul %251, %252, %cst_215 {dimension_numbers = #tpu.dot_dimension_numbers<[1], [0], [0], [1], [0, 0, 1, 1], [], []>} : vector<32x128xf32>, vector<128x128xf32>, vector<32x128xf32> -> vector<32x128xf32>
      %c0_216 = arith.constant 0 : index
      %c0_217 = arith.constant 0 : index
      %254 = vector.load %arg6[%c0_216, %c0_217] : memref<1x128xf32, #tpu.memory_space<vmem>>, vector<1x128xf32>
      %255 = vector.broadcast %254 : vector<1x128xf32> to vector<32x128xf32>
      %256 = arith.addf %253, %255 : vector<32x128xf32>
      %cst_218 = arith.constant 0.0911458358 : f32
      %257 = vector.broadcast %cst_218 : f32 to vector<32x128xf32>
      %258 = arith.mulf %257, %39 : vector<32x128xf32>
      %cst_219 = arith.constant 0.449236304 : f32
      %259 = vector.broadcast %cst_219 : f32 to vector<32x128xf32>
      %260 = arith.mulf %259, %118 : vector<32x128xf32>
      %261 = arith.addf %258, %260 : vector<32x128xf32>
      %cst_220 = arith.constant 0.651041686 : f32
      %262 = vector.broadcast %cst_220 : f32 to vector<32x128xf32>
      %263 = arith.mulf %262, %161 : vector<32x128xf32>
      %264 = arith.addf %261, %263 : vector<32x128xf32>
      %cst_221 = arith.constant -0.322376192 : f32
      %265 = vector.broadcast %cst_221 : f32 to vector<32x128xf32>
      %266 = arith.mulf %265, %207 : vector<32x128xf32>
      %267 = arith.addf %264, %266 : vector<32x128xf32>
      %cst_222 = arith.constant 0.130952388 : f32
      %268 = vector.broadcast %cst_222 : f32 to vector<32x128xf32>
      %269 = arith.mulf %268, %256 : vector<32x128xf32>
      %270 = arith.addf %267, %269 : vector<32x128xf32>
      %271 = vector.broadcast %41 : f32 to vector<32x128xf32>
      %272 = arith.mulf %271, %270 : vector<32x128xf32>
      %273 = arith.addf %38, %272 : vector<32x128xf32>
      %c0_223 = arith.constant 0 : index
      %c0_224 = arith.constant 0 : index
      %274 = vector.load %arg1[%c0_223, %c0_224] : memref<128x128xf32, #tpu.memory_space<vmem>>, vector<128x128xf32>
      %cst_225 = arith.constant dense<0.000000e+00> : vector<32x128xf32>
      %275 = tpu.matmul %273, %274, %cst_225 {dimension_numbers = #tpu.dot_dimension_numbers<[1], [0], [0], [1], [0, 0, 1, 1], [], []>} : vector<32x128xf32>, vector<128x128xf32>, vector<32x128xf32> -> vector<32x128xf32>
      %c0_226 = arith.constant 0 : index
      %c0_227 = arith.constant 0 : index
      %276 = vector.load %arg2[%c0_226, %c0_227] : memref<1x128xf32, #tpu.memory_space<vmem>>, vector<1x128xf32>
      %277 = vector.broadcast %276 : vector<1x128xf32> to vector<32x128xf32>
      %278 = arith.addf %275, %277 : vector<32x128xf32>
      %cst_228 = arith.constant 0.000000e+00 : f32
      %279 = vector.broadcast %cst_228 : f32 to vector<32x128xf32>
      %280 = arith.maximumf %278, %279 : vector<32x128xf32>
      %c0_229 = arith.constant 0 : index
      %c0_230 = arith.constant 0 : index
      %281 = vector.load %arg7[%c0_229, %c0_230] : memref<32x32xf32, #tpu.memory_space<vmem>>, vector<32x32xf32>
      %cst_231 = arith.constant dense<0.000000e+00> : vector<32x128xf32>
      %282 = tpu.matmul %281, %280, %cst_231 {dimension_numbers = #tpu.dot_dimension_numbers<[1], [0], [0], [1], [0, 0, 1, 1], [], []>} : vector<32x32xf32>, vector<32x128xf32>, vector<32x128xf32> -> vector<32x128xf32>
      %c0_232 = arith.constant 0 : index
      %c0_233 = arith.constant 0 : index
      %283 = vector.load %arg8[%c0_232, %c0_233] : memref<32x32xf32, #tpu.memory_space<vmem>>, vector<32x32xf32>
      %cst_234 = arith.constant dense<0.000000e+00> : vector<32x128xf32>
      %284 = tpu.matmul %283, %280, %cst_234 {dimension_numbers = #tpu.dot_dimension_numbers<[1], [0], [0], [1], [0, 0, 1, 1], [], []>} : vector<32x32xf32>, vector<32x128xf32>, vector<32x128xf32> -> vector<32x128xf32>
      %c0_235 = arith.constant 0 : index
      %c0_236 = arith.constant 0 : index
      %c0_237 = arith.constant 0 : index
      %285 = vector.load %arg3[%c0_235, %c0_236, %c0_237] : memref<3x128x128xf32, #tpu.memory_space<vmem>>, vector<1x128x128xf32>
      %286 = vector.shape_cast %285 : vector<1x128x128xf32> to vector<128x128xf32>
      %cst_238 = arith.constant dense<0.000000e+00> : vector<32x128xf32>
      %287 = tpu.matmul %282, %286, %cst_238 {dimension_numbers = #tpu.dot_dimension_numbers<[1], [0], [0], [1], [0, 0, 1, 1], [], []>} : vector<32x128xf32>, vector<128x128xf32>, vector<32x128xf32> -> vector<32x128xf32>
      %c1_239 = arith.constant 1 : index
      %c0_240 = arith.constant 0 : index
      %c0_241 = arith.constant 0 : index
      %288 = vector.load %arg3[%c1_239, %c0_240, %c0_241] : memref<3x128x128xf32, #tpu.memory_space<vmem>>, vector<1x128x128xf32>
      %289 = vector.shape_cast %288 : vector<1x128x128xf32> to vector<128x128xf32>
      %cst_242 = arith.constant dense<0.000000e+00> : vector<32x128xf32>
      %290 = tpu.matmul %280, %289, %cst_242 {dimension_numbers = #tpu.dot_dimension_numbers<[1], [0], [0], [1], [0, 0, 1, 1], [], []>} : vector<32x128xf32>, vector<128x128xf32>, vector<32x128xf32> -> vector<32x128xf32>
      %291 = arith.addf %287, %290 : vector<32x128xf32>
      %c2_243 = arith.constant 2 : index
      %c0_244 = arith.constant 0 : index
      %c0_245 = arith.constant 0 : index
      %292 = vector.load %arg3[%c2_243, %c0_244, %c0_245] : memref<3x128x128xf32, #tpu.memory_space<vmem>>, vector<1x128x128xf32>
      %293 = vector.shape_cast %292 : vector<1x128x128xf32> to vector<128x128xf32>
      %cst_246 = arith.constant dense<0.000000e+00> : vector<32x128xf32>
      %294 = tpu.matmul %284, %293, %cst_246 {dimension_numbers = #tpu.dot_dimension_numbers<[1], [0], [0], [1], [0, 0, 1, 1], [], []>} : vector<32x128xf32>, vector<128x128xf32>, vector<32x128xf32> -> vector<32x128xf32>
      %295 = arith.addf %291, %294 : vector<32x128xf32>
      %c0_247 = arith.constant 0 : index
      %c0_248 = arith.constant 0 : index
      %296 = vector.load %arg4[%c0_247, %c0_248] : memref<1x128xf32, #tpu.memory_space<vmem>>, vector<1x128xf32>
      %297 = vector.broadcast %296 : vector<1x128xf32> to vector<32x128xf32>
      %298 = arith.addf %295, %297 : vector<32x128xf32>
      %cst_249 = arith.constant 0.000000e+00 : f32
      %299 = vector.broadcast %cst_249 : f32 to vector<32x128xf32>
      %300 = arith.maximumf %298, %299 : vector<32x128xf32>
      %c0_250 = arith.constant 0 : index
      %c0_251 = arith.constant 0 : index
      %301 = vector.load %arg5[%c0_250, %c0_251] : memref<128x128xf32, #tpu.memory_space<vmem>>, vector<128x128xf32>
      %cst_252 = arith.constant dense<0.000000e+00> : vector<32x128xf32>
      %302 = tpu.matmul %300, %301, %cst_252 {dimension_numbers = #tpu.dot_dimension_numbers<[1], [0], [0], [1], [0, 0, 1, 1], [], []>} : vector<32x128xf32>, vector<128x128xf32>, vector<32x128xf32> -> vector<32x128xf32>
      %c0_253 = arith.constant 0 : index
      %c0_254 = arith.constant 0 : index
      %303 = vector.load %arg6[%c0_253, %c0_254] : memref<1x128xf32, #tpu.memory_space<vmem>>, vector<1x128xf32>
      %304 = vector.broadcast %303 : vector<1x128xf32> to vector<32x128xf32>
      %305 = arith.addf %302, %304 : vector<32x128xf32>
      %cst_255 = arith.constant 0.00123263884 : f32
      %306 = vector.broadcast %cst_255 : f32 to vector<32x128xf32>
      %307 = arith.mulf %306, %39 : vector<32x128xf32>
      %cst_256 = arith.constant -0.00425277045 : f32
      %308 = vector.broadcast %cst_256 : f32 to vector<32x128xf32>
      %309 = arith.mulf %308, %118 : vector<32x128xf32>
      %310 = arith.addf %307, %309 : vector<32x128xf32>
      %cst_257 = arith.constant 0.0369791649 : f32
      %311 = vector.broadcast %cst_257 : f32 to vector<32x128xf32>
      %312 = arith.mulf %311, %161 : vector<32x128xf32>
      %313 = arith.addf %310, %312 : vector<32x128xf32>
      %cst_258 = arith.constant -5.086380e-02 : f32
      %314 = vector.broadcast %cst_258 : f32 to vector<32x128xf32>
      %315 = arith.mulf %314, %207 : vector<32x128xf32>
      %316 = arith.addf %313, %315 : vector<32x128xf32>
      %cst_259 = arith.constant 0.0419047624 : f32
      %317 = vector.broadcast %cst_259 : f32 to vector<32x128xf32>
      %318 = arith.mulf %317, %256 : vector<32x128xf32>
      %319 = arith.addf %316, %318 : vector<32x128xf32>
      %cst_260 = arith.constant -2.500000e-02 : f32
      %320 = vector.broadcast %cst_260 : f32 to vector<32x128xf32>
      %321 = arith.mulf %320, %305 : vector<32x128xf32>
      %322 = arith.addf %319, %321 : vector<32x128xf32>
      %323 = vector.broadcast %41 : f32 to vector<32x128xf32>
      %324 = arith.mulf %323, %322 : vector<32x128xf32>
      %325 = math.absf %38 : vector<32x128xf32>
      %326 = math.absf %273 : vector<32x128xf32>
      %327 = arith.maximumf %325, %326 : vector<32x128xf32>
      %cst_261 = arith.constant 1.000000e-03 : f32
      %328 = vector.broadcast %cst_261 : f32 to vector<32x128xf32>
      %329 = arith.mulf %328, %327 : vector<32x128xf32>
      %cst_262 = arith.constant 1.000000e-03 : f32
      %330 = vector.broadcast %cst_262 : f32 to vector<32x128xf32>
      %331 = arith.addf %330, %329 : vector<32x128xf32>
      %332 = arith.divf %324, %331 : vector<32x128xf32>
      %333 = arith.mulf %332, %332 : vector<32x128xf32>
      %334 = vector.shape_cast %333 : vector<32x128xf32> to vector<1x32x128xf32>
      %cst_263 = arith.constant dense<0.000000e+00> : vector<1xf32>
      %335 = vector.multi_reduction <add>, %334, %cst_263 [1, 2] : vector<1x32x128xf32> to vector<1xf32>
      %336 = vector.shape_cast %335 : vector<1xf32> to vector<1x1x1xf32>
      %337 = vector.extract %336[0, 0, 0] : f32 from vector<1x1x1xf32>
      %cst_264 = arith.constant 2.44140625E-4 : f32
      %338 = arith.mulf %337, %cst_264 : f32
      %cst_265 = arith.constant 1.000000e+00 : f32
      %339 = arith.cmpf ole, %338, %cst_265 : f32
      %cst_266 = arith.constant 9.99999996E-13 : f32
      %340 = arith.maximumf %338, %cst_266 : f32
      %341 = vector.broadcast %340 : f32 to vector<8x128xf32>
      %342 = math.log %341 : vector<8x128xf32>
      %cst_267 = arith.constant -1.000000e-01 : f32
      %343 = vector.broadcast %cst_267 : f32 to vector<8x128xf32>
      %344 = arith.mulf %343, %342 : vector<8x128xf32>
      %345 = math.exp %344 : vector<8x128xf32>
      %cst_268 = arith.constant 0.899999976 : f32
      %346 = vector.broadcast %cst_268 : f32 to vector<8x128xf32>
      %347 = arith.mulf %346, %345 : vector<8x128xf32>
      %348 = vector.shape_cast %347 : vector<8x128xf32> to vector<1x8x128xf32>
      %cst_269 = arith.constant dense<0xFF800000> : vector<1xf32>
      %349 = vector.multi_reduction <maximumf>, %348, %cst_269 [1, 2] : vector<1x8x128xf32> to vector<1xf32>
      %350 = vector.shape_cast %349 : vector<1xf32> to vector<1x1x1xf32>
      %351 = vector.extract %350[0, 0, 0] : f32 from vector<1x1x1xf32>
      %cst_270 = arith.constant 2.000000e-01 : f32
      %cst_271 = arith.constant 1.000000e+01 : f32
      %352 = arith.maximumf %cst_270, %351 : f32
      %353 = arith.minimumf %cst_271, %352 : f32
      %cst_272 = arith.constant 1.000000e+00 : f32
      %cst_273 = arith.constant 0.000000e+00 : f32
      %354 = arith.select %339, %cst_272, %cst_273 : f32
      %355 = arith.subf %273, %38 : vector<32x128xf32>
      %356 = vector.broadcast %354 : f32 to vector<32x128xf32>
      %357 = arith.mulf %356, %355 : vector<32x128xf32>
      %358 = arith.addf %38, %357 : vector<32x128xf32>
      %c0_274 = arith.constant 0 : index
      %c0_275 = arith.constant 0 : index
      %359 = vector.load %arg9[%c0_274, %c0_275] : memref<32x128xf32, #tpu.memory_space<vmem>>, vector<32x128xf32>
      tpu.vector_store %arg9[%c0_274, %c0_275], %358 {strides = array<i32>} : memref<32x128xf32, #tpu.memory_space<vmem>>, vector<32x128xf32>,
      %360 = arith.subf %305, %39 : vector<32x128xf32>
      %361 = vector.broadcast %354 : f32 to vector<32x128xf32>
      %362 = arith.mulf %361, %360 : vector<32x128xf32>
      %363 = arith.addf %39, %362 : vector<32x128xf32>
      %c0_276 = arith.constant 0 : index
      %c0_277 = arith.constant 0 : index
      %364 = vector.load %arg11[%c0_276, %c0_277] : memref<32x128xf32, #tpu.memory_space<vmem>>, vector<32x128xf32>
      tpu.vector_store %arg11[%c0_276, %c0_277], %363 {strides = array<i32>} : memref<32x128xf32, #tpu.memory_space<vmem>>, vector<32x128xf32>,
      %365 = arith.mulf %354, %41 : f32
      %366 = arith.addf %arg12, %365 : f32
      %367 = arith.mulf %41, %353 : f32
      %cst_278 = arith.constant 9.99999997E-7 : f32
      %368 = arith.maximumf %367, %cst_278 : f32
      %c1_i32 = arith.constant 1 : i32
      %369 = arith.addi %arg14, %c1_i32 : i32
      scf.yield %366, %368, %369 : f32, f32, i32
    }
    %36 = vector.broadcast %35#2 : i32 to vector<1x1xi32>
    %c0_36 = arith.constant 0 : index
    %c0_37 = arith.constant 0 : index
    %37 = vector.load %arg10[%c0_36, %c0_37] : memref<1x1xi32, #tpu.memory_space<vmem>>, vector<1x1xi32>
    tpu.vector_store %arg10[%c0_36, %c0_37], %36 {strides = array<i32>} : memref<1x1xi32, #tpu.memory_space<vmem>>, vector<1x1xi32>,
    return
  }
}

</mosaic_0001>

<bundles_post_ra>
// kernel: odeblock_forward.1
= control target key start
LH: loop header
LB: loop body
LE: loop exit
PB: predicated region body
PF: predicated region fallthrough
CT: control target
= control target key end

     0   :  { %16 = vsyncpa [#allocation4], 0  ;;  %vm159_vm0 = vcmask 261120   ;;  %s8119_s22 = smov 0   ;;  %s8121_s23 = smov 0.05   ;;  %s11105_s0 = inlined_call_operand.vmem [shape: f32[32,128], index: 0, kind: input, shape index: {}]   ;;  %s11106_s1 = inlined_call_operand.vmem [shape: f32[128,128], index: 1, kind: input, shape index: {}]   ;;  %s11107_s2 = inlined_call_operand.vmem [shape: f32[1,128], index: 2, kind: input, shape index: {}]   ;;  %s11108_s3 = inlined_call_operand.vmem [shape: f32[3,128,128], index: 3, kind: input, shape index: {}]   ;;  %s11109_s4 = inlined_call_operand.vmem [shape: f32[1,128], index: 4, kind: input, shape index: {}]   ;;  %s11110_s5 = inlined_call_operand.vmem [shape: f32[128,128], index: 5, kind: input, shape index: {}]   ;;  %s11111_s6 = inlined_call_operand.vmem [shape: f32[1,128], index: 6, kind: input, shape index: {}]   ;;  %s11112_s7 = inlined_call_operand.vmem [shape: f32[32,32], index: 7, kind: input, shape index: {}]   ;;  %s11113_s8 = inlined_call_operand.vmem [shape: f32[32,32], index: 8, kind: input, shape index: {}]   ;;  %s11114_s9 = inlined_call_operand.vmem [shape: f32[32,128], index: 9, kind: output, shape index: {0}]   ;;  %s11115_s10 = inlined_call_operand.hbm [shape: s32[1,1], index: 10, kind: output, shape index: {1}]  }
   0x1   :  { %v58_v0 = vld [vmem:[%s11106_s1 + $0x78] sm:$0xff]  ;;  %v57_v1 = vld [vmem:[%s11106_s1 + $0x70] sm:$0xff]  ;;  %v56_v2 = vld [vmem:[%s11106_s1 + $0x68] sm:$0xff]  ;;  %s8123_s24 = smov 0.0  }
   0x2   :  { %5914 = vmatprep.subr.mxu0 %v58_v0  ;;  %v55_v3 = vld [vmem:[%s11106_s1 + $0x60] sm:$0xff]  ;;  %v54_v4 = vld [vmem:[%s11106_s1 + $0x58] sm:$0xff]  ;;  %v36_v6 = vld [vmem:[%s11105_s0 + $0x8] sm:$0xff] }
   0x3   :  { %5915 = vmatpush3.msra.mxu0 %v58_v0  ;;  %v35_v5 = vld [vmem:[%s11105_s0] sm:$0xff]  ;;  %v37_v7 = vld [vmem:[%s11105_s0 + $0x10] sm:$0xff]  ;;  %v38_v8 = vld [vmem:[%s11105_s0 + $0x18] sm:$0xff]  ;;  %40 = vst [vmem:[%s11114_s9 + $0x8] sm:$0xff] %v36_v6 }
   0x4   :  { %5916 = vmatprep.subr.mxu0 %v57_v1  ;;  %39 = vst [vmem:[%s11114_s9] sm:$0xff] %v35_v5  ;;  %5946 = vmatprep.mubr.f32.mxu0 %v35_v5  ;;  %41 = vst [vmem:[%s11114_s9 + $0x10] sm:$0xff] %v37_v7  ;;  %v53_v9 = vld [vmem:[%s11106_s1 + $0x50] sm:$0xff]  ;;  %v52_v10 = vld [vmem:[%s11106_s1 + $0x48] sm:$0xff] }
   0x5   :  { %5917 = vmatpush3.msra.mxu0 %v57_v1  ;;  %42 = vst [vmem:[%s11114_s9 + $0x18] sm:$0xff] %v38_v8  ;;  %v51_v11 = vld [vmem:[%s11106_s1 + $0x40] sm:$0xff]  ;;  %v50_v12 = vld [vmem:[%s11106_s1 + $0x38] sm:$0xff]  ;;  %v49_v13 = vld [vmem:[%s11106_s1 + $0x30] sm:$0xff] }
   0x6   :  { %5918 = vmatprep.subr.mxu0 %v56_v2  ;;  %v48_v14 = vld [vmem:[%s11106_s1 + $0x28] sm:$0xff]  ;;  %v47_v15 = vld [vmem:[%s11106_s1 + $0x20] sm:$0xff]  ;;  %v46_v16 = vld [vmem:[%s11106_s1 + $0x18] sm:$0xff] }
   0x7   :  { %5919 = vmatpush3.msra.mxu0 %v56_v2  ;;  %v45_v17 = vld [vmem:[%s11106_s1 + $0x10] sm:$0xff]  ;;  %v44_v18 = vld [vmem:[%s11106_s1 + $0x8] sm:$0xff]  ;;  %v43_v19 = vld [vmem:[%s11106_s1] sm:$0xff] }
   0x8   :  { %5920 = vmatprep.subr.mxu0 %v55_v3  ;;  %v155_v20 = vld [vmem:[%s11112_s7] sm:$0xff]  ;;  %v373_v21 = vld [vmem:[%s11108_s3 + $0x78] sm:$0xff]  ;;  %v372_v22 = vld [vmem:[%s11108_s3 + $0x70] sm:$0xff] }
   0x9   :  { %5921 = vmatpush3.msra.mxu0 %v55_v3  ;;  %5960 = vmatprep.mubr.msk.f32.mxu1 %vm159_vm0, %v155_v20  ;;  %v371_v23 = vld [vmem:[%s11108_s3 + $0x68] sm:$0xff]  ;;  %v370_v24 = vld [vmem:[%s11108_s3 + $0x60] sm:$0xff]  ;;  %v369_v25 = vld [vmem:[%s11108_s3 + $0x58] sm:$0xff] }
   0xa   :  { %5922 = vmatprep.subr.mxu0 %v54_v4  ;;  %v368_v26 = vld [vmem:[%s11108_s3 + $0x50] sm:$0xff]  ;;  %v367_v27 = vld [vmem:[%s11108_s3 + $0x48] sm:$0xff]  ;;  %v366_v28 = vld [vmem:[%s11108_s3 + $0x40] sm:$0xff] }
   0xb   :  { %5923 = vmatpush3.msra.mxu0 %v54_v4  ;;  %v365_v29 = vld [vmem:[%s11108_s3 + $0x38] sm:$0xff]  ;;  %v364_v30 = vld [vmem:[%s11108_s3 + $0x30] sm:$0xff]  ;;  %v363_v31 = vld [vmem:[%s11108_s3 + $0x28] sm:$0xff] }
   0xc   :  { %5924 = vmatprep.subr.mxu0 %v53_v9  ;;  %v362_v32 = vld [vmem:[%s11108_s3 + $0x20] sm:$0xff]  ;;  %v361_v33 = vld [vmem:[%s11108_s3 + $0x18] sm:$0xff]  ;;  %v360_v34 = vld [vmem:[%s11108_s3 + $0x10] sm:$0xff] }
   0xd   :  { %5925 = vmatpush3.msra.mxu0 %v53_v9  ;;  %v4976_v37 = vld [vmem:[%s11107_s2] ss:$0 sm:$0xff]  ;;  %v156_v48 = vld [vmem:[%s11112_s7 + $0x8] sm:$0xff]  ;;  %v157_v49 = vld [vmem:[%s11112_s7 + $0x10] sm:$0xff] }
   0xe   :  { %5926 = vmatprep.subr.mxu0 %v52_v10  ;;  %v158_v50 = vld [vmem:[%s11112_s7 + $0x18] sm:$0xff]  ;;  %v257_v51 = vld [vmem:[%s11113_s8] sm:$0xff]  ;;  %v258_v52 = vld [vmem:[%s11113_s8 + $0x8] sm:$0xff] }
   0xf   :  { %5927 = vmatpush3.msra.mxu0 %v52_v10  ;;  %v5000_v53 = vld [vmem:[%s11108_s3 + $0xf8] sm:$0xff]  ;;  %v259_v54 = vld [vmem:[%s11113_s8 + $0x10] sm:$0xff]  ;;  %v4998_v57 = vld [vmem:[%s11108_s3 + $0xe8] sm:$0xff] }
  0x10   :  { %5928 = vmatprep.subr.mxu0 %v51_v11  ;;  %v4999_v55 = vld [vmem:[%s11108_s3 + $0xf0] sm:$0xff]  ;;  %v260_v56 = vld [vmem:[%s11113_s8 + $0x18] sm:$0xff]  ;;  %v4997_v58 = vld [vmem:[%s11108_s3 + $0xe0] sm:$0xff] }
  0x11   :  { %5929 = vmatpush3.msra.mxu0 %v51_v11  ;;  %v4996_v59 = vld [vmem:[%s11108_s3 + $0xd8] sm:$0xff]  ;;  %v4995_v60 = vld [vmem:[%s11108_s3 + $0xd0] sm:$0xff]  ;;  %v4994_v61 = vld [vmem:[%s11108_s3 + $0xc8] sm:$0xff] }
  0x12   :  { %5930 = vmatprep.subr.mxu0 %v50_v12  ;;  %v4993_v62 = vld [vmem:[%s11108_s3 + $0xc0] sm:$0xff]  ;;  %v4992_v63 = vld [vmem:[%s11108_s3 + $0xb8] sm:$0xff]  ;;  %v4991_v0 = vld [vmem:[%s11108_s3 + $0xb0] sm:$0xff] }
  0x13   :  { %5931 = vmatpush3.msra.mxu0 %v50_v12  ;;  %v4990_v1 = vld [vmem:[%s11108_s3 + $0xa8] sm:$0xff]  ;;  %v4989_v2 = vld [vmem:[%s11108_s3 + $0xa0] sm:$0xff]  ;;  %v4988_v3 = vld [vmem:[%s11108_s3 + $0x98] sm:$0xff] }
  0x14   :  { %5932 = vmatprep.subr.mxu0 %v49_v13  ;;  %v4987_v4 = vld [vmem:[%s11108_s3 + $0x90] sm:$0xff]  ;;  %v4986_v5 = vld [vmem:[%s11108_s3 + $0x88] sm:$0xff]  ;;  %v5013_v10 = vld [vmem:[%s11108_s3 + $0x160] sm:$0xff] }
  0x15   :  { %5933 = vmatpush3.msra.mxu0 %v49_v13  ;;  %v5014_v9 = vld [vmem:[%s11108_s3 + $0x168] sm:$0xff]  ;;  %v5012_v11 = vld [vmem:[%s11108_s3 + $0x158] sm:$0xff]  ;;  %v5011_v12 = vld [vmem:[%s11108_s3 + $0x150] sm:$0xff] }
  0x16   :  { %5934 = vmatprep.subr.mxu0 %v48_v14  ;;  %v5010_v13 = vld [vmem:[%s11108_s3 + $0x148] sm:$0xff]  ;;  %v5005_v20 = vld [vmem:[%s11108_s3 + $0x120] sm:$0xff] }
  0x17   :  { %5935 = vmatpush3.msra.mxu0 %v48_v14  ;;  %v5009_v14 = vld [vmem:[%s11108_s3 + $0x140] sm:$0xff] }
  0x18   :  { %5936 = vmatprep.subr.mxu0 %v47_v15 }
  0x19   :  { %5937 = vmatpush3.msra.mxu0 %v47_v15  ;;  %v5008_v15 = vld [vmem:[%s11108_s3 + $0x138] sm:$0xff] }
  0x1a   :  { %5938 = vmatprep.subr.mxu0 %v46_v16 }
  0x1b   :  { %5939 = vmatpush3.msra.mxu0 %v46_v16  ;;  %v5007_v16 = vld [vmem:[%s11108_s3 + $0x130] sm:$0xff] }
  0x1c   :  { %5940 = vmatprep.subr.mxu0 %v45_v17 }
  0x1d   :  { %5941 = vmatpush3.msra.mxu0 %v45_v17  ;;  %v359_v17 = vld [vmem:[%s11108_s3 + $0x8] sm:$0xff] }
  0x1e   :  { %5942 = vmatprep.subr.mxu0 %v44_v18 }
  0x1f   :  { %5943 = vmatpush3.msra.mxu0 %v44_v18  ;;  %v5006_v18 = vld [vmem:[%s11108_s3 + $0x128] sm:$0xff] }
  0x20   :  { %5944 = vmatprep.subr.mxu0 %v43_v19 }
  0x21   :  { %5945 = vmatpush3.msra.mxu0 %v43_v19  ;;  %v358_v19 = vld [vmem:[%s11108_s3] sm:$0xff] }
  0x22   :  { %5947 = vmatmul.mubr.f32.vlgmr.msra.gmra.mxu0 %v36_v6  ;;  %6018 = vmatprep.subr.mxu0 %v373_v21  ;;  %v4985_v6 = vld [vmem:[%s11108_s3 + $0x80] sm:$0xff] }
  0x23   :  { %5949 = vmatprep.mubr.f32.mxu0 %v37_v7  ;;  %6019 = vmatpush3.msra.mxu0 %v373_v21  ;;  %v5016_v7 = vld [vmem:[%s11108_s3 + $0x178] sm:$0xff] }
  0x24   :  { %6020 = vmatprep.subr.mxu0 %v372_v22  ;;  %v5004_v21 = vld [vmem:[%s11108_s3 + $0x118] sm:$0xff] }
  0x25   :  { %6021 = vmatpush3.msra.mxu0 %v372_v22  ;;  %v5003_v22 = vld [vmem:[%s11108_s3 + $0x110] sm:$0xff] }
  0x26   :  { %5950 = vmatmul.mubr.f32.gmra.mxu0 %v38_v8  ;;  %6022 = vmatprep.subr.mxu0 %v371_v23  ;;  %v5015_v8 = vld [vmem:[%s11108_s3 + $0x170] sm:$0xff] }
  0x27   :  { %6023 = vmatpush3.msra.mxu0 %v371_v23  ;;  %v5002_v23 = vld [vmem:[%s11108_s3 + $0x108] sm:$0xff] }
  0x28   :  { %6024 = vmatprep.subr.mxu0 %v370_v24 }
  0x29   :  { %6025 = vmatpush3.msra.mxu0 %v370_v24  ;;  %v5001_v24 = vld [vmem:[%s11108_s3 + $0x100] sm:$0xff] }
  0x2a   :  { %6026 = vmatprep.subr.mxu0 %v369_v25 }
  0x2b   :  { %6027 = vmatpush3.msra.mxu0 %v369_v25  ;;  %v697_v25 = vld [vmem:[%s11110_s5 + $0x78] sm:$0xff] }
  0x2c   :  { %6028 = vmatprep.subr.mxu0 %v368_v26 }
  0x2d   :  { %6029 = vmatpush3.msra.mxu0 %v368_v26 }
  0x2e   :  { %6030 = vmatprep.subr.mxu0 %v367_v27 }
  0x2f   :  { %6031 = vmatpush3.msra.mxu0 %v367_v27 }
  0x30   :  { %6032 = vmatprep.subr.mxu0 %v366_v28 }
  0x31   :  { %6033 = vmatpush3.msra.mxu0 %v366_v28  ;;  %v696_v28 = vld [vmem:[%s11110_s5 + $0x70] sm:$0xff] }
  0x32   :  { %6034 = vmatprep.subr.mxu0 %v365_v29 }
  0x33   :  { %6035 = vmatpush3.msra.mxu0 %v365_v29 }
  0x34   :  { %6036 = vmatprep.subr.mxu0 %v364_v30 }
  0x35   :  { %6037 = vmatpush3.msra.mxu0 %v364_v30  ;;  %v695_v30 = vld [vmem:[%s11110_s5 + $0x68] sm:$0xff] }
  0x36   :  { %6038 = vmatprep.subr.mxu0 %v363_v31 }
  0x37   :  { %6039 = vmatpush3.msra.mxu0 %v363_v31 }
  0x38   :  { %6040 = vmatprep.subr.mxu0 %v362_v32 }
  0x39   :  { %6041 = vmatpush3.msra.mxu0 %v362_v32  ;;  %v694_v32 = vld [vmem:[%s11110_s5 + $0x60] sm:$0xff] }
  0x3a   :  { %6042 = vmatprep.subr.mxu0 %v361_v33 }
  0x3b   :  { %6043 = vmatpush3.msra.mxu0 %v361_v33 }
  0x3c   :  { %6044 = vmatprep.subr.mxu0 %v360_v34 }
  0x3d   :  { %6045 = vmatpush3.msra.mxu0 %v360_v34  ;;  %v693_v34 = vld [vmem:[%s11110_s5 + $0x58] sm:$0xff] }
  0x3e   :  { %6046 = vmatprep.subr.mxu0 %v359_v17 }
  0x3f   :  { %6047 = vmatpush3.msra.mxu0 %v359_v17 }
  0x40   :  { %6048 = vmatprep.subr.mxu0 %v358_v19 }
  0x41   :  { %6049 = vmatpush3.msra.mxu0 %v358_v19 }
  0x42   :  { %6094 = vmatprep.subr.mxu0 %v697_v25 }
  0xe2   :  { %v5948_v35 = vpop.f32.mrf.mxu0 }
  0xe3   :  { %v138_v41 = vadd.f32 %v5948_v35, %v4976_v37 }
  0xe4   :  { %v132_v36 = vpop.f32.mrf.mxu0 }
  0xe5   :  { %v133_v44 = vadd.f32 %v4976_v37, %v132_v36  ;;  %v7920_v46 = vmax.f32 %v138_v41, 0.0  ;;  %v692_v36 = vld [vmem:[%s11110_s5 + $0x50] sm:$0xff]  ;;  %v689_v41 = vld [vmem:[%s11110_s5 + $0x38] sm:$0xff] }
  0xe6   :  { %v5951_v38 = vpop.f32.mrf.mxu0 }
  0xe7   :  { %v148_v39 = vadd.f32 %v5951_v38, %v4976_v37  ;;  %v151_v47 = vmax.f32 %v133_v44, 0.0  ;;  %v691_v38 = vld [vmem:[%s11110_s5 + $0x48] sm:$0xff]  ;;  %v686_v44 = vld [vmem:[%s11110_s5 + $0x20] sm:$0xff] }
  0xe8   :  { %v142_v40 = vpop.f32.mrf.mxu0 }
  0xe9   :  { %v7914_v42 = vmax.f32 %v148_v39, 0.0  ;;  %v143_v43 = vadd.f32 %v4976_v37, %v142_v40  ;;  %v690_v40 = vld [vmem:[%s11110_s5 + $0x40] sm:$0xff] }
  0xeb   :  { %v7916_v45 = vmax.f32 %v143_v43, 0.0  ;;  %5952 = vmatprep.subr.mxu1 %v7914_v42  ;;  %v687_v43 = vld [vmem:[%s11110_s5 + $0x28] sm:$0xff] }
  0xec   :  { %5953 = vmatpush3.msra.mxu1 %v7914_v42 }
  0xed   :  { %5954 = vmatprep.subr.mxu1 %v7916_v45 }
  0xee   :  { %5955 = vmatpush3.msra.mxu1 %v7916_v45 }
  0xef   :  { %5956 = vmatprep.subr.mxu1 %v7920_v46 }
  0xf0   :  { %5957 = vmatpush3.msra.mxu1 %v7920_v46 }
  0xf1   :  { %5958 = vmatprep.subr.mxu1 %v151_v47 }
  0xf2   :  { %5959 = vmatpush3.msra.mxu1 %v151_v47 }
  0xf3   :  { %5961 = vmatmul.mubr.msk.f32.vlgmr.msra.gmra.mxu1 %vm159_vm0, %v156_v48  ;;  %5966 = vmatprep.subr.mxu1 %v7914_v42  ;;  %v682_v48 = vld [vmem:[%s11110_s5] sm:$0xff] }
  0xf4   :  { %5967 = vmatpush3.msra.mxu1 %v7914_v42  ;;  %5963 = vmatprep.mubr.msk.f32.mxu1 %vm159_vm0, %v157_v49 }
  0xf5   :  { %5968 = vmatprep.subr.mxu1 %v7916_v45 }
  0xf6   :  { %5969 = vmatpush3.msra.mxu1 %v7916_v45 }
  0xf7   :  { %5964 = vmatmul.mubr.msk.f32.gmra.mxu1 %vm159_vm0, %v158_v50  ;;  %5970 = vmatprep.subr.mxu1 %v7920_v46 }
  0xf8   :  { %5971 = vmatpush3.msra.mxu1 %v7920_v46  ;;  %5974 = vmatprep.mubr.msk.f32.mxu1 %vm159_vm0, %v257_v51 }
  0xf9   :  { %5972 = vmatprep.subr.mxu1 %v151_v47 }
  0xfa   :  { %5973 = vmatpush3.msra.mxu1 %v151_v47 }
  0xfb   :  { %5975 = vmatmul.mubr.msk.f32.vlgmr.msra.gmra.mxu1 %vm159_vm0, %v258_v52  ;;  %5980 = vmatprep.subr.mxu1 %v5000_v53 }
  0xfc   :  { %5981 = vmatpush3.msra.mxu1 %v5000_v53  ;;  %5977 = vmatprep.mubr.msk.f32.mxu1 %vm159_vm0, %v259_v54 }
  0xfd   :  { %5982 = vmatprep.subr.mxu1 %v4999_v55 }
  0xfe   :  { %5983 = vmatpush3.msra.mxu1 %v4999_v55 }
  0xff   :  { %5978 = vmatmul.mubr.msk.f32.gmra.mxu1 %vm159_vm0, %v260_v56  ;;  %5984 = vmatprep.subr.mxu1 %v4998_v57 }
 0x100   :  { %5985 = vmatpush3.msra.mxu1 %v4998_v57  ;;  %6012 = vmatprep.mubr.f32.mxu1 %v151_v47  ;;  %v683_v47 = vld [vmem:[%s11110_s5 + $0x8] sm:$0xff] }
 0x101   :  { %5986 = vmatprep.subr.mxu1 %v4997_v58 }
 0x102   :  { %5987 = vmatpush3.msra.mxu1 %v4997_v58 }
 0x103   :  { %5988 = vmatprep.subr.mxu1 %v4996_v59 }
 0x104   :  { %5989 = vmatpush3.msra.mxu1 %v4996_v59 }
 0x105   :  { %5990 = vmatprep.subr.mxu1 %v4995_v60 }
 0x106   :  { %5991 = vmatpush3.msra.mxu1 %v4995_v60  ;;  %v5017_v60 = vld [vmem:[%s11109_s4] ss:$0 sm:$0xff] }
 0x107   :  { %5992 = vmatprep.subr.mxu1 %v4994_v61 }
 0x108   :  { %5993 = vmatpush3.msra.mxu1 %v4994_v61 }
 0x109   :  { %5994 = vmatprep.subr.mxu1 %v4993_v62 }
 0x10a   :  { %5995 = vmatpush3.msra.mxu1 %v4993_v62 }
 0x10b   :  { %5996 = vmatprep.subr.mxu1 %v4992_v63 }
 0x10c   :  { %5997 = vmatpush3.msra.mxu1 %v4992_v63 }
 0x10d   :  { %5998 = vmatprep.subr.mxu1 %v4991_v0 }
 0x10e   :  { %5999 = vmatpush3.msra.mxu1 %v4991_v0 }
 0x10f   :  { %6000 = vmatprep.subr.mxu1 %v4990_v1 }
 0x110   :  { %6001 = vmatpush3.msra.mxu1 %v4990_v1 }
 0x111   :  { %6002 = vmatprep.subr.mxu1 %v4989_v2 }
 0x112   :  { %6003 = vmatpush3.msra.mxu1 %v4989_v2 }
 0x113   :  { %6004 = vmatprep.subr.mxu1 %v4988_v3 }
 0x114   :  { %6005 = vmatpush3.msra.mxu1 %v4988_v3 }
 0x115   :  { %6006 = vmatprep.subr.mxu1 %v4987_v4 }
 0x116   :  { %6007 = vmatpush3.msra.mxu1 %v4987_v4 }
 0x117   :  { %6008 = vmatprep.subr.mxu1 %v4986_v5 }
 0x118   :  { %6009 = vmatpush3.msra.mxu1 %v4986_v5 }
 0x119   :  { %6010 = vmatprep.subr.mxu1 %v4985_v6 }
 0x11a   :  { %6011 = vmatpush3.msra.mxu1 %v4985_v6 }
 0x11b   :  { %6013 = vmatmul.mubr.f32.vlgmr.msra.gmra.mxu1 %v7920_v46  ;;  %6056 = vmatprep.subr.mxu1 %v5016_v7  ;;  %v684_v46 = vld [vmem:[%s11110_s5 + $0x10] sm:$0xff] }
 0x11c   :  { %6015 = vmatprep.mubr.f32.mxu1 %v7916_v45  ;;  %6057 = vmatpush3.msra.mxu1 %v5016_v7  ;;  %v685_v45 = vld [vmem:[%s11110_s5 + $0x18] sm:$0xff] }
 0x11d   :  { %6058 = vmatprep.subr.mxu1 %v5015_v8 }
 0x11e   :  { %6059 = vmatpush3.msra.mxu1 %v5015_v8 }
 0x11f   :  { %6016 = vmatmul.mubr.f32.gmra.mxu1 %v7914_v42  ;;  %6060 = vmatprep.subr.mxu1 %v5014_v9  ;;  %v688_v42 = vld [vmem:[%s11110_s5 + $0x30] sm:$0xff] }
 0x120   :  { %6061 = vmatpush3.msra.mxu1 %v5014_v9 }
 0x121   :  { %6062 = vmatprep.subr.mxu1 %v5013_v10 }
 0x122   :  { %6063 = vmatpush3.msra.mxu1 %v5013_v10 }
 0x123   :  { %6064 = vmatprep.subr.mxu1 %v5012_v11 }
 0x124   :  { %6065 = vmatpush3.msra.mxu1 %v5012_v11 }
 0x125   :  { %6066 = vmatprep.subr.mxu1 %v5011_v12 }
 0x126   :  { %6067 = vmatpush3.msra.mxu1 %v5011_v12 }
 0x127   :  { %6068 = vmatprep.subr.mxu1 %v5010_v13 }
 0x128   :  { %6069 = vmatpush3.msra.mxu1 %v5010_v13 }
 0x129   :  { %6070 = vmatprep.subr.mxu1 %v5009_v14 }
 0x12a   :  { %6071 = vmatpush3.msra.mxu1 %v5009_v14  ;;  %v5018_v14 = vld [vmem:[%s11111_s6] ss:$0 sm:$0xff] }
 0x12b   :  { %6072 = vmatprep.subr.mxu1 %v5008_v15 }
 0x12c   :  { %6073 = vmatpush3.msra.mxu1 %v5008_v15 }
 0x12d   :  { %6074 = vmatprep.subr.mxu1 %v5007_v16 }
 0x12e   :  { %6075 = vmatpush3.msra.mxu1 %v5007_v16 }
 0x12f   :  { %6076 = vmatprep.subr.mxu1 %v5006_v18 }
 0x130   :  { %6077 = vmatpush3.msra.mxu1 %v5006_v18 }
 0x131   :  { %6078 = vmatprep.subr.mxu1 %v5005_v20 }
 0x132   :  { %6079 = vmatpush3.msra.mxu1 %v5005_v20 }
 0x133   :  { %6080 = vmatprep.subr.mxu1 %v5004_v21 }
 0x134   :  { %6081 = vmatpush3.msra.mxu1 %v5004_v21 }
 0x135   :  { %6082 = vmatprep.subr.mxu1 %v5003_v22 }
 0x136   :  { %6083 = vmatpush3.msra.mxu1 %v5003_v22 }
 0x137   :  { %6084 = vmatprep.subr.mxu1 %v5002_v23 }
 0x138   :  { %6085 = vmatpush3.msra.mxu1 %v5002_v23 }
 0x139   :  { %6086 = vmatprep.subr.mxu1 %v5001_v24 }
 0x13a   :  { %6087 = vmatpush3.msra.mxu1 %v5001_v24 }
 0x1b3   :  { %v5962_v26 = vpop.f32.mrf.mxu1 }
 0x1b5   :  { %v238_v27 = vpop.f32.mrf.mxu1 }
 0x1b6   :  { %6050 = vmatprep.mubr.f32.mxu0 %v238_v27 }
 0x1b7   :  { %v5965_v29 = vpop.f32.mrf.mxu1  ;;  %6051 = vmatmul.mubr.f32.vlgmr.msra.gmra.mxu0 %v5962_v26 }
 0x1b8   :  { %6095 = vmatpush3.msra.mxu0 %v697_v25 }
 0x1b9   :  { %v248_v31 = vpop.f32.mrf.mxu1  ;;  %6096 = vmatprep.subr.mxu0 %v696_v28 }
 0x1ba   :  { %6053 = vmatprep.mubr.f32.mxu0 %v248_v31  ;;  %6097 = vmatpush3.msra.mxu0 %v696_v28 }
 0x1bb   :  { %v5976_v33 = vpop.f32.mrf.mxu1  ;;  %6054 = vmatmul.mubr.f32.gmra.mxu0 %v5965_v29  ;;  %6098 = vmatprep.subr.mxu0 %v695_v30 }
 0x1bc   :  { %6099 = vmatpush3.msra.mxu0 %v695_v30 }
 0x1bd   :  { %v339_v35 = vpop.f32.mrf.mxu1  ;;  %6100 = vmatprep.subr.mxu0 %v694_v32 }
 0x1be   :  { %6088 = vmatprep.mubr.f32.mxu1 %v339_v35  ;;  %6101 = vmatpush3.msra.mxu0 %v694_v32 }
 0x1bf   :  { %v5979_v37 = vpop.f32.mrf.mxu1  ;;  %6089 = vmatmul.mubr.f32.vlgmr.msra.gmra.mxu1 %v5976_v33  ;;  %6102 = vmatprep.subr.mxu0 %v693_v34 }
 0x1c0   :  { %6103 = vmatpush3.msra.mxu0 %v693_v34 }
 0x1c1   :  { %v349_v39 = vpop.f32.mrf.mxu1  ;;  %6104 = vmatprep.subr.mxu0 %v692_v36 }
 0x1c2   :  { %6091 = vmatprep.mubr.f32.mxu1 %v349_v39  ;;  %6105 = vmatpush3.msra.mxu0 %v692_v36 }
 0x1c3   :  { %6092 = vmatmul.mubr.f32.gmra.mxu1 %v5979_v37  ;;  %6106 = vmatprep.subr.mxu0 %v691_v38 }
 0x1c4   :  { %6107 = vmatpush3.msra.mxu0 %v691_v38 }
 0x1c5   :  { %6108 = vmatprep.subr.mxu0 %v690_v40 }
 0x1c6   :  { %6109 = vmatpush3.msra.mxu0 %v690_v40 }
 0x1c7   :  { %6110 = vmatprep.subr.mxu0 %v689_v41 }
 0x1c8   :  { %6111 = vmatpush3.msra.mxu0 %v689_v41 }
 0x1c9   :  { %6112 = vmatprep.subr.mxu0 %v688_v42 }
 0x1ca   :  { %6113 = vmatpush3.msra.mxu0 %v688_v42 }
 0x1cb   :  { %6114 = vmatprep.subr.mxu0 %v687_v43 }
 0x1cc   :  { %6115 = vmatpush3.msra.mxu0 %v687_v43 }
 0x1cd   :  { %6116 = vmatprep.subr.mxu0 %v686_v44 }
 0x1ce   :  { %6117 = vmatpush3.msra.mxu0 %v686_v44 }
 0x1cf   :  { %6118 = vmatprep.subr.mxu0 %v685_v45 }
 0x1d0   :  { %6119 = vmatpush3.msra.mxu0 %v685_v45 }
 0x1d1   :  { %6120 = vmatprep.subr.mxu0 %v684_v46 }
 0x1d2   :  { %6121 = vmatpush3.msra.mxu0 %v684_v46 }
 0x1d3   :  { %6122 = vmatprep.subr.mxu0 %v683_v47 }
 0x1d4   :  { %6123 = vmatpush3.msra.mxu0 %v683_v47 }
 0x1d5   :  { %6124 = vmatprep.subr.mxu0 %v682_v48 }
 0x1d6   :  { %6125 = vmatpush3.msra.mxu0 %v682_v48 }
 0x1db   :  { %v6014_v49 = vpop.f32.mrf.mxu1 }
 0x1dd   :  { %v457_v50 = vpop.f32.mrf.mxu1 }
 0x1df   :  { %v6017_v52 = vpop.f32.mrf.mxu1 }
 0x1e1   :  { %v467_v54 = vpop.f32.mrf.mxu1 }
 0x277   :  { %v6052_v51 = vpop.f32.mrf.mxu0 }
 0x278   :  { %v548_v56 = vadd.f32 %v6052_v51, %v6014_v49 }
 0x279   :  { %v542_v53 = vpop.f32.mrf.mxu0 }
 0x27a   :  { %v543_v58 = vadd.f32 %v542_v53, %v457_v50 }
 0x27b   :  { %v6055_v55 = vpop.f32.mrf.mxu0 }
 0x27c   :  { %v558_v63 = vadd.f32 %v6055_v55, %v6017_v52 }
 0x27d   :  { %v552_v61 = vpop.f32.mrf.mxu0 }
 0x27e   :  { %v553_v3 = vadd.f32 %v552_v61, %v467_v54 }
 0x27f   :  { %v6090_v57 = vpop.f32.mrf.mxu1 }
 0x280   :  { %v664_v59 = vadd.f32 %v6090_v57, %v548_v56 }
 0x281   :  { %v644_v62 = vpop.f32.mrf.mxu1 }
 0x282   :  { %v663_v0 = vadd.f32 %v644_v62, %v543_v58  ;;  %v675_v1 = vadd.f32 %v5017_v60, %v664_v59 }
 0x283   :  { %v6093_v2 = vpop.f32.mrf.mxu1 }
 0x284   :  { %v674_v4 = vadd.f32 %v5017_v60, %v663_v0  ;;  %v666_v5 = vadd.f32 %v6093_v2, %v558_v63  ;;  %v679_v9 = vmax.f32 %v675_v1, 0.0 }
 0x285   :  { %v654_v6 = vpop.f32.mrf.mxu1 }
 0x286   :  { %v678_v7 = vmax.f32 %v674_v4, 0.0  ;;  %v665_v8 = vadd.f32 %v654_v6, %v553_v3  ;;  %v677_v10 = vadd.f32 %v5017_v60, %v666_v5 }
 0x288   :  { %v676_v11 = vadd.f32 %v5017_v60, %v665_v8  ;;  %6126 = vmatprep.mubr.f32.mxu0 %v678_v7  ;;  %v681_v13 = vmax.f32 %v677_v10, 0.0 }
 0x289   :  { %6127 = vmatmul.mubr.f32.vlgmr.msra.gmra.mxu0 %v679_v9 }
 0x28a   :  { %v680_v12 = vmax.f32 %v676_v11, 0.0 }
 0x28c   :  { %6129 = vmatprep.mubr.f32.mxu0 %v680_v12 }
 0x28d   :  { %6130 = vmatmul.mubr.f32.gmra.mxu0 %v681_v13 }
 0x349   :  { %v6128_v15 = vpop.f32.mrf.mxu0 }
 0x34a   :  { %v777_v16 = vadd.f32 %v6128_v15, %v5018_v14 }
 0x34b   :  { %v771_v17 = vpop.f32.mrf.mxu0 }
 0x34c   :  { %791 = vst [vmem:[#allocation2] sm:$0xff] %v777_v16  ;;  %v772_v18 = vadd.f32 %v5018_v14, %v771_v17 }
 0x34d   :  { %v6131_v19 = vpop.f32.mrf.mxu0 }
 0x34e   :  { %790 = vst [vmem:[#allocation2 + $0x10] sm:$0xff] %v772_v18  ;;  %v787_v20 = vadd.f32 %v6131_v19, %v5018_v14 }
 0x34f   :  { %v781_v21 = vpop.f32.mrf.mxu0 }
 0x350   :  { %793 = vst [vmem:[#allocation2 + $0x8] sm:$0xff] %v787_v20  ;;  %v782_v22 = vadd.f32 %v5018_v14, %v781_v21 }
 0x352   :  { %792 = vst [vmem:[#allocation2 + $0x18] sm:$0xff] %v782_v22 }
 0x353 LB: > { %v8135_v23 = vld [vmem:[%s11106_s1 + $0x78] sm:$0xff]  ;;  %v8140_v24 = vld [vmem:[%s11106_s1 + $0x70] sm:$0xff]  ;;  %v8147_v25 = vld [vmem:[%s11106_s1 + $0x68] sm:$0xff]  ;;  %s812_s11 = ssub.f32 1.0, %s7731_s24  ;;  %s11052_s22 = sadd.s32 1, %s7723_s22   ;;  %s7731_s24 = sphi %s8123_s24, %s11076_s24   ;;  %s7727_s23 = sphi %s8121_s23, %s4940_s23   ;;  %s7723_s22 = sphi %s8119_s22, %s11674_s22  }
 0x354   : > { %6132 = vmatprep.subr.mxu0 %v8135_v23  ;;  %v8155_v26 = vld [vmem:[%s11106_s1 + $0x60] sm:$0xff]  ;;  %v8166_v28 = vld [vmem:[%s11106_s1 + $0x58] sm:$0xff]  ;;  %v8182_v32 = vld [vmem:[%s11106_s1 + $0x50] sm:$0xff]  ;;  %s11673_s19 = smov %s11052_s22  ;;  %s7733_s21 = smov 1e-12  }
 0x355   : > { %6133 = vmatpush3.msra.mxu0 %v8135_v23  ;;  %v8158_v27 = vld [vmem:[#allocation2 + $0x10] sm:$0xff]  ;;  %s8160_s14 = smin.f32 %s7727_s23, %s812_s11  ;;  %v8176_v31 = vld [vmem:[%s11114_s9] sm:$0xff]  ;;  %v8190_v34 = vld [vmem:[%s11106_s1 + $0x48] sm:$0xff]  ;;  %s7734_s26 = smov 0.2  }
 0x356   : > { %6134 = vmatprep.subr.mxu0 %v8140_v24  ;;  %v814_v29 = vmul.f32 0.2, %v8158_v27  ;;  %v8170_v30 = vstv %s8160_s14  ;;  %v8198_v36 = vld [vmem:[%s11106_s1 + $0x40] sm:$0xff]  ;;  %v8205_v37 = vld [vmem:[%s11106_s1 + $0x38] sm:$0xff]  ;;  %v8212_v38 = vld [vmem:[%s11106_s1 + $0x30] sm:$0xff]  ;;  %s7735_s28 = smov 10.0  }
 0x357   : > { %6135 = vmatpush3.msra.mxu0 %v8140_v24  ;;  %v8219_v39 = vld [vmem:[%s11106_s1 + $0x28] sm:$0xff]  ;;  %v8221_v40 = vld [vmem:[#allocation2] sm:$0xff]  ;;  %v8238_v44 = vld [vmem:[%s11106_s1 + $0x18] sm:$0xff]  ;;  %s7736_s30 = smov 1e-06   ;;  %p799_p2 = scmp.lt.s32.totalorder %s11673_s19, 1000 }
 0x358   : > { %6136 = vmatprep.subr.mxu0 %v8147_v25  ;;  %v819_v33 = vmul.f32 %v8170_v30, %v814_v29  ;;  %v8230_v42 = vld [vmem:[%s11106_s1 + $0x20] sm:$0xff]  ;;  %v815_v43 = vmul.f32 0.2, %v8221_v40  ;;  %v8241_v46 = vld [vmem:[#allocation2 + $0x8] sm:$0xff]  ;;  %v8248_v47 = vld [vmem:[%s11106_s1 + $0x10] sm:$0xff] }
 0x359   : > { %6137 = vmatpush3.msra.mxu0 %v8147_v25  ;;  %v8224_v41 = vld [vmem:[#allocation2 + $0x18] sm:$0xff]  ;;  %v817_v49 = vmul.f32 0.2, %v8241_v46  ;;  %v8257_v50 = vld [vmem:[%s11106_s1 + $0x8] sm:$0xff]  ;;  %v8269_v53 = vld [vmem:[%s11114_s9 + $0x10] sm:$0xff] }
 0x35a   : > { %6138 = vmatprep.subr.mxu0 %v8155_v26  ;;  %v823_v35 = vadd.f32 %v819_v33, %v8176_v31  ;;  %v816_v45 = vmul.f32 0.2, %v8224_v41  ;;  %v820_v48 = vmul.f32 %v8170_v30, %v815_v43  ;;  %v8262_v51 = vld [vmem:[%s11114_s9 + $0x8] sm:$0xff]  ;;  %v8275_v54 = vld [vmem:[%s11106_s1] sm:$0xff]  ;;  %v8285_v58 = vld [vmem:[%s11114_s9 + $0x18] sm:$0xff] }
 0x35b   : > { %6139 = vmatpush3.msra.mxu0 %v8155_v26  ;;  %v822_v56 = vmul.f32 %v8170_v30, %v817_v49  ;;  %v8293_v60 = vld [vmem:[%s11112_s7] sm:$0xff]  ;;  %v8300_v61 = vld [vmem:[%s11108_s3 + $0x78] sm:$0xff]  ;;  %v8305_v62 = vld [vmem:[%s11108_s3 + $0x70] sm:$0xff] }
 0x35c   : > { %6140 = vmatprep.subr.mxu0 %v8166_v28  ;;  %6164 = vmatprep.mubr.f32.mxu0 %v823_v35  ;;  %v821_v52 = vmul.f32 %v8170_v30, %v816_v45  ;;  %v824_v55 = vadd.f32 %v820_v48, %v8262_v51  ;;  %v8312_v63 = vld [vmem:[%s11108_s3 + $0x68] sm:$0xff]  ;;  %v8319_v0 = vld [vmem:[%s11108_s3 + $0x60] sm:$0xff]  ;;  %v8326_v1 = vld [vmem:[%s11108_s3 + $0x58] sm:$0xff] }
 0x35d   : > { %6141 = vmatpush3.msra.mxu0 %v8166_v28  ;;  %v826_v59 = vadd.f32 %v822_v56, %v8285_v58  ;;  %6178 = vmatprep.mubr.msk.f32.mxu1 %vm159_vm0, %v8293_v60  ;;  %v8333_v2 = vld [vmem:[%s11108_s3 + $0x50] sm:$0xff]  ;;  %v8340_v3 = vld [vmem:[%s11108_s3 + $0x48] sm:$0xff]  ;;  %v8347_v4 = vld [vmem:[%s11108_s3 + $0x40] sm:$0xff] }
 0x35e   : > { %6142 = vmatprep.subr.mxu0 %v8182_v32  ;;  %v825_v57 = vadd.f32 %v821_v52, %v8269_v53  ;;  %v8354_v5 = vld [vmem:[%s11108_s3 + $0x38] sm:$0xff]  ;;  %v8361_v6 = vld [vmem:[%s11108_s3 + $0x30] sm:$0xff]  ;;  %v8368_v7 = vld [vmem:[%s11108_s3 + $0x28] sm:$0xff] }
 0x35f   : > { %6143 = vmatpush3.msra.mxu0 %v8182_v32  ;;  %v8375_v8 = vld [vmem:[%s11108_s3 + $0x20] sm:$0xff]  ;;  %v8382_v9 = vld [vmem:[%s11108_s3 + $0x18] sm:$0xff]  ;;  %v8389_v10 = vld [vmem:[%s11108_s3 + $0x10] sm:$0xff] }
 0x360   : > { %6144 = vmatprep.subr.mxu0 %v8190_v34  ;;  %v8398_v13 = vld [vmem:[%s11107_s2] ss:$0 sm:$0xff]  ;;  %v8419_v33 = vld [vmem:[%s11112_s7 + $0x8] sm:$0xff]  ;;  %v8424_v35 = vld [vmem:[%s11112_s7 + $0x10] sm:$0xff] }
 0x361   : > { %6145 = vmatpush3.msra.mxu0 %v8190_v34  ;;  %v8435_v43 = vld [vmem:[%s11112_s7 + $0x18] sm:$0xff]  ;;  %v8441_v45 = vld [vmem:[%s11113_s8] sm:$0xff]  ;;  %v8453_v48 = vld [vmem:[%s11113_s8 + $0x8] sm:$0xff] }
 0x362   : > { %6146 = vmatprep.subr.mxu0 %v8198_v36  ;;  %v8458_v49 = vld [vmem:[%s11108_s3 + $0xf8] sm:$0xff]  ;;  %v8463_v52 = vld [vmem:[%s11113_s8 + $0x10] sm:$0xff] }
 0x363   : > { %6147 = vmatpush3.msra.mxu0 %v8198_v36  ;;  %v8479_v56 = vld [vmem:[%s11113_s8 + $0x18] sm:$0xff] }
 0x364   : > { %6148 = vmatprep.subr.mxu0 %v8205_v37 }
 0x365   : > { %6149 = vmatpush3.msra.mxu0 %v8205_v37 }
 0x366   : > { %6150 = vmatprep.subr.mxu0 %v8212_v38 }
 0x367   : > { %6151 = vmatpush3.msra.mxu0 %v8212_v38 }
 0x368   : > { %6152 = vmatprep.subr.mxu0 %v8219_v39 }
 0x369   : > { %6153 = vmatpush3.msra.mxu0 %v8219_v39 }
 0x36a   : > { %6154 = vmatprep.subr.mxu0 %v8230_v42 }
 0x36b   : > { %6155 = vmatpush3.msra.mxu0 %v8230_v42 }
 0x36c   : > { %6156 = vmatprep.subr.mxu0 %v8238_v44 }
 0x36d   : > { %6157 = vmatpush3.msra.mxu0 %v8238_v44 }
 0x36e   : > { %6158 = vmatprep.subr.mxu0 %v8248_v47 }
 0x36f   : > { %6159 = vmatpush3.msra.mxu0 %v8248_v47 }
 0x370   : > { %6160 = vmatprep.subr.mxu0 %v8257_v50 }
 0x371   : > { %6161 = vmatpush3.msra.mxu0 %v8257_v50 }
 0x372   : > { %6162 = vmatprep.subr.mxu0 %v8275_v54 }
 0x373   : > { %6163 = vmatpush3.msra.mxu0 %v8275_v54 }
 0x374   : > { %6165 = vmatmul.mubr.f32.vlgmr.msra.gmra.mxu0 %v824_v55  ;;  %6236 = vmatprep.subr.mxu0 %v8300_v61  ;;  %v8468_v55 = vld [vmem:[%s11108_s3 + $0xf0] sm:$0xff] }
 0x375   : > { %6167 = vmatprep.mubr.f32.mxu0 %v825_v57  ;;  %6237 = vmatpush3.msra.mxu0 %v8300_v61  ;;  %v8484_v57 = vld [vmem:[%s11108_s3 + $0xe8] sm:$0xff] }
 0x376   : > { %6238 = vmatprep.subr.mxu0 %v8305_v62 }
 0x377   : > { %6239 = vmatpush3.msra.mxu0 %v8305_v62 }
 0x378   : > { %6168 = vmatmul.mubr.f32.gmra.mxu0 %v826_v59  ;;  %6240 = vmatprep.subr.mxu0 %v8312_v63  ;;  %v8491_v59 = vld [vmem:[%s11108_s3 + $0xe0] sm:$0xff] }
 0x379   : > { %6241 = vmatpush3.msra.mxu0 %v8312_v63 }
 0x37a   : > { %6242 = vmatprep.subr.mxu0 %v8319_v0 }
 0x37b   : > { %6243 = vmatpush3.msra.mxu0 %v8319_v0 }
 0x37c   : > { %6244 = vmatprep.subr.mxu0 %v8326_v1 }
 0x37d   : > { %6245 = vmatpush3.msra.mxu0 %v8326_v1 }
 0x37e   : > { %6246 = vmatprep.subr.mxu0 %v8333_v2 }
 0x37f   : > { %6247 = vmatpush3.msra.mxu0 %v8333_v2 }
 0x380   : > { %6248 = vmatprep.subr.mxu0 %v8340_v3 }
 0x381   : > { %6249 = vmatpush3.msra.mxu0 %v8340_v3 }
 0x382   : > { %6250 = vmatprep.subr.mxu0 %v8347_v4 }
 0x383   : > { %6251 = vmatpush3.msra.mxu0 %v8347_v4 }
 0x384   : > { %6252 = vmatprep.subr.mxu0 %v8354_v5 }
 0x385   : > { %6253 = vmatpush3.msra.mxu0 %v8354_v5 }
 0x386   : > { %6254 = vmatprep.subr.mxu0 %v8361_v6 }
 0x387   : > { %6255 = vmatpush3.msra.mxu0 %v8361_v6 }
 0x388   : > { %6256 = vmatprep.subr.mxu0 %v8368_v7 }
 0x389   : > { %6257 = vmatpush3.msra.mxu0 %v8368_v7 }
 0x38a   : > { %6258 = vmatprep.subr.mxu0 %v8375_v8 }
 0x38b   : > { %6259 = vmatpush3.msra.mxu0 %v8375_v8 }
 0x38c   : > { %6260 = vmatprep.subr.mxu0 %v8382_v9 }
 0x38d   : > { %6261 = vmatpush3.msra.mxu0 %v8382_v9 }
 0x38e   : > { %6262 = vmatprep.subr.mxu0 %v8389_v10 }
 0x38f   : > { %6263 = vmatpush3.msra.mxu0 %v8389_v10 }
 0x434   : > { %v6166_v11 = vpop.f32.mrf.mxu0 }
 0x435   : > { %v922_v17 = vadd.f32 %v6166_v11, %v8398_v13  ;;  %v8500_v11 = vld [vmem:[%s11108_s3 + $0xd8] sm:$0xff] }
 0x436   : > { %v916_v12 = vpop.f32.mrf.mxu0 }
 0x437   : > { %v917_v20 = vadd.f32 %v8398_v13, %v916_v12  ;;  %v8410_v22 = vmax.f32 %v922_v17, 0.0  ;;  %v8507_v12 = vld [vmem:[%s11108_s3 + $0xd0] sm:$0xff] }
 0x438   : > { %v6169_v14 = vpop.f32.mrf.mxu0  ;;  %11391 = vst [vmem:[#allocation6_spill] sm:$0xff] %v8507_v12  ;;  %v8535_v17 = vld [vmem:[%s11108_s3 + $0xb0] sm:$0xff] }
 0x439   : > { %v932_v15 = vadd.f32 %v6169_v14, %v8398_v13  ;;  %v935_v29 = vmax.f32 %v917_v20, 0.0  ;;  %v8514_v14 = vld [vmem:[%s11108_s3 + $0xc8] sm:$0xff]  ;;  %11395 = vst [vmem:[#allocation10_spill] sm:$0xff] %v8535_v17  ;;  %v8549_v20 = vld [vmem:[%s11108_s3 + $0xa0] sm:$0xff] }
 0x43a   : > { %v926_v16 = vpop.f32.mrf.mxu0  ;;  %11392 = vst [vmem:[#allocation7_spill] sm:$0xff] %v8514_v14  ;;  %11397 = vst [vmem:[#allocation12_spill] sm:$0xff] %v8549_v20 }
 0x43b   : > { %v8402_v18 = vmax.f32 %v932_v15, 0.0  ;;  %v927_v19 = vadd.f32 %v8398_v13, %v926_v16  ;;  %v8521_v15 = vld [vmem:[%s11108_s3 + $0xc0] sm:$0xff]  ;;  %v8528_v16 = vld [vmem:[%s11108_s3 + $0xb8] sm:$0xff] }
 0x43c   : > { %11393 = vst [vmem:[#allocation8_spill] sm:$0xff] %v8521_v15  ;;  %11394 = vst [vmem:[#allocation9_spill] sm:$0xff] %v8528_v16 }
 0x43d   : > { %v8406_v21 = vmax.f32 %v927_v19, 0.0  ;;  %6170 = vmatprep.subr.mxu1 %v8402_v18  ;;  %v8542_v19 = vld [vmem:[%s11108_s3 + $0xa8] sm:$0xff] }
 0x43e   : > { %6171 = vmatpush3.msra.mxu1 %v8402_v18  ;;  %11396 = vst [vmem:[#allocation11_spill] sm:$0xff] %v8542_v19 }
 0x43f   : > { %6172 = vmatprep.subr.mxu1 %v8406_v21 }
 0x440   : > { %6173 = vmatpush3.msra.mxu1 %v8406_v21 }
 0x441   : > { %6174 = vmatprep.subr.mxu1 %v8410_v22 }
 0x442   : > { %6175 = vmatpush3.msra.mxu1 %v8410_v22 }
 0x443   : > { %6176 = vmatprep.subr.mxu1 %v935_v29 }
 0x444   : > { %6177 = vmatpush3.msra.mxu1 %v935_v29 }
 0x445   : > { %6179 = vmatmul.mubr.msk.f32.vlgmr.msra.gmra.mxu1 %vm159_vm0, %v8419_v33  ;;  %6184 = vmatprep.subr.mxu1 %v8402_v18 }
 0x446   : > { %6185 = vmatpush3.msra.mxu1 %v8402_v18  ;;  %6181 = vmatprep.mubr.msk.f32.mxu1 %vm159_vm0, %v8424_v35 }
 0x447   : > { %6186 = vmatprep.subr.mxu1 %v8406_v21 }
 0x448   : > { %6187 = vmatpush3.msra.mxu1 %v8406_v21 }
 0x449   : > { %6182 = vmatmul.mubr.msk.f32.gmra.mxu1 %vm159_vm0, %v8435_v43  ;;  %6188 = vmatprep.subr.mxu1 %v8410_v22 }
 0x44a   : > { %6189 = vmatpush3.msra.mxu1 %v8410_v22  ;;  %6192 = vmatprep.mubr.msk.f32.mxu1 %vm159_vm0, %v8441_v45 }
 0x44b   : > { %6190 = vmatprep.subr.mxu1 %v935_v29 }
 0x44c   : > { %6191 = vmatpush3.msra.mxu1 %v935_v29 }
 0x44d   : > { %6193 = vmatmul.mubr.msk.f32.vlgmr.msra.gmra.mxu1 %vm159_vm0, %v8453_v48  ;;  %6198 = vmatprep.subr.mxu1 %v8458_v49 }
 0x44e   : > { %6199 = vmatpush3.msra.mxu1 %v8458_v49  ;;  %6195 = vmatprep.mubr.msk.f32.mxu1 %vm159_vm0, %v8463_v52 }
 0x44f   : > { %6200 = vmatprep.subr.mxu1 %v8468_v55 }
 0x450   : > { %6201 = vmatpush3.msra.mxu1 %v8468_v55 }
 0x451   : > { %6196 = vmatmul.mubr.msk.f32.gmra.mxu1 %vm159_vm0, %v8479_v56  ;;  %6202 = vmatprep.subr.mxu1 %v8484_v57 }
 0x452   : > { %6203 = vmatpush3.msra.mxu1 %v8484_v57  ;;  %6230 = vmatprep.mubr.f32.mxu1 %v935_v29  ;;  %v8556_v29 = vld [vmem:[%s11108_s3 + $0x98] sm:$0xff] }
 0x453   : > { %6204 = vmatprep.subr.mxu1 %v8491_v59  ;;  %11398 = vst [vmem:[#allocation13_spill] sm:$0xff] %v8556_v29 }
 0x454   : > { %6205 = vmatpush3.msra.mxu1 %v8491_v59 }
 0x455   : > { %6206 = vmatprep.subr.mxu1 %v8500_v11 }
 0x456   : > { %6207 = vmatpush3.msra.mxu1 %v8500_v11 }
 0x457   : > { %6208 = vmatprep.subr.mxu1 %v8507_v12 }
 0x458   : > { %6209 = vmatpush3.msra.mxu1 %v8507_v12 }
 0x459   : > { %6210 = vmatprep.subr.mxu1 %v8514_v14 }
 0x45a   : > { %6211 = vmatpush3.msra.mxu1 %v8514_v14 }
 0x45b   : > { %6212 = vmatprep.subr.mxu1 %v8521_v15 }
 0x45c   : > { %6213 = vmatpush3.msra.mxu1 %v8521_v15 }
 0x45d   : > { %6214 = vmatprep.subr.mxu1 %v8528_v16 }
 0x45e   : > { %6215 = vmatpush3.msra.mxu1 %v8528_v16 }
 0x45f   : > { %6216 = vmatprep.subr.mxu1 %v8535_v17 }
 0x460   : > { %6217 = vmatpush3.msra.mxu1 %v8535_v17  ;;  %v8563_v17 = vld [vmem:[%s11108_s3 + $0x90] sm:$0xff] }
 0x461   : > { %6218 = vmatprep.subr.mxu1 %v8542_v19  ;;  %11399 = vst [vmem:[#allocation14_spill] sm:$0xff] %v8563_v17 }
 0x462   : > { %6219 = vmatpush3.msra.mxu1 %v8542_v19  ;;  %v8570_v19 = vld [vmem:[%s11108_s3 + $0x88] sm:$0xff] }
 0x463   : > { %6220 = vmatprep.subr.mxu1 %v8549_v20  ;;  %11400 = vst [vmem:[#allocation15_spill] sm:$0xff] %v8570_v19 }
 0x464   : > { %6221 = vmatpush3.msra.mxu1 %v8549_v20  ;;  %v8577_v20 = vld [vmem:[%s11108_s3 + $0x80] sm:$0xff] }
 0x465   : > { %6222 = vmatprep.subr.mxu1 %v8556_v29  ;;  %11401 = vst [vmem:[#allocation16_spill] sm:$0xff] %v8577_v20 }
 0x466   : > { %6223 = vmatpush3.msra.mxu1 %v8556_v29  ;;  %v8584_v29 = vld [vmem:[%s11108_s3 + $0x178] sm:$0xff] }
 0x467   : > { %6224 = vmatprep.subr.mxu1 %v8563_v17  ;;  %11402 = vst [vmem:[#allocation17_spill] sm:$0xff] %v8584_v29 }
 0x468   : > { %6225 = vmatpush3.msra.mxu1 %v8563_v17  ;;  %v8591_v17 = vld [vmem:[%s11108_s3 + $0x170] sm:$0xff] }
 0x469   : > { %6226 = vmatprep.subr.mxu1 %v8570_v19  ;;  %11403 = vst [vmem:[#allocation18_spill] sm:$0xff] %v8591_v17 }
 0x46a   : > { %6227 = vmatpush3.msra.mxu1 %v8570_v19  ;;  %v8600_v19 = vld [vmem:[%s11108_s3 + $0x168] sm:$0xff] }
 0x46b   : > { %6228 = vmatprep.subr.mxu1 %v8577_v20  ;;  %11404 = vst [vmem:[#allocation19_spill] sm:$0xff] %v8600_v19 }
 0x46c   : > { %6229 = vmatpush3.msra.mxu1 %v8577_v20  ;;  %v8607_v20 = vld [vmem:[%s11108_s3 + $0x160] sm:$0xff] }
 0x46d   : > { %6231 = vmatmul.mubr.f32.vlgmr.msra.gmra.mxu1 %v8410_v22  ;;  %6274 = vmatprep.subr.mxu1 %v8584_v29  ;;  %11405 = vst [vmem:[#allocation20_spill] sm:$0xff] %v8607_v20  ;;  %v8622_v22 = vld [vmem:[%s11108_s3 + $0x150] sm:$0xff] }
 0x46e   : > { %6233 = vmatprep.mubr.f32.mxu1 %v8406_v21  ;;  %6275 = vmatpush3.msra.mxu1 %v8584_v29  ;;  %v8615_v21 = vld [vmem:[%s11108_s3 + $0x158] sm:$0xff]  ;;  %11407 = vst [vmem:[#allocation22_spill] sm:$0xff] %v8622_v22  ;;  %v8722_v29 = vld [vmem:[%s11110_s5 + $0x70] sm:$0xff] }
 0x46f   : > { %6276 = vmatprep.subr.mxu1 %v8591_v17  ;;  %11406 = vst [vmem:[#allocation21_spill] sm:$0xff] %v8615_v21 }
 0x470   : > { %6277 = vmatpush3.msra.mxu1 %v8591_v17 }
 0x471   : > { %6234 = vmatmul.mubr.f32.gmra.mxu1 %v8402_v18  ;;  %6278 = vmatprep.subr.mxu1 %v8600_v19  ;;  %v8629_v18 = vld [vmem:[%s11108_s3 + $0x148] sm:$0xff] }
 0x472   : > { %6279 = vmatpush3.msra.mxu1 %v8600_v19  ;;  %11408 = vst [vmem:[#allocation23_spill] sm:$0xff] %v8629_v18  ;;  %v8694_v19 = vld [vmem:[%s11108_s3 + $0x110] sm:$0xff] }
 0x473   : > { %6280 = vmatprep.subr.mxu1 %v8607_v20  ;;  %11415 = vst [vmem:[#allocation30_spill] sm:$0xff] %v8694_v19 }
 0x474   : > { %6281 = vmatpush3.msra.mxu1 %v8607_v20  ;;  %v8636_v20 = vld [vmem:[%s11108_s3 + $0x140] sm:$0xff] }
 0x475   : > { %6282 = vmatprep.subr.mxu1 %v8615_v21  ;;  %11409 = vst [vmem:[#allocation24_spill] sm:$0xff] %v8636_v20 }
 0x476   : > { %6283 = vmatpush3.msra.mxu1 %v8615_v21  ;;  %v8643_v21 = vld [vmem:[%s11108_s3 + $0x138] sm:$0xff] }
 0x477   : > { %6284 = vmatprep.subr.mxu1 %v8622_v22  ;;  %11410 = vst [vmem:[#allocation25_spill] sm:$0xff] %v8643_v21 }
 0x478   : > { %6285 = vmatpush3.msra.mxu1 %v8622_v22  ;;  %v8650_v22 = vld [vmem:[%s11108_s3 + $0x130] sm:$0xff] }
 0x479   : > { %6286 = vmatprep.subr.mxu1 %v8629_v18  ;;  %11411 = vst [vmem:[#allocation26_spill] sm:$0xff] %v8650_v22 }
 0x47a   : > { %6287 = vmatpush3.msra.mxu1 %v8629_v18  ;;  %v8659_v18 = vld [vmem:[%s11108_s3 + $0x8] sm:$0xff] }
 0x47b   : > { %6288 = vmatprep.subr.mxu1 %v8636_v20  ;;  %6264 = vmatprep.subr.mxu0 %v8659_v18 }
 0x47c   : > { %6289 = vmatpush3.msra.mxu1 %v8636_v20  ;;  %v8664_v20 = vld [vmem:[%s11108_s3 + $0x128] sm:$0xff]  ;;  %6265 = vmatpush3.msra.mxu0 %v8659_v18 }
 0x47d   : > { %6290 = vmatprep.subr.mxu1 %v8643_v21  ;;  %11412 = vst [vmem:[#allocation27_spill] sm:$0xff] %v8664_v20 }
 0x47e   : > { %6291 = vmatpush3.msra.mxu1 %v8643_v21  ;;  %v8678_v21 = vld [vmem:[%s11108_s3 + $0x120] sm:$0xff] }
 0x47f   : > { %6292 = vmatprep.subr.mxu1 %v8650_v22  ;;  %11413 = vst [vmem:[#allocation28_spill] sm:$0xff] %v8678_v21 }
 0x480   : > { %6293 = vmatpush3.msra.mxu1 %v8650_v22  ;;  %v8673_v22 = vld [vmem:[%s11108_s3] sm:$0xff] }
 0x481   : > { %6294 = vmatprep.subr.mxu1 %v8664_v20  ;;  %6266 = vmatprep.subr.mxu0 %v8673_v22 }
 0x482   : > { %6295 = vmatpush3.msra.mxu1 %v8664_v20  ;;  %6267 = vmatpush3.msra.mxu0 %v8673_v22  ;;  %v8687_v20 = vld [vmem:[%s11108_s3 + $0x118] sm:$0xff] }
 0x483   : > { %6296 = vmatprep.subr.mxu1 %v8678_v21  ;;  %11414 = vst [vmem:[#allocation29_spill] sm:$0xff] %v8687_v20 }
 0x484   : > { %6297 = vmatpush3.msra.mxu1 %v8678_v21  ;;  %v8701_v21 = vld [vmem:[%s11108_s3 + $0x108] sm:$0xff] }
 0x485   : > { %6298 = vmatprep.subr.mxu1 %v8687_v20  ;;  %11416 = vst [vmem:[#allocation31_spill] sm:$0xff] %v8701_v21 }
 0x486   : > { %6299 = vmatpush3.msra.mxu1 %v8687_v20  ;;  %v8708_v20 = vld [vmem:[%s11108_s3 + $0x100] sm:$0xff] }
 0x487   : > { %6300 = vmatprep.subr.mxu1 %v8694_v19  ;;  %11417 = vst [vmem:[#allocation32_spill] sm:$0xff] %v8708_v20 }
 0x488   : > { %6301 = vmatpush3.msra.mxu1 %v8694_v19  ;;  %v8716_v19 = vld [vmem:[%s11110_s5 + $0x78] sm:$0xff] }
 0x489   : > { %6302 = vmatprep.subr.mxu1 %v8701_v21  ;;  %6312 = vmatprep.subr.mxu0 %v8716_v19 }
 0x48a   : > { %6303 = vmatpush3.msra.mxu1 %v8701_v21 }
 0x48b   : > { %6304 = vmatprep.subr.mxu1 %v8708_v20 }
 0x48c   : > { %6305 = vmatpush3.msra.mxu1 %v8708_v20  ;;  %v8728_v20 = vld [vmem:[%s11110_s5 + $0x68] sm:$0xff] }
 0x48d   : > { %6350 = vmatprep.subr.mxu1 %v8135_v23  ;;  %11418 = vst [vmem:[#allocation33_spill] sm:$0xff] %v8728_v20 }
 0x505   : > { %v6180_v17 = vpop.f32.mrf.mxu1 }
 0x507   : > { %v1021_v21 = vpop.f32.mrf.mxu1 }
 0x508   : > { %6268 = vmatprep.mubr.f32.mxu0 %v1021_v21  ;;  %v8735_v21 = vld [vmem:[%s11110_s5 + $0x60] sm:$0xff] }
 0x509   : > { %v6183_v16 = vpop.f32.mrf.mxu1  ;;  %6269 = vmatmul.mubr.f32.vlgmr.msra.gmra.mxu0 %v6180_v17  ;;  %v8742_v17 = vld [vmem:[%s11110_s5 + $0x58] sm:$0xff] }
 0x50a   : > { %6313 = vmatpush3.msra.mxu0 %v8716_v19  ;;  %11419 = vst [vmem:[#allocation34_spill] sm:$0xff] %v8742_v17 }
 0x50b   : > { %v1031_v15 = vpop.f32.mrf.mxu1  ;;  %6314 = vmatprep.subr.mxu0 %v8722_v29 }
 0x50c   : > { %6271 = vmatprep.mubr.f32.mxu0 %v1031_v15  ;;  %6315 = vmatpush3.msra.mxu0 %v8722_v29  ;;  %v8749_v15 = vld [vmem:[%s11110_s5 + $0x50] sm:$0xff] }
 0x50d   : > { %v6194_v14 = vpop.f32.mrf.mxu1  ;;  %6272 = vmatmul.mubr.f32.gmra.mxu0 %v6183_v16  ;;  %6316 = vmatprep.subr.mxu0 %v8728_v20  ;;  %11420 = vst [vmem:[#allocation35_spill] sm:$0xff] %v8749_v15 }
 0x50e   : > { %6317 = vmatpush3.msra.mxu0 %v8728_v20  ;;  %v8756_v20 = vld [vmem:[%s11110_s5 + $0x48] sm:$0xff] }
 0x50f   : > { %v1122_v12 = vpop.f32.mrf.mxu1  ;;  %6318 = vmatprep.subr.mxu0 %v8735_v21  ;;  %11421 = vst [vmem:[#allocation36_spill] sm:$0xff] %v8756_v20 }
 0x510   : > { %6306 = vmatprep.mubr.f32.mxu1 %v1122_v12  ;;  %6319 = vmatpush3.msra.mxu0 %v8735_v21 }
 0x511   : > { %v6197_v16 = vpop.f32.mrf.mxu1  ;;  %6307 = vmatmul.mubr.f32.vlgmr.msra.gmra.mxu1 %v6194_v14  ;;  %6320 = vmatprep.subr.mxu0 %v8742_v17 }
 0x512   : > { %6321 = vmatpush3.msra.mxu0 %v8742_v17  ;;  %6351 = vmatpush3.msra.mxu1 %v8135_v23  ;;  %v8797_v23 = vld [vmem:[%s11110_s5 + $0x40] sm:$0xff] }
 0x513   : > { %v1132_v12 = vpop.f32.mrf.mxu1  ;;  %6322 = vmatprep.subr.mxu0 %v8749_v15  ;;  %6352 = vmatprep.subr.mxu1 %v8140_v24  ;;  %11422 = vst [vmem:[#allocation37_spill] sm:$0xff] %v8797_v23 }
 0x514   : > { %6309 = vmatprep.mubr.f32.mxu1 %v1132_v12  ;;  %6323 = vmatpush3.msra.mxu0 %v8749_v15 }
 0x515   : > { %6310 = vmatmul.mubr.f32.gmra.mxu1 %v6197_v16  ;;  %6324 = vmatprep.subr.mxu0 %v8756_v20 }
 0x516   : > { %6325 = vmatpush3.msra.mxu0 %v8756_v20  ;;  %6353 = vmatpush3.msra.mxu1 %v8140_v24  ;;  %v8804_v24 = vld [vmem:[%s11110_s5 + $0x38] sm:$0xff] }
 0x517   : > { %6354 = vmatprep.subr.mxu1 %v8147_v25  ;;  %6326 = vmatprep.subr.mxu0 %v8797_v23  ;;  %11423 = vst [vmem:[#allocation38_spill] sm:$0xff] %v8804_v24 }
 0x518   : > { %6355 = vmatpush3.msra.mxu1 %v8147_v25  ;;  %6327 = vmatpush3.msra.mxu0 %v8797_v23  ;;  %v8811_v25 = vld [vmem:[%s11110_s5 + $0x30] sm:$0xff] }
 0x519   : > { %6356 = vmatprep.subr.mxu1 %v8155_v26  ;;  %6328 = vmatprep.subr.mxu0 %v8804_v24  ;;  %11424 = vst [vmem:[#allocation39_spill] sm:$0xff] %v8811_v25 }
 0x51a   : > { %6357 = vmatpush3.msra.mxu1 %v8155_v26  ;;  %6329 = vmatpush3.msra.mxu0 %v8804_v24  ;;  %v8818_v26 = vld [vmem:[%s11110_s5 + $0x28] sm:$0xff] }
 0x51b   : > { %6358 = vmatprep.subr.mxu1 %v8166_v28  ;;  %6330 = vmatprep.subr.mxu0 %v8811_v25  ;;  %11425 = vst [vmem:[#allocation40_spill] sm:$0xff] %v8818_v26 }
 0x51c   : > { %6359 = vmatpush3.msra.mxu1 %v8166_v28  ;;  %6331 = vmatpush3.msra.mxu0 %v8811_v25  ;;  %v8825_v28 = vld [vmem:[%s11110_s5 + $0x20] sm:$0xff] }
 0x51d   : > { %6360 = vmatprep.subr.mxu1 %v8182_v32  ;;  %6332 = vmatprep.subr.mxu0 %v8818_v26  ;;  %11426 = vst [vmem:[#allocation41_spill] sm:$0xff] %v8825_v28 }
 0x51e   : > { %6361 = vmatpush3.msra.mxu1 %v8182_v32  ;;  %6333 = vmatpush3.msra.mxu0 %v8818_v26  ;;  %v8832_v32 = vld [vmem:[%s11110_s5 + $0x18] sm:$0xff] }
 0x51f   : > { %6362 = vmatprep.subr.mxu1 %v8190_v34  ;;  %6334 = vmatprep.subr.mxu0 %v8825_v28  ;;  %11427 = vst [vmem:[#allocation42_spill] sm:$0xff] %v8832_v32 }
 0x520   : > { %6363 = vmatpush3.msra.mxu1 %v8190_v34  ;;  %6335 = vmatpush3.msra.mxu0 %v8825_v28  ;;  %v8839_v34 = vld [vmem:[%s11110_s5 + $0x10] sm:$0xff] }
 0x521   : > { %6364 = vmatprep.subr.mxu1 %v8198_v36  ;;  %6336 = vmatprep.subr.mxu0 %v8832_v32  ;;  %11428 = vst [vmem:[#allocation43_spill] sm:$0xff] %v8839_v34 }
 0x522   : > { %6365 = vmatpush3.msra.mxu1 %v8198_v36  ;;  %6337 = vmatpush3.msra.mxu0 %v8832_v32  ;;  %v8846_v36 = vld [vmem:[%s11110_s5 + $0x8] sm:$0xff] }
 0x523   : > { %6366 = vmatprep.subr.mxu1 %v8205_v37  ;;  %6338 = vmatprep.subr.mxu0 %v8839_v34  ;;  %11429 = vst [vmem:[#allocation44_spill] sm:$0xff] %v8846_v36 }
 0x524   : > { %6367 = vmatpush3.msra.mxu1 %v8205_v37  ;;  %6339 = vmatpush3.msra.mxu0 %v8839_v34  ;;  %v8853_v37 = vld [vmem:[%s11110_s5] sm:$0xff] }
 0x525   : > { %6368 = vmatprep.subr.mxu1 %v8212_v38  ;;  %6340 = vmatprep.subr.mxu0 %v8846_v36  ;;  %11430 = vst [vmem:[#allocation45_spill] sm:$0xff] %v8853_v37  ;;  %v8860_v34 = vld [vmem:[%s11109_s4] ss:$0 sm:$0xff] }
 0x526   : > { %6369 = vmatpush3.msra.mxu1 %v8212_v38  ;;  %6341 = vmatpush3.msra.mxu0 %v8846_v36 }
 0x527   : > { %6370 = vmatprep.subr.mxu1 %v8219_v39  ;;  %6342 = vmatprep.subr.mxu0 %v8853_v37 }
 0x528   : > { %6371 = vmatpush3.msra.mxu1 %v8219_v39  ;;  %6343 = vmatpush3.msra.mxu0 %v8853_v37 }
 0x529   : > { %6372 = vmatprep.subr.mxu1 %v8230_v42 }
 0x52a   : > { %6373 = vmatpush3.msra.mxu1 %v8230_v42 }
 0x52b   : > { %6374 = vmatprep.subr.mxu1 %v8238_v44 }
 0x52c   : > { %6375 = vmatpush3.msra.mxu1 %v8238_v44 }
 0x52d   : > { %6376 = vmatprep.subr.mxu1 %v8248_v47  ;;  %v6232_v38 = vpop.f32.mrf.mxu1 }
 0x52e   : > { %6377 = vmatpush3.msra.mxu1 %v8248_v47 }
 0x52f   : > { %6378 = vmatprep.subr.mxu1 %v8257_v50  ;;  %v1239_v39 = vpop.f32.mrf.mxu1 }
 0x530   : > { %6379 = vmatpush3.msra.mxu1 %v8257_v50 }
 0x531   : > { %6380 = vmatprep.subr.mxu1 %v8275_v54  ;;  %v6235_v44 = vpop.f32.mrf.mxu1 }
 0x532   : > { %6381 = vmatpush3.msra.mxu1 %v8275_v54 }
 0x533   : > { %6454 = vmatprep.subr.mxu1 %v8300_v61  ;;  %v1249_v50 = vpop.f32.mrf.mxu1 }
 0x5c9   : > { %v6270_v42 = vpop.f32.mrf.mxu0 }
 0x5ca   : > { %v1330_v14 = vadd.f32 %v6270_v42, %v6232_v38 }
 0x5cb   : > { %v1324_v47 = vpop.f32.mrf.mxu0 }
 0x5cc   : > { %v1325_v12 = vadd.f32 %v1324_v47, %v1239_v39 }
 0x5cd   : > { %v6273_v54 = vpop.f32.mrf.mxu0 }
 0x5ce   : > { %v1340_v26 = vadd.f32 %v6273_v54, %v6235_v44 }
 0x5cf   : > { %v1334_v32 = vpop.f32.mrf.mxu0 }
 0x5d0   : > { %v1335_v23 = vadd.f32 %v1334_v32, %v1249_v50 }
 0x5d1   : > { %v6308_v16 = vpop.f32.mrf.mxu1 }
 0x5d2   : > { %v1445_v36 = vadd.f32 %v6308_v16, %v1330_v14 }
 0x5d3   : > { %v1425_v28 = vpop.f32.mrf.mxu1 }
 0x5d4   : > { %v1444_v37 = vadd.f32 %v1425_v28, %v1325_v12  ;;  %v1456_v25 = vadd.f32 %v8860_v34, %v1445_v36  ;;  %v1571_v28 = vmul.f32 0.075, %v8158_v27 }
 0x5d5   : > { %v6311_v24 = vpop.f32.mrf.mxu1 }
 0x5d6   : > { %v1455_v20 = vadd.f32 %v8860_v34, %v1444_v37  ;;  %v1447_v15 = vadd.f32 %v6311_v24, %v1340_v26  ;;  %v1460_v47 = vmax.f32 %v1456_v25, 0.0  ;;  %v8871_v24 = vld [vmem:[%s11111_s6] ss:$0 sm:$0xff] }
 0x5d7   : > { %v1435_v38 = vpop.f32.mrf.mxu1 }
 0x5d8   : > { %v1459_v42 = vmax.f32 %v1455_v20, 0.0  ;;  %v1446_v39 = vadd.f32 %v1435_v38, %v1335_v23  ;;  %v1458_v14 = vadd.f32 %v8860_v34, %v1447_v15  ;;  %v1572_v15 = vmul.f32 0.075, %v8221_v40 }
 0x5d9   : > { %v1573_v38 = vmul.f32 0.075, %v8224_v41 }
 0x5da   : > { %v1457_v16 = vadd.f32 %v8860_v34, %v1446_v39  ;;  %6344 = vmatprep.mubr.f32.mxu0 %v1459_v42  ;;  %v1462_v44 = vmax.f32 %v1458_v14, 0.0  ;;  %v1574_v42 = vmul.f32 0.075, %v8241_v46 }
 0x5db   : > { %6345 = vmatmul.mubr.f32.vlgmr.msra.gmra.mxu0 %v1460_v47 }
 0x5dc   : > { %v1461_v17 = vmax.f32 %v1457_v16, 0.0 }
 0x5de   : > { %6347 = vmatprep.mubr.f32.mxu0 %v1461_v17 }
 0x5df   : > { %6348 = vmatmul.mubr.f32.gmra.mxu0 %v1462_v44 }
 0x5e0   : > { %6396 = vmatprep.mubr.msk.f32.mxu0 %vm159_vm0, %v8293_v60 }
 0x69b   : > { %v6346_v20 = vpop.f32.mrf.mxu0 }
 0x69c   : > { %v8874_v23 = vadd.f32 %v6346_v20, %v8871_v24 }
 0x69d   : > { %v1552_v25 = vpop.f32.mrf.mxu0 }
 0x69e   : > { %v1576_v26 = vmul.f32 0.225, %v8874_v23  ;;  %v8879_v17 = vadd.f32 %v8871_v24, %v1552_v25 }
 0x69f   : > { %v6349_v60 = vpop.f32.mrf.mxu0 }
 0x6a0   : > { %v1580_v32 = vadd.f32 %v1576_v26, %v1572_v15  ;;  %v1575_v36 = vmul.f32 0.225, %v8879_v17  ;;  %v8884_v50 = vadd.f32 %v6349_v60, %v8871_v24  ;;  %v11452_v26 = vld [vmem:[#allocation27_spill] sm:$0xff]  ;;  %v11454_v60 = vld [vmem:[#allocation29_spill] sm:$0xff] }
 0x6a1   : > { %v1562_v37 = vpop.f32.mrf.mxu0 }
 0x6a2   : > { %v8887_v54 = vadd.f32 %v8871_v24, %v1562_v37  ;;  %v1579_v40 = vadd.f32 %v1575_v36, %v1571_v28  ;;  %v1584_v12 = vmul.f32 %v1580_v32, %v8170_v30  ;;  %v1578_v27 = vmul.f32 0.225, %v8884_v50  ;;  %v11453_v28 = vld [vmem:[#allocation28_spill] sm:$0xff]  ;;  %v11455_v32 = vld [vmem:[#allocation30_spill] sm:$0xff]  ;;  %v11456_v36 = vld [vmem:[#allocation31_spill] sm:$0xff] }
 0x6a3   : > { %v11457_v37 = vld [vmem:[#allocation32_spill] sm:$0xff] }
 0x6a4   : > { %v1583_v39 = vmul.f32 %v1579_v40, %v8170_v30  ;;  %v1577_v47 = vmul.f32 0.225, %v8887_v54  ;;  %v1588_v16 = vadd.f32 %v1584_v12, %v8262_v51  ;;  %v1582_v20 = vadd.f32 %v1578_v27, %v1574_v42  ;;  %v9025_v40 = vld [vmem:[%s11106_s1 + $0x78] sm:$0xff] }
 0x6a6   : > { %v1587_v14 = vadd.f32 %v1583_v39, %v8176_v31  ;;  %v1581_v44 = vadd.f32 %v1577_v47, %v1573_v38  ;;  %v1586_v41 = vmul.f32 %v1582_v20, %v8170_v30  ;;  %v11458_v47 = vld [vmem:[#allocation33_spill] sm:$0xff]  ;;  %v9042_v20 = vld [vmem:[%s11106_s1 + $0x70] sm:$0xff] }
 0x6a8   : > { %6382 = vmatprep.mubr.f32.mxu1 %v1587_v14  ;;  %v1585_v15 = vmul.f32 %v1581_v44, %v8170_v30  ;;  %v1590_v25 = vadd.f32 %v1586_v41, %v8285_v58  ;;  %v11460_v44 = vld [vmem:[#allocation35_spill] sm:$0xff] }
 0x6a9   : > { %6383 = vmatmul.mubr.f32.vlgmr.msra.gmra.mxu1 %v1588_v16  ;;  %v9053_v41 = vld [vmem:[%s11106_s1 + $0x68] sm:$0xff] }
 0x6aa   : > { %6455 = vmatpush3.msra.mxu1 %v8300_v61  ;;  %v1589_v46 = vadd.f32 %v1585_v15, %v8269_v53  ;;  %v11462_v15 = vld [vmem:[#allocation37_spill] sm:$0xff] }
 0x6ab   : > { %6456 = vmatprep.subr.mxu1 %v8305_v62 }
 0x6ac   : > { %6457 = vmatpush3.msra.mxu1 %v8305_v62  ;;  %6385 = vmatprep.mubr.f32.mxu1 %v1589_v46  ;;  %v11463_v46 = vld [vmem:[#allocation38_spill] sm:$0xff] }
 0x6ad   : > { %6458 = vmatprep.subr.mxu1 %v8312_v63  ;;  %6386 = vmatmul.mubr.f32.gmra.mxu1 %v1590_v25  ;;  %v9062_v25 = vld [vmem:[%s11106_s1 + $0x60] sm:$0xff] }
 0x6ae   : > { %6459 = vmatpush3.msra.mxu1 %v8312_v63 }
 0x6af   : > { %6460 = vmatprep.subr.mxu1 %v8319_v0 }
 0x6b0   : > { %6461 = vmatpush3.msra.mxu1 %v8319_v0 }
 0x6b1   : > { %6462 = vmatprep.subr.mxu1 %v8326_v1 }
 0x6b2   : > { %6463 = vmatpush3.msra.mxu1 %v8326_v1 }
 0x6b3   : > { %6464 = vmatprep.subr.mxu1 %v8333_v2 }
 0x6b4   : > { %6465 = vmatpush3.msra.mxu1 %v8333_v2 }
 0x6b5   : > { %6466 = vmatprep.subr.mxu1 %v8340_v3 }
 0x6b6   : > { %6467 = vmatpush3.msra.mxu1 %v8340_v3 }
 0x6b7   : > { %6468 = vmatprep.subr.mxu1 %v8347_v4 }
 0x6b8   : > { %6469 = vmatpush3.msra.mxu1 %v8347_v4 }
 0x6b9   : > { %6470 = vmatprep.subr.mxu1 %v8354_v5 }
 0x6ba   : > { %6471 = vmatpush3.msra.mxu1 %v8354_v5  ;;  %v11431_v5 = vld [vmem:[#allocation6_spill] sm:$0xff] }
 0x6bb   : > { %6472 = vmatprep.subr.mxu1 %v8361_v6 }
 0x6bc   : > { %6473 = vmatpush3.msra.mxu1 %v8361_v6  ;;  %v11432_v6 = vld [vmem:[#allocation7_spill] sm:$0xff] }
 0x6bd   : > { %6474 = vmatprep.subr.mxu1 %v8368_v7 }
 0x6be   : > { %6475 = vmatpush3.msra.mxu1 %v8368_v7  ;;  %v11433_v7 = vld [vmem:[#allocation8_spill] sm:$0xff] }
 0x6bf   : > { %6476 = vmatprep.subr.mxu1 %v8375_v8 }
 0x6c0   : > { %6477 = vmatpush3.msra.mxu1 %v8375_v8  ;;  %v11434_v8 = vld [vmem:[#allocation9_spill] sm:$0xff] }
 0x6c1   : > { %6478 = vmatprep.subr.mxu1 %v8382_v9 }
 0x6c2   : > { %6479 = vmatpush3.msra.mxu1 %v8382_v9  ;;  %v11435_v9 = vld [vmem:[#allocation10_spill] sm:$0xff] }
 0x6c3   : > { %6480 = vmatprep.subr.mxu1 %v8389_v10 }
 0x6c4   : > { %6481 = vmatpush3.msra.mxu1 %v8389_v10  ;;  %v11436_v10 = vld [vmem:[#allocation11_spill] sm:$0xff] }
 0x6c5   : > { %6482 = vmatprep.subr.mxu1 %v8659_v18 }
 0x6c6   : > { %6483 = vmatpush3.msra.mxu1 %v8659_v18  ;;  %v11451_v18 = vld [vmem:[#allocation26_spill] sm:$0xff] }
 0x6c7   : > { %6484 = vmatprep.subr.mxu1 %v8673_v22 }
 0x6c8   : > { %6485 = vmatpush3.msra.mxu1 %v8673_v22  ;;  %v11450_v22 = vld [vmem:[#allocation25_spill] sm:$0xff] }
 0x6c9   : > { %6530 = vmatprep.subr.mxu1 %v8716_v19 }
 0x769   : > { %v6384_v31 = vpop.f32.mrf.mxu1 }
 0x76a   : > { %v1663_v62 = vadd.f32 %v6384_v31, %v8398_v13  ;;  %v11464_v31 = vld [vmem:[#allocation39_spill] sm:$0xff] }
 0x76b   : > { %v1657_v51 = vpop.f32.mrf.mxu1 }
 0x76c   : > { %v1658_v1 = vadd.f32 %v8398_v13, %v1657_v51  ;;  %v1677_v3 = vmax.f32 %v1663_v62, 0.0  ;;  %v9071_v51 = vld [vmem:[%s11106_s1 + $0x58] sm:$0xff]  ;;  %v9089_v62 = vld [vmem:[%s11106_s1 + $0x48] sm:$0xff] }
 0x76d   : > { %v6387_v53 = vpop.f32.mrf.mxu1 }
 0x76e   : > { %v1673_v58 = vadd.f32 %v6387_v53, %v8398_v13  ;;  %v1676_v4 = vmax.f32 %v1658_v1, 0.0  ;;  %v11465_v53 = vld [vmem:[#allocation40_spill] sm:$0xff]  ;;  %v11468_v1 = vld [vmem:[#allocation43_spill] sm:$0xff] }
 0x76f   : > { %v1667_v61 = vpop.f32.mrf.mxu1 }
 0x770   : > { %v8935_v63 = vmax.f32 %v1673_v58, 0.0  ;;  %v1668_v0 = vadd.f32 %v8398_v13, %v1667_v61  ;;  %v11437_v13 = vld [vmem:[#allocation12_spill] sm:$0xff]  ;;  %v11466_v61 = vld [vmem:[#allocation41_spill] sm:$0xff] }
 0x771   : > { %v9080_v58 = vld [vmem:[%s11106_s1 + $0x50] sm:$0xff] }
 0x772   : > { %v1678_v2 = vmax.f32 %v1668_v0, 0.0  ;;  %6388 = vmatprep.subr.mxu0 %v8935_v63  ;;  %v9098_v0 = vld [vmem:[%s11106_s1 + $0x40] sm:$0xff] }
 0x773   : > { %6389 = vmatpush3.msra.mxu0 %v8935_v63 }
 0x774   : > { %6390 = vmatprep.subr.mxu0 %v1678_v2 }
 0x775   : > { %6391 = vmatpush3.msra.mxu0 %v1678_v2 }
 0x776   : > { %6392 = vmatprep.subr.mxu0 %v1677_v3 }
 0x777   : > { %6393 = vmatpush3.msra.mxu0 %v1677_v3 }
 0x778   : > { %6394 = vmatprep.subr.mxu0 %v1676_v4 }
 0x779   : > { %6395 = vmatpush3.msra.mxu0 %v1676_v4 }
 0x77a   : > { %6397 = vmatmul.mubr.msk.f32.vlgmr.msra.gmra.mxu0 %vm159_vm0, %v8419_v33  ;;  %6402 = vmatprep.subr.mxu0 %v8935_v63  ;;  %v11438_v33 = vld [vmem:[#allocation13_spill] sm:$0xff] }
 0x77b   : > { %6403 = vmatpush3.msra.mxu0 %v8935_v63  ;;  %6399 = vmatprep.mubr.msk.f32.mxu0 %vm159_vm0, %v8424_v35  ;;  %v11439_v35 = vld [vmem:[#allocation14_spill] sm:$0xff] }
 0x77c   : > { %6404 = vmatprep.subr.mxu0 %v1678_v2 }
 0x77d   : > { %6405 = vmatpush3.msra.mxu0 %v1678_v2 }
 0x77e   : > { %6400 = vmatmul.mubr.msk.f32.gmra.mxu0 %vm159_vm0, %v8435_v43  ;;  %6406 = vmatprep.subr.mxu0 %v1677_v3  ;;  %v11440_v43 = vld [vmem:[#allocation15_spill] sm:$0xff] }
 0x77f   : > { %6407 = vmatpush3.msra.mxu0 %v1677_v3  ;;  %6410 = vmatprep.mubr.msk.f32.mxu0 %vm159_vm0, %v8441_v45  ;;  %v11441_v45 = vld [vmem:[#allocation16_spill] sm:$0xff] }
 0x780   : > { %6408 = vmatprep.subr.mxu0 %v1676_v4 }
 0x781   : > { %6409 = vmatpush3.msra.mxu0 %v1676_v4 }
 0x782   : > { %6411 = vmatmul.mubr.msk.f32.vlgmr.msra.gmra.mxu0 %vm159_vm0, %v8453_v48  ;;  %6416 = vmatprep.subr.mxu0 %v8458_v49  ;;  %v11442_v48 = vld [vmem:[#allocation17_spill] sm:$0xff] }
 0x783   : > { %6417 = vmatpush3.msra.mxu0 %v8458_v49  ;;  %6413 = vmatprep.mubr.msk.f32.mxu0 %vm159_vm0, %v8463_v52  ;;  %v11443_v49 = vld [vmem:[#allocation18_spill] sm:$0xff]  ;;  %v11444_v52 = vld [vmem:[#allocation19_spill] sm:$0xff] }
 0x784   : > { %6418 = vmatprep.subr.mxu0 %v8468_v55 }
 0x785   : > { %6419 = vmatpush3.msra.mxu0 %v8468_v55  ;;  %v11445_v55 = vld [vmem:[#allocation20_spill] sm:$0xff] }
 0x786   : > { %6414 = vmatmul.mubr.msk.f32.gmra.mxu0 %vm159_vm0, %v8479_v56  ;;  %6420 = vmatprep.subr.mxu0 %v8484_v57  ;;  %v11446_v56 = vld [vmem:[#allocation21_spill] sm:$0xff] }
 0x787   : > { %6421 = vmatpush3.msra.mxu0 %v8484_v57  ;;  %6448 = vmatprep.mubr.f32.mxu0 %v1676_v4  ;;  %v11447_v57 = vld [vmem:[#allocation22_spill] sm:$0xff]  ;;  %v9116_v4 = vld [vmem:[%s11106_s1 + $0x30] sm:$0xff] }
 0x788   : > { %6422 = vmatprep.subr.mxu0 %v8491_v59 }
 0x789   : > { %6423 = vmatpush3.msra.mxu0 %v8491_v59  ;;  %v11448_v59 = vld [vmem:[#allocation23_spill] sm:$0xff] }
 0x78a   : > { %6424 = vmatprep.subr.mxu0 %v8500_v11 }
 0x78b   : > { %6425 = vmatpush3.msra.mxu0 %v8500_v11  ;;  %v11449_v11 = vld [vmem:[#allocation24_spill] sm:$0xff] }
 0x78c   : > { %6426 = vmatprep.subr.mxu0 %v11431_v5 }
 0x78d   : > { %6427 = vmatpush3.msra.mxu0 %v11431_v5  ;;  %v11470_v5 = vld [vmem:[#allocation45_spill] sm:$0xff] }
 0x78e   : > { %6428 = vmatprep.subr.mxu0 %v11432_v6 }
 0x78f   : > { %6429 = vmatpush3.msra.mxu0 %v11432_v6  ;;  %v9125_v6 = vld [vmem:[%s11106_s1 + $0x28] sm:$0xff] }
 0x790   : > { %6430 = vmatprep.subr.mxu0 %v11433_v7 }
 0x791   : > { %6431 = vmatpush3.msra.mxu0 %v11433_v7  ;;  %v9133_v7 = vld [vmem:[%s11106_s1 + $0x20] sm:$0xff] }
 0x792   : > { %6432 = vmatprep.subr.mxu0 %v11434_v8 }
 0x793   : > { %6433 = vmatpush3.msra.mxu0 %v11434_v8  ;;  %v9140_v8 = vld [vmem:[%s11106_s1 + $0x18] sm:$0xff] }
 0x794   : > { %6434 = vmatprep.subr.mxu0 %v11435_v9 }
 0x795   : > { %6435 = vmatpush3.msra.mxu0 %v11435_v9  ;;  %v9147_v9 = vld [vmem:[%s11106_s1 + $0x10] sm:$0xff] }
 0x796   : > { %6436 = vmatprep.subr.mxu0 %v11436_v10 }
 0x797   : > { %6437 = vmatpush3.msra.mxu0 %v11436_v10  ;;  %v9154_v10 = vld [vmem:[%s11106_s1 + $0x8] sm:$0xff] }
 0x798   : > { %6438 = vmatprep.subr.mxu0 %v11437_v13 }
 0x799   : > { %6439 = vmatpush3.msra.mxu0 %v11437_v13  ;;  %v9161_v13 = vld [vmem:[%s11106_s1] sm:$0xff] }
 0x79a   : > { %6440 = vmatprep.subr.mxu0 %v11438_v33 }
 0x79b   : > { %6441 = vmatpush3.msra.mxu0 %v11438_v33  ;;  %v9168_v33 = vld [vmem:[%s11108_s3 + $0x78] sm:$0xff] }
 0x79c   : > { %6442 = vmatprep.subr.mxu0 %v11439_v35 }
 0x79d   : > { %6443 = vmatpush3.msra.mxu0 %v11439_v35 }
 0x79e   : > { %6444 = vmatprep.subr.mxu0 %v11440_v43 }
 0x79f   : > { %6445 = vmatpush3.msra.mxu0 %v11440_v43 }
 0x7a0   : > { %6446 = vmatprep.subr.mxu0 %v11441_v45 }
 0x7a1   : > { %6447 = vmatpush3.msra.mxu0 %v11441_v45 }
 0x7a2   : > { %6449 = vmatmul.mubr.f32.vlgmr.msra.gmra.mxu0 %v1677_v3  ;;  %6492 = vmatprep.subr.mxu0 %v11442_v48  ;;  %v11469_v3 = vld [vmem:[#allocation44_spill] sm:$0xff] }
 0x7a3   : > { %6451 = vmatprep.mubr.f32.mxu0 %v1678_v2  ;;  %6493 = vmatpush3.msra.mxu0 %v11442_v48  ;;  %v9107_v2 = vld [vmem:[%s11106_s1 + $0x38] sm:$0xff] }
 0x7a4   : > { %6494 = vmatprep.subr.mxu0 %v11443_v49 }
 0x7a5   : > { %6495 = vmatpush3.msra.mxu0 %v11443_v49 }
 0x7a6   : > { %6452 = vmatmul.mubr.f32.gmra.mxu0 %v8935_v63  ;;  %6496 = vmatprep.subr.mxu0 %v11444_v52  ;;  %v11467_v63 = vld [vmem:[#allocation42_spill] sm:$0xff] }
 0x7a7   : > { %6497 = vmatpush3.msra.mxu0 %v11444_v52 }
 0x7a8   : > { %6498 = vmatprep.subr.mxu0 %v11445_v55 }
 0x7a9   : > { %6499 = vmatpush3.msra.mxu0 %v11445_v55 }
 0x7aa   : > { %6500 = vmatprep.subr.mxu0 %v11446_v56 }
 0x7ab   : > { %6501 = vmatpush3.msra.mxu0 %v11446_v56 }
 0x7ac   : > { %6502 = vmatprep.subr.mxu0 %v11447_v57 }
 0x7ad   : > { %6503 = vmatpush3.msra.mxu0 %v11447_v57 }
 0x7ae   : > { %6504 = vmatprep.subr.mxu0 %v11448_v59 }
 0x7af   : > { %6505 = vmatpush3.msra.mxu0 %v11448_v59 }
 0x7b0   : > { %6506 = vmatprep.subr.mxu0 %v11449_v11 }
 0x7b1   : > { %6507 = vmatpush3.msra.mxu0 %v11449_v11 }
 0x7b2   : > { %6508 = vmatprep.subr.mxu0 %v11450_v22 }
 0x7b3   : > { %6509 = vmatpush3.msra.mxu0 %v11450_v22 }
 0x7b4   : > { %6510 = vmatprep.subr.mxu0 %v11451_v18 }
 0x7b5   : > { %6511 = vmatpush3.msra.mxu0 %v11451_v18 }
 0x7b6   : > { %6512 = vmatprep.subr.mxu0 %v11452_v26 }
 0x7b7   : > { %6513 = vmatpush3.msra.mxu0 %v11452_v26 }
 0x7b8   : > { %6514 = vmatprep.subr.mxu0 %v11453_v28 }
 0x7b9   : > { %6515 = vmatpush3.msra.mxu0 %v11453_v28 }
 0x7ba   : > { %6516 = vmatprep.subr.mxu0 %v11454_v60 }
 0x7bb   : > { %6517 = vmatpush3.msra.mxu0 %v11454_v60 }
 0x7bc   : > { %6518 = vmatprep.subr.mxu0 %v11455_v32 }
 0x7bd   : > { %6519 = vmatpush3.msra.mxu0 %v11455_v32 }
 0x7be   : > { %6520 = vmatprep.subr.mxu0 %v11456_v36 }
 0x7bf   : > { %6521 = vmatpush3.msra.mxu0 %v11456_v36 }
 0x7c0   : > { %6522 = vmatprep.subr.mxu0 %v11457_v37 }
 0x7c1   : > { %6523 = vmatpush3.msra.mxu0 %v11457_v37 }
 0x7c2   : > { %6568 = vmatprep.subr.mxu0 %v9025_v40 }
 0x83a   : > { %v6398_v12 = vpop.f32.mrf.mxu0 }
 0x83c   : > { %v1746_v38 = vpop.f32.mrf.mxu0 }
 0x83d   : > { %6486 = vmatprep.mubr.f32.mxu1 %v1746_v38 }
 0x83e   : > { %v6401_v42 = vpop.f32.mrf.mxu0  ;;  %6487 = vmatmul.mubr.f32.vlgmr.msra.gmra.mxu1 %v6398_v12 }
 0x83f   : > { %6531 = vmatpush3.msra.mxu1 %v8716_v19  ;;  %v11459_v19 = vld [vmem:[#allocation34_spill] sm:$0xff] }
 0x840   : > { %v1756_v27 = vpop.f32.mrf.mxu0  ;;  %6532 = vmatprep.subr.mxu1 %v8722_v29 }
 0x841   : > { %6489 = vmatprep.mubr.f32.mxu1 %v1756_v27  ;;  %6533 = vmatpush3.msra.mxu1 %v8722_v29 }
 0x842   : > { %v6412_v39 = vpop.f32.mrf.mxu0  ;;  %6490 = vmatmul.mubr.f32.gmra.mxu1 %v6401_v42  ;;  %6534 = vmatprep.subr.mxu1 %v11458_v47 }
 0x843   : > { %6535 = vmatpush3.msra.mxu1 %v11458_v47 }
 0x844   : > { %v1831_v14 = vpop.f32.mrf.mxu0  ;;  %6536 = vmatprep.subr.mxu1 %v8735_v21 }
 0x845   : > { %6524 = vmatprep.mubr.f32.mxu0 %v1831_v14  ;;  %6537 = vmatpush3.msra.mxu1 %v8735_v21  ;;  %v11461_v21 = vld [vmem:[#allocation36_spill] sm:$0xff] }
 0x846   : > { %v6415_v16 = vpop.f32.mrf.mxu0  ;;  %6525 = vmatmul.mubr.f32.vlgmr.msra.gmra.mxu0 %v6412_v39  ;;  %6538 = vmatprep.subr.mxu1 %v11459_v19 }
 0x847   : > { %6539 = vmatpush3.msra.mxu1 %v11459_v19  ;;  %6569 = vmatpush3.msra.mxu0 %v9025_v40 }
 0x848   : > { %v1841_v29 = vpop.f32.mrf.mxu0  ;;  %6540 = vmatprep.subr.mxu1 %v11460_v44  ;;  %6570 = vmatprep.subr.mxu0 %v9042_v20 }
 0x849   : > { %6527 = vmatprep.mubr.f32.mxu0 %v1841_v29  ;;  %6541 = vmatpush3.msra.mxu1 %v11460_v44  ;;  %v9178_v29 = vld [vmem:[%s11112_s7] sm:$0xff] }
 0x84a   : > { %6528 = vmatmul.mubr.f32.gmra.mxu0 %v6415_v16  ;;  %6542 = vmatprep.subr.mxu1 %v11461_v21  ;;  %v9182_v44 = vld [vmem:[#allocation2] sm:$0xff] }
 0x84b   : > { %6543 = vmatpush3.msra.mxu1 %v11461_v21  ;;  %6571 = vmatpush3.msra.mxu0 %v9042_v20  ;;  %v2203_v21 = vmul.f32 0.9777778, %v9182_v44 }
 0x84c   : > { %6544 = vmatprep.subr.mxu1 %v11462_v15  ;;  %6572 = vmatprep.subr.mxu0 %v9053_v41 }
 0x84d   : > { %6545 = vmatpush3.msra.mxu1 %v11462_v15  ;;  %6573 = vmatpush3.msra.mxu0 %v9053_v41  ;;  %v3489_v15 = vmul.f32 2.8462753, %v9182_v44 }
 0x84e   : > { %6546 = vmatprep.subr.mxu1 %v11463_v46  ;;  %6574 = vmatprep.subr.mxu0 %v9062_v25 }
 0x84f   : > { %6547 = vmatpush3.msra.mxu1 %v11463_v46  ;;  %6575 = vmatpush3.msra.mxu0 %v9062_v25  ;;  %v9187_v46 = vld [vmem:[#allocation2 + $0x10] sm:$0xff] }
 0x850   : > { %6548 = vmatprep.subr.mxu1 %v11464_v31  ;;  %6576 = vmatprep.subr.mxu0 %v9071_v51 }
 0x851   : > { %6549 = vmatpush3.msra.mxu1 %v11464_v31  ;;  %6577 = vmatpush3.msra.mxu0 %v9071_v51  ;;  %v2841_v31 = vmul.f32 2.9525986, %v9187_v46 }
 0x852   : > { %6550 = vmatprep.subr.mxu1 %v11465_v53  ;;  %6578 = vmatprep.subr.mxu0 %v9080_v58 }
 0x853   : > { %6551 = vmatpush3.msra.mxu1 %v11465_v53  ;;  %6579 = vmatpush3.msra.mxu0 %v9080_v58  ;;  %v3488_v53 = vmul.f32 2.8462753, %v9187_v46 }
 0x854   : > { %6552 = vmatprep.subr.mxu1 %v11466_v61  ;;  %6580 = vmatprep.subr.mxu0 %v9089_v62 }
 0x855   : > { %6553 = vmatpush3.msra.mxu1 %v11466_v61  ;;  %6581 = vmatpush3.msra.mxu0 %v9089_v62  ;;  %v9191_v61 = vld [vmem:[#allocation2 + $0x8] sm:$0xff] }
 0x856   : > { %6554 = vmatprep.subr.mxu1 %v11467_v63  ;;  %6582 = vmatprep.subr.mxu0 %v9098_v0 }
 0x857   : > { %6555 = vmatpush3.msra.mxu1 %v11467_v63  ;;  %6583 = vmatpush3.msra.mxu0 %v9098_v0  ;;  %v2844_v63 = vmul.f32 2.9525986, %v9191_v61 }
 0x858   : > { %6556 = vmatprep.subr.mxu1 %v11468_v1  ;;  %6584 = vmatprep.subr.mxu0 %v9107_v2 }
 0x859   : > { %6557 = vmatpush3.msra.mxu1 %v11468_v1  ;;  %6585 = vmatpush3.msra.mxu0 %v9107_v2  ;;  %v2202_v1 = vmul.f32 0.9777778, %v9187_v46 }
 0x85a   : > { %6558 = vmatprep.subr.mxu1 %v11469_v3  ;;  %6586 = vmatprep.subr.mxu0 %v9116_v4 }
 0x85b   : > { %6559 = vmatpush3.msra.mxu1 %v11469_v3  ;;  %6587 = vmatpush3.msra.mxu0 %v9116_v4  ;;  %v2207_v3 = vmul.f32 -3.7333333, %v8874_v23 }
 0x85c   : > { %6560 = vmatprep.subr.mxu1 %v11470_v5  ;;  %6588 = vmatprep.subr.mxu0 %v9125_v6 }
 0x85d   : > { %6561 = vmatpush3.msra.mxu1 %v11470_v5  ;;  %6589 = vmatpush3.msra.mxu0 %v9125_v6  ;;  %v3491_v5 = vmul.f32 2.8462753, %v9191_v61 }
 0x85e   : > { %6590 = vmatprep.subr.mxu0 %v9133_v7 }
 0x85f   : > { %6591 = vmatpush3.msra.mxu0 %v9133_v7 }
 0x860   : > { %6592 = vmatprep.subr.mxu0 %v9140_v8 }
 0x861   : > { %6593 = vmatpush3.msra.mxu0 %v9140_v8 }
 0x862   : > { %6594 = vmatprep.subr.mxu0 %v9147_v9  ;;  %v6450_v35 = vpop.f32.mrf.mxu0 }
 0x863   : > { %6595 = vmatpush3.msra.mxu0 %v9147_v9 }
 0x864   : > { %6596 = vmatprep.subr.mxu0 %v9154_v10  ;;  %v1916_v43 = vpop.f32.mrf.mxu0 }
 0x865   : > { %6597 = vmatpush3.msra.mxu0 %v9154_v10 }
 0x866   : > { %6598 = vmatprep.subr.mxu0 %v9161_v13  ;;  %v6453_v48 = vpop.f32.mrf.mxu0 }
 0x867   : > { %6599 = vmatpush3.msra.mxu0 %v9161_v13 }
 0x868   : > { %6672 = vmatprep.subr.mxu0 %v9168_v33  ;;  %v1926_v52 = vpop.f32.mrf.mxu0 }
 0x8fe   : > { %v6488_v45 = vpop.f32.mrf.mxu1 }
 0x8ff   : > { %v2007_v56 = vadd.f32 %v6488_v45, %v6450_v35  ;;  %v2205_v35 = vmul.f32 0.9777778, %v9191_v61  ;;  %v3493_v45 = vmul.f32 -10.757576, %v8874_v23 }
 0x900   : > { %v2001_v49 = vpop.f32.mrf.mxu1 }
 0x901   : > { %v2002_v59 = vadd.f32 %v2001_v49, %v1916_v43  ;;  %v2846_v43 = vmul.f32 -11.595794, %v8874_v23  ;;  %v2206_v49 = vmul.f32 -3.7333333, %v8879_v17  ;;  %v2208_v23 = vmul.f32 -3.7333333, %v8887_v54 }
 0x902   : > { %v6491_v55 = vpop.f32.mrf.mxu1 }
 0x903   : > { %v2017_v26 = vadd.f32 %v6491_v55, %v6453_v48  ;;  %v2845_v48 = vmul.f32 -11.595794, %v8879_v17  ;;  %v2848_v55 = vmul.f32 -11.595794, %v8884_v50 }
 0x904   : > { %v2011_v22 = vpop.f32.mrf.mxu1 }
 0x905   : > { %v2012_v36 = vadd.f32 %v2011_v22, %v1926_v52  ;;  %v3492_v52 = vmul.f32 -10.757576, %v8879_v17  ;;  %v2211_v22 = vadd.f32 %v2207_v3, %v2203_v21  ;;  %v3497_v17 = vadd.f32 %v3493_v45, %v3489_v15 }
 0x906   : > { %v6526_v57 = vpop.f32.mrf.mxu0 }
 0x907   : > { %v2106_v11 = vadd.f32 %v6526_v57, %v2007_v56  ;;  %v9204_v56 = vld [vmem:[#allocation2 + $0x18] sm:$0xff] }
 0x908   : > { %v2086_v18 = vpop.f32.mrf.mxu0  ;;  %v2843_v57 = vmul.f32 2.9525986, %v9204_v56 }
 0x909   : > { %v2105_v28 = vadd.f32 %v2086_v18, %v2002_v59  ;;  %v2110_v60 = vadd.f32 %v8860_v34, %v2106_v11  ;;  %v3490_v59 = vmul.f32 2.8462753, %v9204_v56  ;;  %v2204_v11 = vmul.f32 0.9777778, %v9204_v56 }
 0x90a   : > { %v6529_v32 = vpop.f32.mrf.mxu0  ;;  %v3495_v18 = vmul.f32 -10.757576, %v8884_v50 }
 0x90b   : > { %v2109_v37 = vadd.f32 %v8860_v34, %v2105_v28  ;;  %v2108_v12 = vadd.f32 %v6529_v32, %v2017_v26  ;;  %v2114_v39 = vmax.f32 %v2110_v60, 0.0  ;;  %v2847_v26 = vmul.f32 -11.595794, %v8887_v54 }
 0x90c   : > { %v2096_v38 = vpop.f32.mrf.mxu0  ;;  %v2849_v32 = vadd.f32 %v2845_v48, %v2841_v31  ;;  %v2212_v31 = vadd.f32 %v2208_v23, %v2204_v11 }
 0x90d   : > { %v2113_v42 = vmax.f32 %v2109_v37, 0.0  ;;  %v2107_v27 = vadd.f32 %v2096_v38, %v2012_v36  ;;  %v2112_v47 = vadd.f32 %v8860_v34, %v2108_v12  ;;  %v3496_v37 = vadd.f32 %v3492_v52, %v3488_v53 }
 0x90e   : > { %v2209_v12 = vmul.f32 -3.7333333, %v8884_v50  ;;  %v2852_v38 = vadd.f32 %v2848_v55, %v2844_v63  ;;  %v2851_v21 = vadd.f32 %v2847_v26, %v2843_v57 }
 0x90f   : > { %v2111_v14 = vadd.f32 %v8860_v34, %v2107_v27  ;;  %6562 = vmatprep.mubr.f32.mxu1 %v2113_v42  ;;  %v2116_v19 = vmax.f32 %v2112_v47, 0.0  ;;  %v2842_v34 = vmul.f32 2.9525986, %v9182_v44  ;;  %v2210_v27 = vadd.f32 %v2206_v49, %v2202_v1 }
 0x910   : > { %6563 = vmatmul.mubr.f32.vlgmr.msra.gmra.mxu1 %v2114_v39 }
 0x911   : > { %v2115_v16 = vmax.f32 %v2111_v14, 0.0  ;;  %v2850_v60 = vadd.f32 %v2846_v43, %v2842_v34  ;;  %v3494_v34 = vmul.f32 -10.757576, %v8887_v54  ;;  %v2213_v43 = vadd.f32 %v2209_v12, %v2205_v35 }
 0x913   : > { %6565 = vmatprep.mubr.f32.mxu1 %v2115_v16 }
 0x914   : > { %6566 = vmatmul.mubr.f32.gmra.mxu1 %v2116_v19  ;;  %v3499_v19 = vadd.f32 %v3495_v18, %v3491_v5  ;;  %v3498_v18 = vadd.f32 %v3494_v34, %v3490_v59 }
 0x915   : > { %6614 = vmatprep.mubr.msk.f32.mxu1 %vm159_vm0, %v9178_v29 }
 0x9d0   : > { %v6564_v28 = vpop.f32.mrf.mxu1 }
 0x9d1   : > { %v9213_v36 = vadd.f32 %v6564_v28, %v8871_v24 }
 0x9d2   : > { %v2183_v42 = vpop.f32.mrf.mxu1 }
 0x9d3   : > { %v2215_v39 = vmul.f32 3.5555556, %v9213_v36  ;;  %v2854_v47 = vmul.f32 9.822893, %v9213_v36  ;;  %v9219_v14 = vadd.f32 %v8871_v24, %v2183_v42  ;;  %v3501_v16 = vmul.f32 8.906423, %v9213_v36 }
 0x9d4   : > { %v6567_v15 = vpop.f32.mrf.mxu1  ;;  %v9261_v42 = vld [vmem:[%s11114_s9 + $0x8] sm:$0xff] }
 0x9d5   : > { %v2219_v53 = vadd.f32 %v2215_v39, %v2211_v22  ;;  %v9224_v50 = vadd.f32 %v6567_v15, %v8871_v24  ;;  %v2214_v63 = vmul.f32 3.5555556, %v9219_v14  ;;  %v9227_v1 = vadd.f32 %v2854_v47, %v2850_v60 }
 0x9d6   : > { %v2193_v3 = vpop.f32.mrf.mxu1  ;;  %v2853_v45 = vmul.f32 9.822893, %v9219_v14  ;;  %v9230_v48 = vadd.f32 %v3501_v16, %v3497_v17  ;;  %v3500_v5 = vmul.f32 8.906423, %v9219_v14 }
 0x9d7   : > { %v9234_v54 = vadd.f32 %v8871_v24, %v2193_v3  ;;  %v2218_v49 = vadd.f32 %v2214_v63, %v2210_v27  ;;  %v2223_v52 = vmul.f32 %v2219_v53, %v8170_v30  ;;  %v2217_v55 = vmul.f32 3.5555556, %v9224_v50  ;;  %v9293_v53 = vld [vmem:[%s11108_s3 + $0x68] sm:$0xff]  ;;  %v9300_v63 = vld [vmem:[%s11108_s3 + $0x60] sm:$0xff]  ;;  %v9307_v3 = vld [vmem:[%s11108_s3 + $0x58] sm:$0xff] }
 0x9d8   : > { %v9238_v57 = vadd.f32 %v2853_v45, %v2849_v32  ;;  %v2856_v11 = vmul.f32 9.822893, %v9224_v50  ;;  %v9241_v22 = vadd.f32 %v3500_v5, %v3496_v37  ;;  %v3503_v35 = vmul.f32 8.906423, %v9224_v50  ;;  %v9255_v37 = vld [vmem:[%s11114_s9] sm:$0xff]  ;;  %v9321_v45 = vld [vmem:[%s11108_s3 + $0x48] sm:$0xff] }
 0x9d9   : > { %v2222_v23 = vmul.f32 %v2218_v49, %v8170_v30  ;;  %v2216_v26 = vmul.f32 3.5555556, %v9234_v54  ;;  %v2221_v24 = vadd.f32 %v2217_v55, %v2213_v43  ;;  %v2855_v28 = vmul.f32 9.822893, %v9234_v54  ;;  %v9314_v43 = vld [vmem:[%s11108_s3 + $0x50] sm:$0xff]  ;;  %v9328_v5 = vld [vmem:[%s11108_s3 + $0x40] sm:$0xff] }
 0x9da   : > { %v9247_v60 = vadd.f32 %v2856_v11, %v2852_v38  ;;  %v9249_v17 = vadd.f32 %v3503_v35, %v3499_v19  ;;  %v3502_v32 = vmul.f32 8.906423, %v9234_v54  ;;  %v2227_v38 = vadd.f32 %v9261_v42, %v2223_v52  ;;  %v9273_v19 = vld [vmem:[%s11114_s9 + $0x10] sm:$0xff]  ;;  %v9335_v49 = vld [vmem:[%s11108_s3 + $0x38] sm:$0xff]  ;;  %v9349_v55 = vld [vmem:[%s11108_s3 + $0x28] sm:$0xff] }
 0x9db   : > { %v2226_v59 = vadd.f32 %v9255_v37, %v2222_v23  ;;  %v2220_v12 = vadd.f32 %v2216_v26, %v2212_v31  ;;  %v2225_v27 = vmul.f32 %v2221_v24, %v8170_v30  ;;  %v9265_v39 = vadd.f32 %v2855_v28, %v2851_v21  ;;  %v9280_v21 = vld [vmem:[%s11114_s9 + $0x18] sm:$0xff]  ;;  %v9286_v31 = vld [vmem:[%s11108_s3 + $0x70] sm:$0xff]  ;;  %v9356_v11 = vld [vmem:[%s11108_s3 + $0x20] sm:$0xff] }
 0x9dc   : > { %v9267_v47 = vadd.f32 %v3502_v32, %v3498_v18  ;;  %v9342_v52 = vld [vmem:[%s11108_s3 + $0x30] sm:$0xff]  ;;  %v9363_v35 = vld [vmem:[%s11108_s3 + $0x18] sm:$0xff]  ;;  %v9377_v23 = vld [vmem:[%s11108_s3 + $0x8] sm:$0xff] }
 0x9dd   : > { %6600 = vmatprep.mubr.f32.mxu0 %v2226_v59  ;;  %v2224_v16 = vmul.f32 %v2220_v12, %v8170_v30  ;;  %v2229_v15 = vadd.f32 %v9280_v21, %v2225_v27  ;;  %v9370_v18 = vld [vmem:[%s11108_s3 + $0x10] sm:$0xff]  ;;  %11472 = vst [vmem:[#allocation7_spill] sm:$0xff] %v9377_v23  ;;  %v9384_v26 = vld [vmem:[%s11108_s3] sm:$0xff]  ;;  %v9391_v24 = vld [vmem:[%s11110_s5 + $0x78] sm:$0xff] }
 0x9de   : > { %6601 = vmatmul.mubr.f32.vlgmr.msra.gmra.mxu0 %v2227_v38  ;;  %11471 = vst [vmem:[#allocation6_spill] sm:$0xff] %v9370_v18  ;;  %11473 = vst [vmem:[#allocation8_spill] sm:$0xff] %v9384_v26  ;;  %v9397_v12 = vld [vmem:[%s11107_s2] ss:$0 sm:$0xff] }
 0x9df   : > { %v2228_v34 = vadd.f32 %v9273_v19, %v2224_v16  ;;  %6673 = vmatpush3.msra.mxu0 %v9168_v33 }
 0x9e0   : > { %6674 = vmatprep.subr.mxu0 %v9286_v31 }
 0x9e1   : > { %6603 = vmatprep.mubr.f32.mxu0 %v2228_v34  ;;  %6675 = vmatpush3.msra.mxu0 %v9286_v31 }
 0x9e2   : > { %6604 = vmatmul.mubr.f32.gmra.mxu0 %v2229_v15  ;;  %6676 = vmatprep.subr.mxu0 %v9293_v53 }
 0x9e3   : > { %6677 = vmatpush3.msra.mxu0 %v9293_v53 }
 0x9e4   : > { %6678 = vmatprep.subr.mxu0 %v9300_v63 }
 0x9e5   : > { %6679 = vmatpush3.msra.mxu0 %v9300_v63 }
 0x9e6   : > { %6680 = vmatprep.subr.mxu0 %v9307_v3 }
 0x9e7   : > { %6681 = vmatpush3.msra.mxu0 %v9307_v3 }
 0x9e8   : > { %6682 = vmatprep.subr.mxu0 %v9314_v43 }
 0x9e9   : > { %6683 = vmatpush3.msra.mxu0 %v9314_v43 }
 0x9ea   : > { %6684 = vmatprep.subr.mxu0 %v9321_v45 }
 0x9eb   : > { %6685 = vmatpush3.msra.mxu0 %v9321_v45 }
 0x9ec   : > { %6686 = vmatprep.subr.mxu0 %v9328_v5 }
 0x9ed   : > { %6687 = vmatpush3.msra.mxu0 %v9328_v5 }
 0x9ee   : > { %6688 = vmatprep.subr.mxu0 %v9335_v49 }
 0x9ef   : > { %6689 = vmatpush3.msra.mxu0 %v9335_v49 }
 0x9f0   : > { %6690 = vmatprep.subr.mxu0 %v9342_v52 }
 0x9f1   : > { %6691 = vmatpush3.msra.mxu0 %v9342_v52 }
 0x9f2   : > { %6692 = vmatprep.subr.mxu0 %v9349_v55 }
 0x9f3   : > { %6693 = vmatpush3.msra.mxu0 %v9349_v55 }
 0x9f4   : > { %6694 = vmatprep.subr.mxu0 %v9356_v11 }
 0x9f5   : > { %6695 = vmatpush3.msra.mxu0 %v9356_v11 }
 0x9f6   : > { %6696 = vmatprep.subr.mxu0 %v9363_v35 }
 0x9f7   : > { %6697 = vmatpush3.msra.mxu0 %v9363_v35 }
 0x9f8   : > { %6698 = vmatprep.subr.mxu0 %v9370_v18 }
 0x9f9   : > { %6699 = vmatpush3.msra.mxu0 %v9370_v18 }
 0x9fa   : > { %6700 = vmatprep.subr.mxu0 %v9377_v23 }
 0x9fb   : > { %6701 = vmatpush3.msra.mxu0 %v9377_v23 }
 0x9fc   : > { %6702 = vmatprep.subr.mxu0 %v9384_v26 }
 0x9fd   : > { %6703 = vmatpush3.msra.mxu0 %v9384_v26 }
 0x9fe   : > { %6748 = vmatprep.subr.mxu0 %v9391_v24 }
 0xa9e   : > { %v6602_v28 = vpop.f32.mrf.mxu0 }
 0xa9f   : > { %v2302_v16 = vadd.f32 %v9397_v12, %v6602_v28  ;;  %v9418_v28 = vld [vmem:[%s11112_s7 + $0x8] sm:$0xff] }
 0xaa0   : > { %v2296_v32 = vpop.f32.mrf.mxu0  ;;  %11474 = vst [vmem:[#allocation9_spill] sm:$0xff] %v9418_v28 }
 0xaa1   : > { %v2297_v26 = vadd.f32 %v9397_v12, %v2296_v32  ;;  %v9409_v18 = vmax.f32 %v2302_v16, 0.0  ;;  %v9436_v32 = vld [vmem:[%s11112_s7 + $0x18] sm:$0xff] }
 0xaa2   : > { %v6605_v59 = vpop.f32.mrf.mxu0  ;;  %11476 = vst [vmem:[#allocation11_spill] sm:$0xff] %v9436_v32  ;;  %v9459_v16 = vld [vmem:[%s11108_s3 + $0xf8] sm:$0xff] }
 0xaa3   : > { %v2312_v38 = vadd.f32 %v9397_v12, %v6605_v59  ;;  %v2315_v59 = vmax.f32 %v2297_v26, 0.0  ;;  %v9427_v26 = vld [vmem:[%s11112_s7 + $0x10] sm:$0xff]  ;;  %11479 = vst [vmem:[#allocation14_spill] sm:$0xff] %v9459_v16 }
 0xaa4   : > { %v2306_v27 = vpop.f32.mrf.mxu0  ;;  %11475 = vst [vmem:[#allocation10_spill] sm:$0xff] %v9427_v26 }
 0xaa5   : > { %v9401_v34 = vmax.f32 %v2312_v38, 0.0  ;;  %v2307_v15 = vadd.f32 %v9397_v12, %v2306_v27  ;;  %v9445_v38 = vld [vmem:[%s11113_s8] sm:$0xff]  ;;  %v9452_v27 = vld [vmem:[%s11113_s8 + $0x8] sm:$0xff] }
 0xaa6   : > { %11477 = vst [vmem:[#allocation12_spill] sm:$0xff] %v9445_v38  ;;  %11478 = vst [vmem:[#allocation13_spill] sm:$0xff] %v9452_v27 }
 0xaa7   : > { %v9405_v23 = vmax.f32 %v2307_v15, 0.0  ;;  %6606 = vmatprep.subr.mxu1 %v9401_v34  ;;  %v9466_v15 = vld [vmem:[%s11113_s8 + $0x10] sm:$0xff] }
 0xaa8   : > { %6607 = vmatpush3.msra.mxu1 %v9401_v34  ;;  %11480 = vst [vmem:[#allocation15_spill] sm:$0xff] %v9466_v15 }
 0xaa9   : > { %6608 = vmatprep.subr.mxu1 %v9405_v23 }
 0xaaa   : > { %6609 = vmatpush3.msra.mxu1 %v9405_v23 }
 0xaab   : > { %6610 = vmatprep.subr.mxu1 %v9409_v18 }
 0xaac   : > { %6611 = vmatpush3.msra.mxu1 %v9409_v18 }
 0xaad   : > { %6612 = vmatprep.subr.mxu1 %v2315_v59 }
 0xaae   : > { %6613 = vmatpush3.msra.mxu1 %v2315_v59 }
 0xaaf   : > { %6615 = vmatmul.mubr.msk.f32.vlgmr.msra.gmra.mxu1 %vm159_vm0, %v9418_v28  ;;  %6620 = vmatprep.subr.mxu1 %v9401_v34 }
 0xab0   : > { %6621 = vmatpush3.msra.mxu1 %v9401_v34  ;;  %6617 = vmatprep.mubr.msk.f32.mxu1 %vm159_vm0, %v9427_v26 }
 0xab1   : > { %6622 = vmatprep.subr.mxu1 %v9405_v23 }
 0xab2   : > { %6623 = vmatpush3.msra.mxu1 %v9405_v23 }
 0xab3   : > { %6618 = vmatmul.mubr.msk.f32.gmra.mxu1 %vm159_vm0, %v9436_v32  ;;  %6624 = vmatprep.subr.mxu1 %v9409_v18 }
 0xab4   : > { %6625 = vmatpush3.msra.mxu1 %v9409_v18  ;;  %6628 = vmatprep.mubr.msk.f32.mxu1 %vm159_vm0, %v9445_v38 }
 0xab5   : > { %6626 = vmatprep.subr.mxu1 %v2315_v59 }
 0xab6   : > { %6627 = vmatpush3.msra.mxu1 %v2315_v59 }
 0xab7   : > { %6629 = vmatmul.mubr.msk.f32.vlgmr.msra.gmra.mxu1 %vm159_vm0, %v9452_v27  ;;  %6634 = vmatprep.subr.mxu1 %v9459_v16  ;;  %v9473_v27 = vld [vmem:[%s11108_s3 + $0xf0] sm:$0xff] }
 0xab8   : > { %6635 = vmatpush3.msra.mxu1 %v9459_v16  ;;  %6631 = vmatprep.mubr.msk.f32.mxu1 %vm159_vm0, %v9466_v15  ;;  %11481 = vst [vmem:[#allocation16_spill] sm:$0xff] %v9473_v27  ;;  %v9480_v16 = vld [vmem:[%s11113_s8 + $0x18] sm:$0xff]  ;;  %v9487_v15 = vld [vmem:[%s11108_s3 + $0xe8] sm:$0xff] }
 0xab9   : > { %6636 = vmatprep.subr.mxu1 %v9473_v27  ;;  %11482 = vst [vmem:[#allocation17_spill] sm:$0xff] %v9480_v16  ;;  %11483 = vst [vmem:[#allocation18_spill] sm:$0xff] %v9487_v15 }
 0xaba   : > { %6637 = vmatpush3.msra.mxu1 %v9473_v27  ;;  %v9494_v27 = vld [vmem:[%s11108_s3 + $0xe0] sm:$0xff] }
 0xabb   : > { %6632 = vmatmul.mubr.msk.f32.gmra.mxu1 %vm159_vm0, %v9480_v16  ;;  %6638 = vmatprep.subr.mxu1 %v9487_v15  ;;  %11484 = vst [vmem:[#allocation19_spill] sm:$0xff] %v9494_v27  ;;  %v9501_v16 = vld [vmem:[%s11108_s3 + $0xd8] sm:$0xff] }
 0xabc   : > { %6639 = vmatpush3.msra.mxu1 %v9487_v15  ;;  %6666 = vmatprep.mubr.f32.mxu1 %v2315_v59  ;;  %11485 = vst [vmem:[#allocation20_spill] sm:$0xff] %v9501_v16  ;;  %v9508_v59 = vld [vmem:[%s11108_s3 + $0xd0] sm:$0xff]  ;;  %v9716_v15 = vld [vmem:[%s11110_s5 + $0x60] sm:$0xff] }
 0xabd   : > { %6640 = vmatprep.subr.mxu1 %v9494_v27  ;;  %11486 = vst [vmem:[#allocation21_spill] sm:$0xff] %v9508_v59  ;;  %11515 = vst [vmem:[#allocation50_spill] sm:$0xff] %v9716_v15 }
 0xabe   : > { %6641 = vmatpush3.msra.mxu1 %v9494_v27  ;;  %v9515_v27 = vld [vmem:[%s11108_s3 + $0xc8] sm:$0xff] }
 0xabf   : > { %6642 = vmatprep.subr.mxu1 %v9501_v16  ;;  %11487 = vst [vmem:[#allocation22_spill] sm:$0xff] %v9515_v27 }
 0xac0   : > { %6643 = vmatpush3.msra.mxu1 %v9501_v16  ;;  %v9522_v16 = vld [vmem:[%s11108_s3 + $0xc0] sm:$0xff] }
 0xac1   : > { %6644 = vmatprep.subr.mxu1 %v9508_v59  ;;  %11488 = vst [vmem:[#allocation23_spill] sm:$0xff] %v9522_v16 }
 0xac2   : > { %6645 = vmatpush3.msra.mxu1 %v9508_v59  ;;  %v9529_v59 = vld [vmem:[%s11108_s3 + $0xb8] sm:$0xff] }
 0xac3   : > { %6646 = vmatprep.subr.mxu1 %v9515_v27  ;;  %11489 = vst [vmem:[#allocation24_spill] sm:$0xff] %v9529_v59 }
 0xac4   : > { %6647 = vmatpush3.msra.mxu1 %v9515_v27  ;;  %v9536_v27 = vld [vmem:[%s11108_s3 + $0xb0] sm:$0xff] }
 0xac5   : > { %6648 = vmatprep.subr.mxu1 %v9522_v16  ;;  %11490 = vst [vmem:[#allocation25_spill] sm:$0xff] %v9536_v27 }
 0xac6   : > { %6649 = vmatpush3.msra.mxu1 %v9522_v16  ;;  %v9543_v16 = vld [vmem:[%s11108_s3 + $0xa8] sm:$0xff] }
 0xac7   : > { %6650 = vmatprep.subr.mxu1 %v9529_v59  ;;  %11491 = vst [vmem:[#allocation26_spill] sm:$0xff] %v9543_v16 }
 0xac8   : > { %6651 = vmatpush3.msra.mxu1 %v9529_v59  ;;  %v9550_v59 = vld [vmem:[%s11108_s3 + $0xa0] sm:$0xff] }
 0xac9   : > { %6652 = vmatprep.subr.mxu1 %v9536_v27  ;;  %11492 = vst [vmem:[#allocation27_spill] sm:$0xff] %v9550_v59 }
 0xaca   : > { %6653 = vmatpush3.msra.mxu1 %v9536_v27  ;;  %v9557_v27 = vld [vmem:[%s11108_s3 + $0x98] sm:$0xff] }
 0xacb   : > { %6654 = vmatprep.subr.mxu1 %v9543_v16  ;;  %11493 = vst [vmem:[#allocation28_spill] sm:$0xff] %v9557_v27 }
 0xacc   : > { %6655 = vmatpush3.msra.mxu1 %v9543_v16  ;;  %v9564_v16 = vld [vmem:[%s11108_s3 + $0x90] sm:$0xff] }
 0xacd   : > { %6656 = vmatprep.subr.mxu1 %v9550_v59  ;;  %11494 = vst [vmem:[#allocation29_spill] sm:$0xff] %v9564_v16 }
 0xace   : > { %6657 = vmatpush3.msra.mxu1 %v9550_v59  ;;  %v9571_v59 = vld [vmem:[%s11108_s3 + $0x88] sm:$0xff] }
 0xacf   : > { %6658 = vmatprep.subr.mxu1 %v9557_v27  ;;  %11495 = vst [vmem:[#allocation30_spill] sm:$0xff] %v9571_v59 }
 0xad0   : > { %6659 = vmatpush3.msra.mxu1 %v9557_v27  ;;  %v9578_v27 = vld [vmem:[%s11108_s3 + $0x80] sm:$0xff] }
 0xad1   : > { %6660 = vmatprep.subr.mxu1 %v9564_v16  ;;  %11496 = vst [vmem:[#allocation31_spill] sm:$0xff] %v9578_v27 }
 0xad2   : > { %6661 = vmatpush3.msra.mxu1 %v9564_v16  ;;  %v9586_v16 = vld [vmem:[%s11108_s3 + $0x178] sm:$0xff] }
 0xad3   : > { %6662 = vmatprep.subr.mxu1 %v9571_v59  ;;  %11497 = vst [vmem:[#allocation32_spill] sm:$0xff] %v9586_v16 }
 0xad4   : > { %6663 = vmatpush3.msra.mxu1 %v9571_v59  ;;  %v9594_v59 = vld [vmem:[%s11108_s3 + $0x170] sm:$0xff] }
 0xad5   : > { %6664 = vmatprep.subr.mxu1 %v9578_v27  ;;  %11498 = vst [vmem:[#allocation33_spill] sm:$0xff] %v9594_v59 }
 0xad6   : > { %6665 = vmatpush3.msra.mxu1 %v9578_v27 }
 0xad7   : > { %6667 = vmatmul.mubr.f32.vlgmr.msra.gmra.mxu1 %v9409_v18  ;;  %6710 = vmatprep.subr.mxu1 %v9586_v16  ;;  %v9602_v18 = vld [vmem:[%s11108_s3 + $0x168] sm:$0xff] }
 0xad8   : > { %6669 = vmatprep.mubr.f32.mxu1 %v9405_v23  ;;  %6711 = vmatpush3.msra.mxu1 %v9586_v16  ;;  %11499 = vst [vmem:[#allocation34_spill] sm:$0xff] %v9602_v18  ;;  %v9609_v23 = vld [vmem:[%s11108_s3 + $0x160] sm:$0xff] }
 0xad9   : > { %6712 = vmatprep.subr.mxu1 %v9594_v59  ;;  %11500 = vst [vmem:[#allocation35_spill] sm:$0xff] %v9609_v23 }
 0xada   : > { %6713 = vmatpush3.msra.mxu1 %v9594_v59 }
 0xadb   : > { %6670 = vmatmul.mubr.f32.gmra.mxu1 %v9401_v34  ;;  %6714 = vmatprep.subr.mxu1 %v9602_v18  ;;  %v9616_v34 = vld [vmem:[%s11108_s3 + $0x158] sm:$0xff] }
 0xadc   : > { %6715 = vmatpush3.msra.mxu1 %v9602_v18  ;;  %11501 = vst [vmem:[#allocation36_spill] sm:$0xff] %v9616_v34  ;;  %v9623_v18 = vld [vmem:[%s11108_s3 + $0x150] sm:$0xff] }
 0xadd   : > { %6716 = vmatprep.subr.mxu1 %v9609_v23  ;;  %11502 = vst [vmem:[#allocation37_spill] sm:$0xff] %v9623_v18 }
 0xade   : > { %6717 = vmatpush3.msra.mxu1 %v9609_v23  ;;  %v9630_v23 = vld [vmem:[%s11108_s3 + $0x148] sm:$0xff] }
 0xadf   : > { %6718 = vmatprep.subr.mxu1 %v9616_v34  ;;  %11503 = vst [vmem:[#allocation38_spill] sm:$0xff] %v9630_v23 }
 0xae0   : > { %6719 = vmatpush3.msra.mxu1 %v9616_v34  ;;  %v9637_v34 = vld [vmem:[%s11108_s3 + $0x140] sm:$0xff] }
 0xae1   : > { %6720 = vmatprep.subr.mxu1 %v9623_v18  ;;  %11504 = vst [vmem:[#allocation39_spill] sm:$0xff] %v9637_v34 }
 0xae2   : > { %6721 = vmatpush3.msra.mxu1 %v9623_v18  ;;  %v9644_v18 = vld [vmem:[%s11108_s3 + $0x138] sm:$0xff] }
 0xae3   : > { %6722 = vmatprep.subr.mxu1 %v9630_v23  ;;  %11505 = vst [vmem:[#allocation40_spill] sm:$0xff] %v9644_v18 }
 0xae4   : > { %6723 = vmatpush3.msra.mxu1 %v9630_v23  ;;  %v9651_v23 = vld [vmem:[%s11108_s3 + $0x130] sm:$0xff] }
 0xae5   : > { %6724 = vmatprep.subr.mxu1 %v9637_v34  ;;  %11506 = vst [vmem:[#allocation41_spill] sm:$0xff] %v9651_v23 }
 0xae6   : > { %6725 = vmatpush3.msra.mxu1 %v9637_v34  ;;  %v9658_v34 = vld [vmem:[%s11108_s3 + $0x128] sm:$0xff] }
 0xae7   : > { %6726 = vmatprep.subr.mxu1 %v9644_v18  ;;  %11507 = vst [vmem:[#allocation42_spill] sm:$0xff] %v9658_v34 }
 0xae8   : > { %6727 = vmatpush3.msra.mxu1 %v9644_v18  ;;  %v9665_v18 = vld [vmem:[%s11108_s3 + $0x120] sm:$0xff] }
 0xae9   : > { %6728 = vmatprep.subr.mxu1 %v9651_v23  ;;  %11508 = vst [vmem:[#allocation43_spill] sm:$0xff] %v9665_v18 }
 0xaea   : > { %6729 = vmatpush3.msra.mxu1 %v9651_v23  ;;  %v9672_v23 = vld [vmem:[%s11108_s3 + $0x118] sm:$0xff] }
 0xaeb   : > { %6730 = vmatprep.subr.mxu1 %v9658_v34  ;;  %11509 = vst [vmem:[#allocation44_spill] sm:$0xff] %v9672_v23 }
 0xaec   : > { %6731 = vmatpush3.msra.mxu1 %v9658_v34  ;;  %v9679_v34 = vld [vmem:[%s11108_s3 + $0x110] sm:$0xff] }
 0xaed   : > { %6732 = vmatprep.subr.mxu1 %v9665_v18  ;;  %11510 = vst [vmem:[#allocation45_spill] sm:$0xff] %v9679_v34 }
 0xaee   : > { %6733 = vmatpush3.msra.mxu1 %v9665_v18  ;;  %v9686_v18 = vld [vmem:[%s11108_s3 + $0x108] sm:$0xff] }
 0xaef   : > { %6734 = vmatprep.subr.mxu1 %v9672_v23  ;;  %11511 = vst [vmem:[#allocation46_spill] sm:$0xff] %v9686_v18 }
 0xaf0   : > { %6735 = vmatpush3.msra.mxu1 %v9672_v23  ;;  %v9693_v23 = vld [vmem:[%s11108_s3 + $0x100] sm:$0xff] }
 0xaf1   : > { %6736 = vmatprep.subr.mxu1 %v9679_v34  ;;  %11512 = vst [vmem:[#allocation47_spill] sm:$0xff] %v9693_v23 }
 0xaf2   : > { %6737 = vmatpush3.msra.mxu1 %v9679_v34 }
 0xaf3   : > { %6738 = vmatprep.subr.mxu1 %v9686_v18 }
 0xaf4   : > { %6739 = vmatpush3.msra.mxu1 %v9686_v18  ;;  %v9702_v18 = vld [vmem:[%s11110_s5 + $0x70] sm:$0xff] }
 0xaf5   : > { %6740 = vmatprep.subr.mxu1 %v9693_v23  ;;  %11513 = vst [vmem:[#allocation48_spill] sm:$0xff] %v9702_v18 }
 0xaf6   : > { %6741 = vmatpush3.msra.mxu1 %v9693_v23 }
 0xaf7   : > { %6786 = vmatprep.subr.mxu1 %v9025_v40 }
 0xb6f   : > { %v6616_v34 = vpop.f32.mrf.mxu1 }
 0xb71   : > { %v2385_v59 = vpop.f32.mrf.mxu1 }
 0xb72   : > { %6704 = vmatprep.mubr.f32.mxu0 %v2385_v59  ;;  %v9709_v59 = vld [vmem:[%s11110_s5 + $0x68] sm:$0xff] }
 0xb73   : > { %v6619_v16 = vpop.f32.mrf.mxu1  ;;  %6705 = vmatmul.mubr.f32.vlgmr.msra.gmra.mxu0 %v6616_v34  ;;  %11514 = vst [vmem:[#allocation49_spill] sm:$0xff] %v9709_v59 }
 0xb74   : > { %6749 = vmatpush3.msra.mxu0 %v9391_v24 }
 0xb75   : > { %v2395_v27 = vpop.f32.mrf.mxu1  ;;  %6750 = vmatprep.subr.mxu0 %v9702_v18 }
 0xb76   : > { %6707 = vmatprep.mubr.f32.mxu0 %v2395_v27  ;;  %6751 = vmatpush3.msra.mxu0 %v9702_v18 }
 0xb77   : > { %v6630_v23 = vpop.f32.mrf.mxu1  ;;  %6708 = vmatmul.mubr.f32.gmra.mxu0 %v6619_v16  ;;  %6752 = vmatprep.subr.mxu0 %v9709_v59  ;;  %v9723_v16 = vld [vmem:[%s11110_s5 + $0x58] sm:$0xff] }
 0xb78   : > { %6753 = vmatpush3.msra.mxu0 %v9709_v59  ;;  %11516 = vst [vmem:[#allocation51_spill] sm:$0xff] %v9723_v16 }
 0xb79   : > { %v2470_v34 = vpop.f32.mrf.mxu1  ;;  %6754 = vmatprep.subr.mxu0 %v9716_v15 }
 0xb7a   : > { %6742 = vmatprep.mubr.f32.mxu1 %v2470_v34  ;;  %6755 = vmatpush3.msra.mxu0 %v9716_v15  ;;  %v9731_v34 = vld [vmem:[%s11110_s5 + $0x50] sm:$0xff] }
 0xb7b   : > { %v6633_v27 = vpop.f32.mrf.mxu1  ;;  %6743 = vmatmul.mubr.f32.vlgmr.msra.gmra.mxu1 %v6630_v23  ;;  %6756 = vmatprep.subr.mxu0 %v9723_v16  ;;  %11517 = vst [vmem:[#allocation52_spill] sm:$0xff] %v9731_v34  ;;  %v9739_v23 = vld [vmem:[%s11110_s5 + $0x48] sm:$0xff] }
 0xb7c   : > { %6757 = vmatpush3.msra.mxu0 %v9723_v16  ;;  %6787 = vmatpush3.msra.mxu1 %v9025_v40  ;;  %11518 = vst [vmem:[#allocation53_spill] sm:$0xff] %v9739_v23  ;;  %v9747_v40 = vld [vmem:[%s11110_s5 + $0x40] sm:$0xff] }
 0xb7d   : > { %v2480_v59 = vpop.f32.mrf.mxu1  ;;  %6758 = vmatprep.subr.mxu0 %v9731_v34  ;;  %6788 = vmatprep.subr.mxu1 %v9042_v20  ;;  %11519 = vst [vmem:[#allocation54_spill] sm:$0xff] %v9747_v40 }
 0xb7e   : > { %6745 = vmatprep.mubr.f32.mxu1 %v2480_v59  ;;  %6759 = vmatpush3.msra.mxu0 %v9731_v34  ;;  %v9756_v59 = vld [vmem:[%s11110_s5 + $0x38] sm:$0xff] }
 0xb7f   : > { %6746 = vmatmul.mubr.f32.gmra.mxu1 %v6633_v27  ;;  %6760 = vmatprep.subr.mxu0 %v9739_v23  ;;  %11520 = vst [vmem:[#allocation55_spill] sm:$0xff] %v9756_v59 }
 0xb80   : > { %6761 = vmatpush3.msra.mxu0 %v9739_v23  ;;  %6789 = vmatpush3.msra.mxu1 %v9042_v20  ;;  %v9765_v20 = vld [vmem:[%s11110_s5 + $0x30] sm:$0xff] }
 0xb81   : > { %6762 = vmatprep.subr.mxu0 %v9747_v40  ;;  %6790 = vmatprep.subr.mxu1 %v9053_v41  ;;  %11521 = vst [vmem:[#allocation56_spill] sm:$0xff] %v9765_v20 }
 0xb82   : > { %6763 = vmatpush3.msra.mxu0 %v9747_v40  ;;  %6791 = vmatpush3.msra.mxu1 %v9053_v41  ;;  %v9774_v41 = vld [vmem:[%s11110_s5 + $0x28] sm:$0xff] }
 0xb83   : > { %6764 = vmatprep.subr.mxu0 %v9756_v59  ;;  %6792 = vmatprep.subr.mxu1 %v9062_v25  ;;  %11522 = vst [vmem:[#allocation57_spill] sm:$0xff] %v9774_v41 }
 0xb84   : > { %6765 = vmatpush3.msra.mxu0 %v9756_v59  ;;  %6793 = vmatpush3.msra.mxu1 %v9062_v25  ;;  %v9783_v25 = vld [vmem:[%s11110_s5 + $0x20] sm:$0xff] }
 0xb85   : > { %6766 = vmatprep.subr.mxu0 %v9765_v20  ;;  %6794 = vmatprep.subr.mxu1 %v9071_v51  ;;  %11523 = vst [vmem:[#allocation58_spill] sm:$0xff] %v9783_v25 }
 0xb86   : > { %6767 = vmatpush3.msra.mxu0 %v9765_v20  ;;  %6795 = vmatpush3.msra.mxu1 %v9071_v51  ;;  %v9792_v51 = vld [vmem:[%s11110_s5 + $0x18] sm:$0xff] }
 0xb87   : > { %6768 = vmatprep.subr.mxu0 %v9774_v41  ;;  %6796 = vmatprep.subr.mxu1 %v9080_v58  ;;  %11524 = vst [vmem:[#allocation59_spill] sm:$0xff] %v9792_v51 }
 0xb88   : > { %6769 = vmatpush3.msra.mxu0 %v9774_v41  ;;  %6797 = vmatpush3.msra.mxu1 %v9080_v58  ;;  %v9801_v58 = vld [vmem:[%s11110_s5 + $0x10] sm:$0xff] }
 0xb89   : > { %6770 = vmatprep.subr.mxu0 %v9783_v25  ;;  %6798 = vmatprep.subr.mxu1 %v9089_v62  ;;  %11525 = vst [vmem:[#allocation60_spill] sm:$0xff] %v9801_v58 }
 0xb8a   : > { %6771 = vmatpush3.msra.mxu0 %v9783_v25  ;;  %6799 = vmatpush3.msra.mxu1 %v9089_v62  ;;  %v9810_v62 = vld [vmem:[%s11110_s5 + $0x8] sm:$0xff] }
 0xb8b   : > { %6772 = vmatprep.subr.mxu0 %v9792_v51  ;;  %6800 = vmatprep.subr.mxu1 %v9098_v0  ;;  %11526 = vst [vmem:[#allocation61_spill] sm:$0xff] %v9810_v62 }
 0xb8c   : > { %6773 = vmatpush3.msra.mxu0 %v9792_v51  ;;  %6801 = vmatpush3.msra.mxu1 %v9098_v0  ;;  %v9819_v0 = vld [vmem:[%s11110_s5] sm:$0xff] }
 0xb8d   : > { %6774 = vmatprep.subr.mxu0 %v9801_v58  ;;  %6802 = vmatprep.subr.mxu1 %v9107_v2  ;;  %11527 = vst [vmem:[#allocation62_spill] sm:$0xff] %v9819_v0 }
 0xb8e   : > { %6775 = vmatpush3.msra.mxu0 %v9801_v58  ;;  %6803 = vmatpush3.msra.mxu1 %v9107_v2 }
 0xb8f   : > { %6776 = vmatprep.subr.mxu0 %v9810_v62  ;;  %6804 = vmatprep.subr.mxu1 %v9116_v4 }
 0xb90   : > { %6777 = vmatpush3.msra.mxu0 %v9810_v62  ;;  %6805 = vmatpush3.msra.mxu1 %v9116_v4 }
 0xb91   : > { %6778 = vmatprep.subr.mxu0 %v9819_v0  ;;  %6806 = vmatprep.subr.mxu1 %v9125_v6 }
 0xb92   : > { %6779 = vmatpush3.msra.mxu0 %v9819_v0  ;;  %6807 = vmatpush3.msra.mxu1 %v9125_v6 }
 0xb93   : > { %6808 = vmatprep.subr.mxu1 %v9133_v7 }
 0xb94   : > { %6809 = vmatpush3.msra.mxu1 %v9133_v7 }
 0xb95   : > { %6810 = vmatprep.subr.mxu1 %v9140_v8 }
 0xb96   : > { %6811 = vmatpush3.msra.mxu1 %v9140_v8 }
 0xb97   : > { %6812 = vmatprep.subr.mxu1 %v9147_v9  ;;  %v6668_v2 = vpop.f32.mrf.mxu1 }
 0xb98   : > { %6813 = vmatpush3.msra.mxu1 %v9147_v9 }
 0xb99   : > { %6814 = vmatprep.subr.mxu1 %v9154_v10  ;;  %v2555_v4 = vpop.f32.mrf.mxu1 }
 0xb9a   : > { %6815 = vmatpush3.msra.mxu1 %v9154_v10 }
 0xb9b   : > { %6816 = vmatprep.subr.mxu1 %v9161_v13  ;;  %v6671_v7 = vpop.f32.mrf.mxu1 }
 0xb9c   : > { %6817 = vmatpush3.msra.mxu1 %v9161_v13  ;;  %v9839_v13 = vld [vmem:[%s11109_s4] ss:$0 sm:$0xff] }
 0xb9d   : > { %6890 = vmatprep.subr.mxu1 %v9168_v33  ;;  %v2565_v8 = vpop.f32.mrf.mxu1  ;;  %11528 = vst [vmem:[#allocation63_spill] sm:$0xff] %v9839_v13 }
 0xc33   : > { %v6706_v6 = vpop.f32.mrf.mxu0 }
 0xc34   : > { %v2646_v62 = vadd.f32 %v6706_v6, %v6668_v2 }
 0xc35   : > { %v2640_v27 = vpop.f32.mrf.mxu0 }
 0xc36   : > { %v2641_v9 = vadd.f32 %v2640_v27, %v2555_v4  ;;  %v4802_v27 = vmul.f32 -0.0042527704, %v9219_v14 }
 0xc37   : > { %v6709_v0 = vpop.f32.mrf.mxu0 }
 0xc38   : > { %v2656_v10 = vadd.f32 %v6709_v0, %v6671_v7 }
 0xc39   : > { %v2650_v25 = vpop.f32.mrf.mxu0 }
 0xc3a   : > { %v2651_v23 = vadd.f32 %v2650_v25, %v2565_v8  ;;  %v4146_v25 = vmul.f32 0.091145836, %v9191_v61  ;;  %v4801_v8 = vmul.f32 0.0012326388, %v9191_v61 }
 0xc3b   : > { %v6744_v58 = vpop.f32.mrf.mxu1 }
 0xc3c   : > { %v2745_v51 = vadd.f32 %v6744_v58, %v2646_v62 }
 0xc3d   : > { %v2725_v41 = vpop.f32.mrf.mxu1 }
 0xc3e   : > { %v2744_v20 = vadd.f32 %v2725_v41, %v2641_v9  ;;  %v2749_v59 = vadd.f32 %v9839_v13, %v2745_v51  ;;  %v4147_v51 = vmul.f32 0.4492363, %v9219_v14  ;;  %v4800_v9 = vmul.f32 0.0012326388, %v9204_v56 }
 0xc3f   : > { %v6747_v40 = vpop.f32.mrf.mxu1 }
 0xc40   : > { %v2748_v34 = vadd.f32 %v9839_v13, %v2744_v20  ;;  %v2747_v16 = vadd.f32 %v6747_v40, %v2656_v10  ;;  %v2753_v58 = vmax.f32 %v2749_v59, 0.0  ;;  %v4144_v20 = vmul.f32 0.091145836, %v9182_v44 }
 0xc41   : > { %v2735_v2 = vpop.f32.mrf.mxu1  ;;  %v4799_v40 = vmul.f32 0.0012326388, %v9182_v44  ;;  %v4803_v59 = vmul.f32 -0.0042527704, %v9213_v36  ;;  %v4145_v44 = vmul.f32 0.091145836, %v9204_v56 }
 0xc42   : > { %v2752_v6 = vmax.f32 %v2748_v34, 0.0  ;;  %v2746_v4 = vadd.f32 %v2735_v2, %v2651_v23  ;;  %v2751_v62 = vadd.f32 %v9839_v13, %v2747_v16  ;;  %v4143_v34 = vmul.f32 0.091145836, %v9187_v46 }
 0xc43   : > { %v4798_v23 = vmul.f32 0.0012326388, %v9187_v46  ;;  %v4148_v16 = vmul.f32 0.4492363, %v9213_v36  ;;  %v4805_v46 = vmul.f32 -0.0042527704, %v9224_v50 }
 0xc44   : > { %v2750_v41 = vadd.f32 %v9839_v13, %v2746_v4  ;;  %6780 = vmatprep.mubr.f32.mxu0 %v2752_v6  ;;  %v2755_v7 = vmax.f32 %v2751_v62, 0.0  ;;  %v4149_v2 = vmul.f32 0.4492363, %v9234_v54  ;;  %v4804_v36 = vmul.f32 -0.0042527704, %v9234_v54 }
 0xc45   : > { %6781 = vmatmul.mubr.f32.vlgmr.msra.gmra.mxu0 %v2753_v58  ;;  %v9866_v6 = vld [vmem:[%s11111_s6] ss:$0 sm:$0xff]  ;;  %v4152_v4 = vadd.f32 %v4148_v16, %v4144_v20  ;;  %v4807_v58 = vadd.f32 %v4803_v59, %v4799_v40  ;;  %v4151_v62 = vadd.f32 %v4147_v51, %v4143_v34  ;;  %v4809_v18 = vadd.f32 %v4805_v46, %v4801_v8 }
 0xc46   : > { %v2754_v0 = vmax.f32 %v2750_v41, 0.0  ;;  %v4806_v41 = vadd.f32 %v4802_v27, %v4798_v23  ;;  %v4153_v38 = vadd.f32 %v4149_v2, %v4145_v44  ;;  %v4808_v32 = vadd.f32 %v4804_v36, %v4800_v9 }
 0xc48   : > { %6783 = vmatprep.mubr.f32.mxu0 %v2754_v0 }
 0xc49   : > { %6784 = vmatmul.mubr.f32.gmra.mxu0 %v2755_v7 }
 0xc4a   : > { %6832 = vmatprep.mubr.msk.f32.mxu0 %vm159_vm0, %v9178_v29  ;;  %v4150_v29 = vmul.f32 0.4492363, %v9224_v50 }
 0xc4c   : > { %v4154_v56 = vadd.f32 %v4150_v29, %v4146_v25 }
 0xd05   : > { %v6782_v10 = vpop.f32.mrf.mxu0 }
 0xd06   : > { %v2828_v14 = vadd.f32 %v9866_v6, %v6782_v10 }
 0xd07   : > { %v2822_v61 = vpop.f32.mrf.mxu0 }
 0xd08   : > { %v2862_v0 = vmul.f32 -0.29080933, %v2828_v14  ;;  %v3509_v7 = vmul.f32 0.2784091, %v2828_v14  ;;  %v4156_v50 = vmul.f32 0.6510417, %v2828_v14  ;;  %v2823_v13 = vadd.f32 %v9866_v6, %v2822_v61 }
 0xd09   : > { %v4811_v15 = vmul.f32 0.036979165, %v2828_v14  ;;  %v6785_v54 = vpop.f32.mrf.mxu0 }
 0xd0a   : > { %v2866_v26 = vadd.f32 %v2862_v0, %v9227_v1  ;;  %v2861_v28 = vmul.f32 -0.29080933, %v2823_v13  ;;  %v3508_v10 = vmul.f32 0.2784091, %v2823_v13  ;;  %v4155_v20 = vmul.f32 0.6510417, %v2823_v13 }
 0xd0b   : > { %v4810_v16 = vmul.f32 0.036979165, %v2823_v13  ;;  %v2838_v40 = vadd.f32 %v9866_v6, %v6785_v54  ;;  %v2832_v34 = vpop.f32.mrf.mxu0  ;;  %v9873_v23 = vadd.f32 %v3509_v7, %v9230_v48  ;;  %v9875_v59 = vadd.f32 %v4156_v50, %v4152_v4  ;;  %v11539_v50 = vld [vmem:[#allocation16_spill] sm:$0xff]  ;;  %v11540_v54 = vld [vmem:[#allocation17_spill] sm:$0xff] }
 0xd0c   : > { %v2870_v25 = vmul.f32 %v2866_v26, %v8170_v30  ;;  %v2833_v51 = vadd.f32 %v9866_v6, %v2832_v34  ;;  %v2865_v27 = vadd.f32 %v2861_v28, %v9238_v57  ;;  %v9881_v1 = vadd.f32 %v3508_v10, %v9241_v22  ;;  %v11541_v10 = vld [vmem:[#allocation18_spill] sm:$0xff] }
 0xd0d   : > { %v2864_v29 = vmul.f32 -0.29080933, %v2838_v40  ;;  %v3511_v8 = vmul.f32 0.2784091, %v2838_v40  ;;  %v4158_v13 = vmul.f32 0.6510417, %v2838_v40  ;;  %v9883_v44 = vadd.f32 %v4811_v15, %v4807_v58 }
 0xd0e   : > { %v4813_v9 = vmul.f32 0.036979165, %v2838_v40  ;;  %v2863_v46 = vmul.f32 -0.29080933, %v2833_v51  ;;  %v3510_v48 = vmul.f32 0.2784091, %v2833_v51  ;;  %v2869_v2 = vmul.f32 %v2865_v27, %v8170_v30 }
 0xd0f   : > { %v4157_v36 = vmul.f32 0.6510417, %v2833_v51  ;;  %v4812_v14 = vmul.f32 0.036979165, %v2833_v51  ;;  %v2874_v26 = vadd.f32 %v9261_v42, %v2870_v25  ;;  %v2868_v4 = vadd.f32 %v2864_v29, %v9247_v60  ;;  %v11544_v40 = vld [vmem:[#allocation21_spill] sm:$0xff]  ;;  %v11545_v34 = vld [vmem:[#allocation22_spill] sm:$0xff] }
 0xd10   : > { %v2873_v57 = vadd.f32 %v9255_v37, %v2869_v2  ;;  %v2867_v22 = vadd.f32 %v2863_v46, %v9265_v39  ;;  %v9891_v28 = vadd.f32 %v3511_v8, %v9249_v17  ;;  %v9894_v15 = vadd.f32 %v3510_v48, %v9267_v47  ;;  %v11546_v25 = vld [vmem:[#allocation23_spill] sm:$0xff]  ;;  %v11547_v51 = vld [vmem:[#allocation24_spill] sm:$0xff]  ;;  %v11548_v27 = vld [vmem:[#allocation25_spill] sm:$0xff] }
 0xd11   : > { %v2872_v61 = vmul.f32 %v2868_v4, %v8170_v30  ;;  %v9897_v58 = vadd.f32 %v4155_v20, %v4151_v62  ;;  %v9899_v0 = vadd.f32 %v4810_v16, %v4806_v41  ;;  %v9901_v7 = vadd.f32 %v4158_v13, %v4154_v56  ;;  %v11536_v62 = vld [vmem:[#allocation13_spill] sm:$0xff]  ;;  %v11537_v41 = vld [vmem:[#allocation14_spill] sm:$0xff]  ;;  %v11538_v56 = vld [vmem:[#allocation15_spill] sm:$0xff] }
 0xd12   : > { %6818 = vmatprep.mubr.f32.mxu1 %v2873_v57  ;;  %v2871_v60 = vmul.f32 %v2867_v22, %v8170_v30  ;;  %v9904_v37 = vadd.f32 %v4813_v9, %v4809_v18  ;;  %v9906_v42 = vadd.f32 %v4157_v36, %v4153_v38  ;;  %v9908_v17 = vadd.f32 %v4812_v14, %v4808_v32  ;;  %v11532_v32 = vld [vmem:[#allocation9_spill] sm:$0xff]  ;;  %v11534_v38 = vld [vmem:[#allocation11_spill] sm:$0xff]  ;;  %v11535_v18 = vld [vmem:[#allocation12_spill] sm:$0xff] }
 0xd13   : > { %6819 = vmatmul.mubr.f32.vlgmr.msra.gmra.mxu1 %v2874_v26  ;;  %v2876_v47 = vadd.f32 %v9280_v21, %v2872_v61  ;;  %v11531_v21 = vld [vmem:[#allocation8_spill] sm:$0xff]  ;;  %v11542_v20 = vld [vmem:[#allocation19_spill] sm:$0xff]  ;;  %v11549_v29 = vld [vmem:[#allocation26_spill] sm:$0xff] }
 0xd14   : > { %v2875_v39 = vadd.f32 %v9273_v19, %v2871_v60  ;;  %6891 = vmatpush3.msra.mxu1 %v9168_v33  ;;  %v11529_v33 = vld [vmem:[#allocation6_spill] sm:$0xff]  ;;  %v11530_v19 = vld [vmem:[#allocation7_spill] sm:$0xff]  ;;  %v11543_v16 = vld [vmem:[#allocation20_spill] sm:$0xff] }
 0xd15   : > { %6892 = vmatprep.subr.mxu1 %v9286_v31  ;;  %v11550_v8 = vld [vmem:[#allocation27_spill] sm:$0xff]  ;;  %v11551_v13 = vld [vmem:[#allocation28_spill] sm:$0xff]  ;;  %v11552_v9 = vld [vmem:[#allocation29_spill] sm:$0xff] }
 0xd16   : > { %6821 = vmatprep.mubr.f32.mxu1 %v2875_v39  ;;  %6893 = vmatpush3.msra.mxu1 %v9286_v31  ;;  %v11553_v46 = vld [vmem:[#allocation30_spill] sm:$0xff]  ;;  %v11554_v48 = vld [vmem:[#allocation31_spill] sm:$0xff]  ;;  %v11555_v2 = vld [vmem:[#allocation32_spill] sm:$0xff] }
 0xd17   : > { %6822 = vmatmul.mubr.f32.gmra.mxu1 %v2876_v47  ;;  %6894 = vmatprep.subr.mxu1 %v9293_v53  ;;  %v11556_v36 = vld [vmem:[#allocation33_spill] sm:$0xff]  ;;  %v11557_v14 = vld [vmem:[#allocation34_spill] sm:$0xff]  ;;  %v11558_v26 = vld [vmem:[#allocation35_spill] sm:$0xff] }
 0xd18   : > { %6895 = vmatpush3.msra.mxu1 %v9293_v53  ;;  %v11559_v4 = vld [vmem:[#allocation36_spill] sm:$0xff]  ;;  %v11560_v57 = vld [vmem:[#allocation37_spill] sm:$0xff]  ;;  %v11561_v22 = vld [vmem:[#allocation38_spill] sm:$0xff] }
 0xd19   : > { %6896 = vmatprep.subr.mxu1 %v9300_v63  ;;  %v11562_v61 = vld [vmem:[#allocation39_spill] sm:$0xff]  ;;  %v11563_v60 = vld [vmem:[#allocation40_spill] sm:$0xff]  ;;  %v11564_v39 = vld [vmem:[#allocation41_spill] sm:$0xff] }
 0xd1a   : > { %6897 = vmatpush3.msra.mxu1 %v9300_v63  ;;  %v11565_v47 = vld [vmem:[#allocation42_spill] sm:$0xff] }
 0xd1b   : > { %6898 = vmatprep.subr.mxu1 %v9307_v3 }
 0xd1c   : > { %6899 = vmatpush3.msra.mxu1 %v9307_v3 }
 0xd1d   : > { %6900 = vmatprep.subr.mxu1 %v9314_v43 }
 0xd1e   : > { %6901 = vmatpush3.msra.mxu1 %v9314_v43 }
 0xd1f   : > { %6902 = vmatprep.subr.mxu1 %v9321_v45 }
 0xd20   : > { %6903 = vmatpush3.msra.mxu1 %v9321_v45 }
 0xd21   : > { %6904 = vmatprep.subr.mxu1 %v9328_v5 }
 0xd22   : > { %6905 = vmatpush3.msra.mxu1 %v9328_v5 }
 0xd23   : > { %6906 = vmatprep.subr.mxu1 %v9335_v49 }
 0xd24   : > { %6907 = vmatpush3.msra.mxu1 %v9335_v49 }
 0xd25   : > { %6908 = vmatprep.subr.mxu1 %v9342_v52 }
 0xd26   : > { %6909 = vmatpush3.msra.mxu1 %v9342_v52 }
 0xd27   : > { %6910 = vmatprep.subr.mxu1 %v9349_v55 }
 0xd28   : > { %6911 = vmatpush3.msra.mxu1 %v9349_v55 }
 0xd29   : > { %6912 = vmatprep.subr.mxu1 %v9356_v11 }
 0xd2a   : > { %6913 = vmatpush3.msra.mxu1 %v9356_v11 }
 0xd2b   : > { %6914 = vmatprep.subr.mxu1 %v9363_v35 }
 0xd2c   : > { %6915 = vmatpush3.msra.mxu1 %v9363_v35 }
 0xd2d   : > { %6916 = vmatprep.subr.mxu1 %v11529_v33 }
 0xd2e   : > { %6917 = vmatpush3.msra.mxu1 %v11529_v33  ;;  %v11566_v33 = vld [vmem:[#allocation43_spill] sm:$0xff] }
 0xd2f   : > { %6918 = vmatprep.subr.mxu1 %v11530_v19 }
 0xd30   : > { %6919 = vmatpush3.msra.mxu1 %v11530_v19  ;;  %v11567_v19 = vld [vmem:[#allocation44_spill] sm:$0xff] }
 0xd31   : > { %6920 = vmatprep.subr.mxu1 %v11531_v21 }
 0xd32   : > { %6921 = vmatpush3.msra.mxu1 %v11531_v21  ;;  %v11568_v21 = vld [vmem:[#allocation45_spill] sm:$0xff] }
 0xd33   : > { %6966 = vmatprep.subr.mxu1 %v9391_v24 }
 0xdd3   : > { %v6820_v31 = vpop.f32.mrf.mxu1 }
 0xdd4   : > { %v2949_v45 = vadd.f32 %v9397_v12, %v6820_v31  ;;  %v11569_v31 = vld [vmem:[#allocation46_spill] sm:$0xff] }
 0xdd5   : > { %v2943_v53 = vpop.f32.mrf.mxu1 }
 0xdd6   : > { %v2944_v52 = vadd.f32 %v9397_v12, %v2943_v53  ;;  %v2963_v11 = vmax.f32 %v2949_v45, 0.0  ;;  %v11570_v53 = vld [vmem:[#allocation47_spill] sm:$0xff] }
 0xdd7   : > { %v6823_v63 = vpop.f32.mrf.mxu1 }
 0xdd8   : > { %v2959_v3 = vadd.f32 %v9397_v12, %v6823_v63  ;;  %v2962_v35 = vmax.f32 %v2944_v52, 0.0  ;;  %v10036_v63 = vld [vmem:[%s11106_s1 + $0x78] sm:$0xff] }
 0xdd9   : > { %v2953_v43 = vpop.f32.mrf.mxu1 }
 0xdda   : > { %v9946_v5 = vmax.f32 %v2959_v3, 0.0  ;;  %v2954_v49 = vadd.f32 %v9397_v12, %v2953_v43  ;;  %v11533_v12 = vld [vmem:[#allocation10_spill] sm:$0xff] }
 0xddc   : > { %v2964_v55 = vmax.f32 %v2954_v49, 0.0  ;;  %6824 = vmatprep.subr.mxu0 %v9946_v5  ;;  %v11571_v49 = vld [vmem:[#allocation48_spill] sm:$0xff] }
 0xddd   : > { %6825 = vmatpush3.msra.mxu0 %v9946_v5 }
 0xdde   : > { %6826 = vmatprep.subr.mxu0 %v2964_v55 }
 0xddf   : > { %6827 = vmatpush3.msra.mxu0 %v2964_v55 }
 0xde0   : > { %6828 = vmatprep.subr.mxu0 %v2963_v11 }
 0xde1   : > { %6829 = vmatpush3.msra.mxu0 %v2963_v11 }
 0xde2   : > { %6830 = vmatprep.subr.mxu0 %v2962_v35 }
 0xde3   : > { %6831 = vmatpush3.msra.mxu0 %v2962_v35 }
 0xde4   : > { %6833 = vmatmul.mubr.msk.f32.vlgmr.msra.gmra.mxu0 %vm159_vm0, %v11532_v32  ;;  %6838 = vmatprep.subr.mxu0 %v9946_v5 }
 0xde5   : > { %6839 = vmatpush3.msra.mxu0 %v9946_v5  ;;  %6835 = vmatprep.mubr.msk.f32.mxu0 %vm159_vm0, %v11533_v12 }
 0xde6   : > { %6840 = vmatprep.subr.mxu0 %v2964_v55 }
 0xde7   : > { %6841 = vmatpush3.msra.mxu0 %v2964_v55 }
 0xde8   : > { %6836 = vmatmul.mubr.msk.f32.gmra.mxu0 %vm159_vm0, %v11534_v38  ;;  %6842 = vmatprep.subr.mxu0 %v2963_v11  ;;  %v11575_v38 = vld [vmem:[#allocation52_spill] sm:$0xff] }
 0xde9   : > { %6843 = vmatpush3.msra.mxu0 %v2963_v11  ;;  %6846 = vmatprep.mubr.msk.f32.mxu0 %vm159_vm0, %v11535_v18  ;;  %v10053_v18 = vld [vmem:[%s11106_s1 + $0x70] sm:$0xff] }
 0xdea   : > { %6844 = vmatprep.subr.mxu0 %v2962_v35 }
 0xdeb   : > { %6845 = vmatpush3.msra.mxu0 %v2962_v35 }
 0xdec   : > { %6847 = vmatmul.mubr.msk.f32.vlgmr.msra.gmra.mxu0 %vm159_vm0, %v11536_v62  ;;  %6852 = vmatprep.subr.mxu0 %v11537_v41  ;;  %v11576_v62 = vld [vmem:[#allocation53_spill] sm:$0xff] }
 0xded   : > { %6853 = vmatpush3.msra.mxu0 %v11537_v41  ;;  %6849 = vmatprep.mubr.msk.f32.mxu0 %vm159_vm0, %v11538_v56  ;;  %v11577_v41 = vld [vmem:[#allocation54_spill] sm:$0xff] }
 0xdee   : > { %6854 = vmatprep.subr.mxu0 %v11539_v50  ;;  %v10064_v56 = vld [vmem:[%s11106_s1 + $0x68] sm:$0xff] }
 0xdef   : > { %6855 = vmatpush3.msra.mxu0 %v11539_v50  ;;  %v11578_v50 = vld [vmem:[#allocation55_spill] sm:$0xff] }
 0xdf0   : > { %6850 = vmatmul.mubr.msk.f32.gmra.mxu0 %vm159_vm0, %v11540_v54  ;;  %6856 = vmatprep.subr.mxu0 %v11541_v10  ;;  %v10073_v54 = vld [vmem:[%s11106_s1 + $0x60] sm:$0xff] }
 0xdf1   : > { %6857 = vmatpush3.msra.mxu0 %v11541_v10  ;;  %6884 = vmatprep.mubr.f32.mxu0 %v2962_v35  ;;  %v11573_v35 = vld [vmem:[#allocation50_spill] sm:$0xff]  ;;  %v11579_v10 = vld [vmem:[#allocation56_spill] sm:$0xff] }
 0xdf2   : > { %6858 = vmatprep.subr.mxu0 %v11542_v20 }
 0xdf3   : > { %6859 = vmatpush3.msra.mxu0 %v11542_v20  ;;  %v10082_v20 = vld [vmem:[%s11106_s1 + $0x58] sm:$0xff] }
 0xdf4   : > { %6860 = vmatprep.subr.mxu0 %v11543_v16 }
 0xdf5   : > { %6861 = vmatpush3.msra.mxu0 %v11543_v16  ;;  %v11580_v16 = vld [vmem:[#allocation57_spill] sm:$0xff] }
 0xdf6   : > { %6862 = vmatprep.subr.mxu0 %v11544_v40 }
 0xdf7   : > { %6863 = vmatpush3.msra.mxu0 %v11544_v40  ;;  %v10091_v40 = vld [vmem:[%s11106_s1 + $0x50] sm:$0xff] }
 0xdf8   : > { %6864 = vmatprep.subr.mxu0 %v11545_v34 }
 0xdf9   : > { %6865 = vmatpush3.msra.mxu0 %v11545_v34  ;;  %v11581_v34 = vld [vmem:[#allocation58_spill] sm:$0xff] }
 0xdfa   : > { %6866 = vmatprep.subr.mxu0 %v11546_v25 }
 0xdfb   : > { %6867 = vmatpush3.msra.mxu0 %v11546_v25  ;;  %v10100_v25 = vld [vmem:[%s11106_s1 + $0x48] sm:$0xff] }
 0xdfc   : > { %6868 = vmatprep.subr.mxu0 %v11547_v51 }
 0xdfd   : > { %6869 = vmatpush3.msra.mxu0 %v11547_v51  ;;  %v11582_v51 = vld [vmem:[#allocation59_spill] sm:$0xff] }
 0xdfe   : > { %6870 = vmatprep.subr.mxu0 %v11548_v27 }
 0xdff   : > { %6871 = vmatpush3.msra.mxu0 %v11548_v27  ;;  %v10109_v27 = vld [vmem:[%s11106_s1 + $0x40] sm:$0xff] }
 0xe00   : > { %6872 = vmatprep.subr.mxu0 %v11549_v29 }
 0xe01   : > { %6873 = vmatpush3.msra.mxu0 %v11549_v29  ;;  %v11583_v29 = vld [vmem:[#allocation60_spill] sm:$0xff] }
 0xe02   : > { %6874 = vmatprep.subr.mxu0 %v11550_v8 }
 0xe03   : > { %6875 = vmatpush3.msra.mxu0 %v11550_v8  ;;  %v10118_v8 = vld [vmem:[%s11106_s1 + $0x38] sm:$0xff] }
 0xe04   : > { %6876 = vmatprep.subr.mxu0 %v11551_v13 }
 0xe05   : > { %6877 = vmatpush3.msra.mxu0 %v11551_v13  ;;  %v11584_v13 = vld [vmem:[#allocation61_spill] sm:$0xff] }
 0xe06   : > { %6878 = vmatprep.subr.mxu0 %v11552_v9 }
 0xe07   : > { %6879 = vmatpush3.msra.mxu0 %v11552_v9  ;;  %v10127_v9 = vld [vmem:[%s11106_s1 + $0x30] sm:$0xff] }
 0xe08   : > { %6880 = vmatprep.subr.mxu0 %v11553_v46 }
 0xe09   : > { %6881 = vmatpush3.msra.mxu0 %v11553_v46  ;;  %v11585_v46 = vld [vmem:[#allocation62_spill] sm:$0xff] }
 0xe0a   : > { %6882 = vmatprep.subr.mxu0 %v11554_v48 }
 0xe0b   : > { %6883 = vmatpush3.msra.mxu0 %v11554_v48  ;;  %v10136_v48 = vld [vmem:[%s11106_s1 + $0x28] sm:$0xff] }
 0xe0c   : > { %6885 = vmatmul.mubr.f32.vlgmr.msra.gmra.mxu0 %v2963_v11  ;;  %6928 = vmatprep.subr.mxu0 %v11555_v2 }
 0xe0d   : > { %6887 = vmatprep.mubr.f32.mxu0 %v2964_v55  ;;  %6929 = vmatpush3.msra.mxu0 %v11555_v2  ;;  %v11572_v55 = vld [vmem:[#allocation49_spill] sm:$0xff] }
 0xe0e   : > { %6930 = vmatprep.subr.mxu0 %v11556_v36  ;;  %v10144_v2 = vld [vmem:[%s11106_s1 + $0x20] sm:$0xff] }
 0xe0f   : > { %6931 = vmatpush3.msra.mxu0 %v11556_v36  ;;  %v10151_v36 = vld [vmem:[%s11106_s1 + $0x18] sm:$0xff] }
 0xe10   : > { %6888 = vmatmul.mubr.f32.gmra.mxu0 %v9946_v5  ;;  %6932 = vmatprep.subr.mxu0 %v11557_v14 }
 0xe11   : > { %6933 = vmatpush3.msra.mxu0 %v11557_v14  ;;  %v10158_v14 = vld [vmem:[%s11106_s1 + $0x10] sm:$0xff] }
 0xe12   : > { %6934 = vmatprep.subr.mxu0 %v11558_v26 }
 0xe13   : > { %6935 = vmatpush3.msra.mxu0 %v11558_v26  ;;  %v10165_v26 = vld [vmem:[%s11106_s1 + $0x8] sm:$0xff] }
 0xe14   : > { %6936 = vmatprep.subr.mxu0 %v11559_v4 }
 0xe15   : > { %6937 = vmatpush3.msra.mxu0 %v11559_v4  ;;  %v10172_v4 = vld [vmem:[%s11106_s1] sm:$0xff] }
 0xe16   : > { %6938 = vmatprep.subr.mxu0 %v11560_v57 }
 0xe17   : > { %6939 = vmatpush3.msra.mxu0 %v11560_v57  ;;  %v10179_v57 = vld [vmem:[%s11108_s3 + $0x78] sm:$0xff] }
 0xe18   : > { %6940 = vmatprep.subr.mxu0 %v11561_v22 }
 0xe19   : > { %6941 = vmatpush3.msra.mxu0 %v11561_v22 }
 0xe1a   : > { %6942 = vmatprep.subr.mxu0 %v11562_v61 }
 0xe1b   : > { %6943 = vmatpush3.msra.mxu0 %v11562_v61 }
 0xe1c   : > { %6944 = vmatprep.subr.mxu0 %v11563_v60 }
 0xe1d   : > { %6945 = vmatpush3.msra.mxu0 %v11563_v60 }
 0xe1e   : > { %6946 = vmatprep.subr.mxu0 %v11564_v39 }
 0xe1f   : > { %6947 = vmatpush3.msra.mxu0 %v11564_v39 }
 0xe20   : > { %6948 = vmatprep.subr.mxu0 %v11565_v47 }
 0xe21   : > { %6949 = vmatpush3.msra.mxu0 %v11565_v47 }
 0xe22   : > { %6950 = vmatprep.subr.mxu0 %v11566_v33 }
 0xe23   : > { %6951 = vmatpush3.msra.mxu0 %v11566_v33 }
 0xe24   : > { %6952 = vmatprep.subr.mxu0 %v11567_v19 }
 0xe25   : > { %6953 = vmatpush3.msra.mxu0 %v11567_v19 }
 0xe26   : > { %6954 = vmatprep.subr.mxu0 %v11568_v21 }
 0xe27   : > { %6955 = vmatpush3.msra.mxu0 %v11568_v21 }
 0xe28   : > { %6956 = vmatprep.subr.mxu0 %v11569_v31 }
 0xe29   : > { %6957 = vmatpush3.msra.mxu0 %v11569_v31 }
 0xe2a   : > { %6958 = vmatprep.subr.mxu0 %v11570_v53 }
 0xe2b   : > { %6959 = vmatpush3.msra.mxu0 %v11570_v53 }
 0xe2c   : > { %7004 = vmatprep.subr.mxu0 %v10036_v63 }
 0xea4   : > { %v6834_v3 = vpop.f32.mrf.mxu0 }
 0xea6   : > { %v3032_v43 = vpop.f32.mrf.mxu0 }
 0xea7   : > { %6922 = vmatprep.mubr.f32.mxu1 %v3032_v43 }
 0xea8   : > { %v6837_v45 = vpop.f32.mrf.mxu0  ;;  %6923 = vmatmul.mubr.f32.vlgmr.msra.gmra.mxu1 %v6834_v3 }
 0xea9   : > { %6967 = vmatpush3.msra.mxu1 %v9391_v24  ;;  %v11574_v24 = vld [vmem:[#allocation51_spill] sm:$0xff] }
 0xeaa   : > { %v3042_v5 = vpop.f32.mrf.mxu0  ;;  %6968 = vmatprep.subr.mxu1 %v11571_v49 }
 0xeab   : > { %6925 = vmatprep.mubr.f32.mxu1 %v3042_v5  ;;  %6969 = vmatpush3.msra.mxu1 %v11571_v49 }
 0xeac   : > { %v6848_v52 = vpop.f32.mrf.mxu0  ;;  %6926 = vmatmul.mubr.f32.gmra.mxu1 %v6837_v45  ;;  %6970 = vmatprep.subr.mxu1 %v11572_v55 }
 0xead   : > { %6971 = vmatpush3.msra.mxu1 %v11572_v55 }
 0xeae   : > { %v3117_v11 = vpop.f32.mrf.mxu0  ;;  %6972 = vmatprep.subr.mxu1 %v11573_v35 }
 0xeaf   : > { %6960 = vmatprep.mubr.f32.mxu0 %v3117_v11  ;;  %6973 = vmatpush3.msra.mxu1 %v11573_v35 }
 0xeb0   : > { %v6851_v32 = vpop.f32.mrf.mxu0  ;;  %6961 = vmatmul.mubr.f32.vlgmr.msra.gmra.mxu0 %v6848_v52  ;;  %6974 = vmatprep.subr.mxu1 %v11574_v24  ;;  %v11586_v52 = vld [vmem:[#allocation63_spill] sm:$0xff] }
 0xeb1   : > { %6975 = vmatpush3.msra.mxu1 %v11574_v24  ;;  %7005 = vmatpush3.msra.mxu0 %v10036_v63 }
 0xeb2   : > { %v3127_v12 = vpop.f32.mrf.mxu0  ;;  %6976 = vmatprep.subr.mxu1 %v11575_v38  ;;  %7006 = vmatprep.subr.mxu0 %v10053_v18 }
 0xeb3   : > { %6963 = vmatprep.mubr.f32.mxu0 %v3127_v12  ;;  %6977 = vmatpush3.msra.mxu1 %v11575_v38 }
 0xeb4   : > { %6964 = vmatmul.mubr.f32.gmra.mxu0 %v6851_v32  ;;  %6978 = vmatprep.subr.mxu1 %v11576_v62 }
 0xeb5   : > { %6979 = vmatpush3.msra.mxu1 %v11576_v62  ;;  %7007 = vmatpush3.msra.mxu0 %v10053_v18 }
 0xeb6   : > { %6980 = vmatprep.subr.mxu1 %v11577_v41  ;;  %7008 = vmatprep.subr.mxu0 %v10064_v56 }
 0xeb7   : > { %6981 = vmatpush3.msra.mxu1 %v11577_v41  ;;  %7009 = vmatpush3.msra.mxu0 %v10064_v56 }
 0xeb8   : > { %6982 = vmatprep.subr.mxu1 %v11578_v50  ;;  %7010 = vmatprep.subr.mxu0 %v10073_v54 }
 0xeb9   : > { %6983 = vmatpush3.msra.mxu1 %v11578_v50  ;;  %7011 = vmatpush3.msra.mxu0 %v10073_v54 }
 0xeba   : > { %6984 = vmatprep.subr.mxu1 %v11579_v10  ;;  %7012 = vmatprep.subr.mxu0 %v10082_v20 }
 0xebb   : > { %6985 = vmatpush3.msra.mxu1 %v11579_v10  ;;  %7013 = vmatpush3.msra.mxu0 %v10082_v20 }
 0xebc   : > { %6986 = vmatprep.subr.mxu1 %v11580_v16  ;;  %7014 = vmatprep.subr.mxu0 %v10091_v40 }
 0xebd   : > { %6987 = vmatpush3.msra.mxu1 %v11580_v16  ;;  %7015 = vmatpush3.msra.mxu0 %v10091_v40 }
 0xebe   : > { %6988 = vmatprep.subr.mxu1 %v11581_v34  ;;  %7016 = vmatprep.subr.mxu0 %v10100_v25 }
 0xebf   : > { %6989 = vmatpush3.msra.mxu1 %v11581_v34  ;;  %7017 = vmatpush3.msra.mxu0 %v10100_v25 }
 0xec0   : > { %6990 = vmatprep.subr.mxu1 %v11582_v51  ;;  %7018 = vmatprep.subr.mxu0 %v10109_v27 }
 0xec1   : > { %6991 = vmatpush3.msra.mxu1 %v11582_v51  ;;  %7019 = vmatpush3.msra.mxu0 %v10109_v27  ;;  %v10189_v51 = vld [vmem:[%s11112_s7] sm:$0xff] }
 0xec2   : > { %6992 = vmatprep.subr.mxu1 %v11583_v29  ;;  %7020 = vmatprep.subr.mxu0 %v10118_v8 }
 0xec3   : > { %6993 = vmatpush3.msra.mxu1 %v11583_v29  ;;  %7021 = vmatpush3.msra.mxu0 %v10118_v8 }
 0xec4   : > { %6994 = vmatprep.subr.mxu1 %v11584_v13  ;;  %7022 = vmatprep.subr.mxu0 %v10127_v9 }
 0xec5   : > { %6995 = vmatpush3.msra.mxu1 %v11584_v13  ;;  %7023 = vmatpush3.msra.mxu0 %v10127_v9 }
 0xec6   : > { %6996 = vmatprep.subr.mxu1 %v11585_v46  ;;  %7024 = vmatprep.subr.mxu0 %v10136_v48 }
 0xec7   : > { %6997 = vmatpush3.msra.mxu1 %v11585_v46  ;;  %7025 = vmatpush3.msra.mxu0 %v10136_v48 }
 0xec8   : > { %7026 = vmatprep.subr.mxu0 %v10144_v2 }
 0xec9   : > { %7027 = vmatpush3.msra.mxu0 %v10144_v2 }
 0xeca   : > { %7028 = vmatprep.subr.mxu0 %v10151_v36 }
 0xecb   : > { %7029 = vmatpush3.msra.mxu0 %v10151_v36 }
 0xecc   : > { %7030 = vmatprep.subr.mxu0 %v10158_v14  ;;  %v6886_v22 = vpop.f32.mrf.mxu0 }
 0xecd   : > { %7031 = vmatpush3.msra.mxu0 %v10158_v14 }
 0xece   : > { %7032 = vmatprep.subr.mxu0 %v10165_v26  ;;  %v3202_v61 = vpop.f32.mrf.mxu0 }
 0xecf   : > { %7033 = vmatpush3.msra.mxu0 %v10165_v26 }
 0xed0   : > { %7034 = vmatprep.subr.mxu0 %v10172_v4  ;;  %v6889_v39 = vpop.f32.mrf.mxu0 }
 0xed1   : > { %7035 = vmatpush3.msra.mxu0 %v10172_v4 }
 0xed2   : > { %7108 = vmatprep.subr.mxu0 %v10179_v57  ;;  %v3212_v33 = vpop.f32.mrf.mxu0 }
 0xf68   : > { %v6924_v60 = vpop.f32.mrf.mxu1 }
 0xf69   : > { %v3293_v21 = vadd.f32 %v6924_v60, %v6886_v22 }
 0xf6a   : > { %v3287_v47 = vpop.f32.mrf.mxu1 }
 0xf6b   : > { %v3288_v53 = vadd.f32 %v3287_v47, %v3202_v61 }
 0xf6c   : > { %v6927_v19 = vpop.f32.mrf.mxu1 }
 0xf6d   : > { %v3303_v5 = vadd.f32 %v6927_v19, %v6889_v39 }
 0xf6e   : > { %v3297_v43 = vpop.f32.mrf.mxu1 }
 0xf6f   : > { %v3298_v35 = vadd.f32 %v3297_v43, %v3212_v33 }
 0xf70   : > { %v6962_v31 = vpop.f32.mrf.mxu0 }
 0xf71   : > { %v3392_v3 = vadd.f32 %v6962_v31, %v3293_v21 }
 0xf72   : > { %v3372_v45 = vpop.f32.mrf.mxu0 }
 0xf73   : > { %v3391_v49 = vadd.f32 %v3372_v45, %v3288_v53  ;;  %v3396_v55 = vadd.f32 %v11586_v52, %v3392_v3 }
 0xf74   : > { %v6965_v11 = vpop.f32.mrf.mxu0 }
 0xf75   : > { %v3395_v32 = vadd.f32 %v11586_v52, %v3391_v49  ;;  %v3394_v24 = vadd.f32 %v6965_v11, %v3303_v5  ;;  %v3400_v41 = vmax.f32 %v3396_v55, 0.0 }
 0xf76   : > { %v3382_v12 = vpop.f32.mrf.mxu0 }
 0xf77   : > { %v3399_v38 = vmax.f32 %v3395_v32, 0.0  ;;  %v3393_v62 = vadd.f32 %v3382_v12, %v3298_v35  ;;  %v3398_v50 = vadd.f32 %v11586_v52, %v3394_v24 }
 0xf79   : > { %v3397_v10 = vadd.f32 %v11586_v52, %v3393_v62  ;;  %6998 = vmatprep.mubr.f32.mxu1 %v3399_v38  ;;  %v3402_v34 = vmax.f32 %v3398_v50, 0.0 }
 0xf7a   : > { %6999 = vmatmul.mubr.f32.vlgmr.msra.gmra.mxu1 %v3400_v41 }
 0xf7b   : > { %v3401_v16 = vmax.f32 %v3397_v10, 0.0  ;;  %v10251_v10 = vld [vmem:[%s11114_s9 + $0x18] sm:$0xff] }
 0xf7d   : > { %7001 = vmatprep.mubr.f32.mxu1 %v3401_v16 }
 0xf7e   : > { %7002 = vmatmul.mubr.f32.gmra.mxu1 %v3402_v34  ;;  %v10257_v34 = vld [vmem:[%s11108_s3 + $0x70] sm:$0xff] }
 0xf7f   : > { %7050 = vmatprep.mubr.msk.f32.mxu1 %vm159_vm0, %v10189_v51 }
0x103a   : > { %v7000_v29 = vpop.f32.mrf.mxu1 }
0x103b   : > { %v3475_v13 = vadd.f32 %v9866_v6, %v7000_v29  ;;  %v10264_v29 = vld [vmem:[%s11108_s3 + $0x68] sm:$0xff] }
0x103c   : > { %v3469_v46 = vpop.f32.mrf.mxu1 }
0x103d   : > { %v3517_v22 = vmul.f32 -0.27353132, %v3475_v13  ;;  %v4164_v61 = vmul.f32 -0.3223762, %v3475_v13  ;;  %v4819_v60 = vmul.f32 -0.0508638, %v3475_v13  ;;  %v3470_v39 = vadd.f32 %v9866_v6, %v3469_v46 }
0x103e   : > { %v7003_v47 = vpop.f32.mrf.mxu1  ;;  %v10271_v13 = vld [vmem:[%s11108_s3 + $0x60] sm:$0xff]  ;;  %v10278_v46 = vld [vmem:[%s11108_s3 + $0x58] sm:$0xff] }
0x103f   : > { %v3521_v33 = vadd.f32 %v3517_v22, %v9873_v23  ;;  %v3516_v19 = vmul.f32 -0.27353132, %v3470_v39  ;;  %v4163_v21 = vmul.f32 -0.3223762, %v3470_v39  ;;  %v4818_v31 = vmul.f32 -0.0508638, %v3470_v39 }
0x1040   : > { %v3485_v53 = vadd.f32 %v9866_v6, %v7003_v47  ;;  %v3479_v3 = vpop.f32.mrf.mxu1  ;;  %v10198_v43 = vadd.f32 %v4164_v61, %v9875_v59  ;;  %v10201_v45 = vadd.f32 %v4819_v60, %v9883_v44  ;;  %v10285_v22 = vld [vmem:[%s11108_s3 + $0x50] sm:$0xff]  ;;  %v10292_v61 = vld [vmem:[%s11108_s3 + $0x48] sm:$0xff]  ;;  %v10299_v60 = vld [vmem:[%s11108_s3 + $0x40] sm:$0xff] }
0x1041   : > { %v3520_v5 = vadd.f32 %v3516_v19, %v9881_v1  ;;  %v3480_v49 = vadd.f32 %v9866_v6, %v3479_v3  ;;  %v10206_v52 = vadd.f32 %v4163_v21, %v9897_v58  ;;  %v10209_v35 = vadd.f32 %v4818_v31, %v9899_v0  ;;  %v10306_v39 = vld [vmem:[%s11108_s3 + $0x38] sm:$0xff]  ;;  %v10313_v47 = vld [vmem:[%s11108_s3 + $0x30] sm:$0xff]  ;;  %v10327_v19 = vld [vmem:[%s11108_s3 + $0x20] sm:$0xff] }
0x1042   : > { %v3519_v23 = vmul.f32 -0.27353132, %v3485_v53  ;;  %v4166_v55 = vmul.f32 -0.3223762, %v3485_v53  ;;  %v4821_v11 = vmul.f32 -0.0508638, %v3485_v53  ;;  %v3525_v32 = vmul.f32 %v3521_v33, %v8170_v30 }
0x1043   : > { %v3518_v59 = vmul.f32 -0.27353132, %v3480_v49  ;;  %v4165_v24 = vmul.f32 -0.3223762, %v3480_v49  ;;  %v4820_v12 = vmul.f32 -0.0508638, %v3480_v49  ;;  %v3524_v1 = vmul.f32 %v3520_v5, %v8170_v30 }
0x1044   : > { %v3523_v44 = vadd.f32 %v3519_v23, %v9891_v28  ;;  %v10215_v6 = vadd.f32 %v4166_v55, %v9901_v7  ;;  %v10218_v58 = vadd.f32 %v4821_v11, %v9904_v37  ;;  %v10230_v28 = vld [vmem:[%s11114_s9] sm:$0xff]  ;;  %v10236_v7 = vld [vmem:[%s11114_s9 + $0x8] sm:$0xff]  ;;  %v10334_v21 = vld [vmem:[%s11108_s3 + $0x18] sm:$0xff] }
0x1045   : > { %v3522_v38 = vadd.f32 %v3518_v59, %v9894_v15  ;;  %v10222_v0 = vadd.f32 %v4165_v24, %v9906_v42  ;;  %v10225_v62 = vadd.f32 %v4820_v12, %v9908_v17  ;;  %v3528_v41 = vadd.f32 %v10230_v28, %v3524_v1  ;;  %v10244_v17 = vld [vmem:[%s11114_s9 + $0x10] sm:$0xff]  ;;  %v10320_v33 = vld [vmem:[%s11108_s3 + $0x28] sm:$0xff]  ;;  %v10355_v3 = vld [vmem:[%s11108_s3] sm:$0xff] }
0x1046   : > { %v3529_v15 = vadd.f32 %v10236_v7, %v3525_v32  ;;  %v3527_v42 = vmul.f32 %v3523_v44, %v8170_v30  ;;  %v10341_v31 = vld [vmem:[%s11108_s3 + $0x10] sm:$0xff]  ;;  %v10348_v53 = vld [vmem:[%s11108_s3 + $0x8] sm:$0xff]  ;;  %v10362_v5 = vld [vmem:[%s11110_s5 + $0x78] sm:$0xff] }
0x1047   : > { %v3526_v37 = vmul.f32 %v3522_v38, %v8170_v30  ;;  %7036 = vmatprep.mubr.f32.mxu0 %v3528_v41  ;;  %v10368_v11 = vld [vmem:[%s11107_s2] ss:$0 sm:$0xff] }
0x1048   : > { %7037 = vmatmul.mubr.f32.vlgmr.msra.gmra.mxu0 %v3529_v15  ;;  %v3531_v16 = vadd.f32 %v10251_v10, %v3527_v42  ;;  %v10398_v42 = vld [vmem:[%s11112_s7 + $0x10] sm:$0xff] }
0x1049   : > { %v3530_v50 = vadd.f32 %v10244_v17, %v3526_v37  ;;  %7109 = vmatpush3.msra.mxu0 %v10179_v57  ;;  %v10389_v37 = vld [vmem:[%s11112_s7 + $0x8] sm:$0xff] }
0x104a   : > { %7110 = vmatprep.subr.mxu0 %v10257_v34 }
0x104b   : > { %7039 = vmatprep.mubr.f32.mxu0 %v3530_v50  ;;  %7111 = vmatpush3.msra.mxu0 %v10257_v34  ;;  %v10407_v50 = vld [vmem:[%s11112_s7 + $0x18] sm:$0xff] }
0x104c   : > { %7040 = vmatmul.mubr.f32.gmra.mxu0 %v3531_v16  ;;  %7112 = vmatprep.subr.mxu0 %v10264_v29  ;;  %v10416_v16 = vld [vmem:[%s11113_s8] sm:$0xff] }
0x104d   : > { %7113 = vmatpush3.msra.mxu0 %v10264_v29 }
0x104e   : > { %7114 = vmatprep.subr.mxu0 %v10271_v13 }
0x104f   : > { %7115 = vmatpush3.msra.mxu0 %v10271_v13 }
0x1050   : > { %7116 = vmatprep.subr.mxu0 %v10278_v46 }
0x1051   : > { %7117 = vmatpush3.msra.mxu0 %v10278_v46 }
0x1052   : > { %7118 = vmatprep.subr.mxu0 %v10285_v22 }
0x1053   : > { %7119 = vmatpush3.msra.mxu0 %v10285_v22 }
0x1054   : > { %7120 = vmatprep.subr.mxu0 %v10292_v61 }
0x1055   : > { %7121 = vmatpush3.msra.mxu0 %v10292_v61 }
0x1056   : > { %7122 = vmatprep.subr.mxu0 %v10299_v60 }
0x1057   : > { %7123 = vmatpush3.msra.mxu0 %v10299_v60 }
0x1058   : > { %7124 = vmatprep.subr.mxu0 %v10306_v39 }
0x1059   : > { %7125 = vmatpush3.msra.mxu0 %v10306_v39 }
0x105a   : > { %7126 = vmatprep.subr.mxu0 %v10313_v47 }
0x105b   : > { %7127 = vmatpush3.msra.mxu0 %v10313_v47 }
0x105c   : > { %7128 = vmatprep.subr.mxu0 %v10320_v33 }
0x105d   : > { %7129 = vmatpush3.msra.mxu0 %v10320_v33 }
0x105e   : > { %7130 = vmatprep.subr.mxu0 %v10327_v19 }
0x105f   : > { %7131 = vmatpush3.msra.mxu0 %v10327_v19 }
0x1060   : > { %7132 = vmatprep.subr.mxu0 %v10334_v21 }
0x1061   : > { %7133 = vmatpush3.msra.mxu0 %v10334_v21 }
0x1062   : > { %7134 = vmatprep.subr.mxu0 %v10341_v31 }
0x1063   : > { %7135 = vmatpush3.msra.mxu0 %v10341_v31 }
0x1064   : > { %7136 = vmatprep.subr.mxu0 %v10348_v53 }
0x1065   : > { %7137 = vmatpush3.msra.mxu0 %v10348_v53 }
0x1066   : > { %7138 = vmatprep.subr.mxu0 %v10355_v3 }
0x1067   : > { %7139 = vmatpush3.msra.mxu0 %v10355_v3 }
0x1068   : > { %7184 = vmatprep.subr.mxu0 %v10362_v5 }
0x1108   : > { %v7038_v49 = vpop.f32.mrf.mxu0 }
0x1109   : > { %v3604_v24 = vadd.f32 %v10368_v11, %v7038_v49  ;;  %v10423_v49 = vld [vmem:[%s11113_s8 + $0x8] sm:$0xff] }
0x110a   : > { %v3598_v23 = vpop.f32.mrf.mxu0 }
0x110b   : > { %v3599_v1 = vadd.f32 %v10368_v11, %v3598_v23  ;;  %v10380_v41 = vmax.f32 %v3604_v24, 0.0  ;;  %v10430_v23 = vld [vmem:[%s11108_s3 + $0xf8] sm:$0xff]  ;;  %v10458_v24 = vld [vmem:[%s11108_s3 + $0xe8] sm:$0xff] }
0x110c   : > { %v7041_v55 = vpop.f32.mrf.mxu0  ;;  %11587 = vst [vmem:[#allocation6_spill] sm:$0xff] %v10458_v24 }
0x110d   : > { %v3614_v32 = vadd.f32 %v10368_v11, %v7041_v55  ;;  %v3617_v15 = vmax.f32 %v3599_v1, 0.0  ;;  %v10437_v55 = vld [vmem:[%s11113_s8 + $0x10] sm:$0xff]  ;;  %v10472_v1 = vld [vmem:[%s11108_s3 + $0xd8] sm:$0xff] }
0x110e   : > { %v3608_v59 = vpop.f32.mrf.mxu0  ;;  %11589 = vst [vmem:[#allocation8_spill] sm:$0xff] %v10472_v1 }
0x110f   : > { %v10372_v12 = vmax.f32 %v3614_v32, 0.0  ;;  %v3609_v44 = vadd.f32 %v10368_v11, %v3608_v59  ;;  %v10444_v32 = vld [vmem:[%s11108_s3 + $0xf0] sm:$0xff]  ;;  %v10451_v59 = vld [vmem:[%s11113_s8 + $0x18] sm:$0xff] }
0x1111   : > { %v10376_v38 = vmax.f32 %v3609_v44, 0.0  ;;  %7042 = vmatprep.subr.mxu1 %v10372_v12  ;;  %v10465_v44 = vld [vmem:[%s11108_s3 + $0xe0] sm:$0xff] }
0x1112   : > { %7043 = vmatpush3.msra.mxu1 %v10372_v12  ;;  %11588 = vst [vmem:[#allocation7_spill] sm:$0xff] %v10465_v44 }
0x1113   : > { %7044 = vmatprep.subr.mxu1 %v10376_v38 }
0x1114   : > { %7045 = vmatpush3.msra.mxu1 %v10376_v38 }
0x1115   : > { %7046 = vmatprep.subr.mxu1 %v10380_v41 }
0x1116   : > { %7047 = vmatpush3.msra.mxu1 %v10380_v41 }
0x1117   : > { %7048 = vmatprep.subr.mxu1 %v3617_v15 }
0x1118   : > { %7049 = vmatpush3.msra.mxu1 %v3617_v15 }
0x1119   : > { %7051 = vmatmul.mubr.msk.f32.vlgmr.msra.gmra.mxu1 %vm159_vm0, %v10389_v37  ;;  %7056 = vmatprep.subr.mxu1 %v10372_v12 }
0x111a   : > { %7057 = vmatpush3.msra.mxu1 %v10372_v12  ;;  %7053 = vmatprep.mubr.msk.f32.mxu1 %vm159_vm0, %v10398_v42 }
0x111b   : > { %7058 = vmatprep.subr.mxu1 %v10376_v38 }
0x111c   : > { %7059 = vmatpush3.msra.mxu1 %v10376_v38 }
0x111d   : > { %7054 = vmatmul.mubr.msk.f32.gmra.mxu1 %vm159_vm0, %v10407_v50  ;;  %7060 = vmatprep.subr.mxu1 %v10380_v41 }
0x111e   : > { %7061 = vmatpush3.msra.mxu1 %v10380_v41  ;;  %7064 = vmatprep.mubr.msk.f32.mxu1 %vm159_vm0, %v10416_v16 }
0x111f   : > { %7062 = vmatprep.subr.mxu1 %v3617_v15 }
0x1120   : > { %7063 = vmatpush3.msra.mxu1 %v3617_v15 }
0x1121   : > { %7065 = vmatmul.mubr.msk.f32.vlgmr.msra.gmra.mxu1 %vm159_vm0, %v10423_v49  ;;  %7070 = vmatprep.subr.mxu1 %v10430_v23 }
0x1122   : > { %7071 = vmatpush3.msra.mxu1 %v10430_v23  ;;  %7067 = vmatprep.mubr.msk.f32.mxu1 %vm159_vm0, %v10437_v55 }
0x1123   : > { %7072 = vmatprep.subr.mxu1 %v10444_v32 }
0x1124   : > { %7073 = vmatpush3.msra.mxu1 %v10444_v32 }
0x1125   : > { %7068 = vmatmul.mubr.msk.f32.gmra.mxu1 %vm159_vm0, %v10451_v59  ;;  %7074 = vmatprep.subr.mxu1 %v10458_v24 }
0x1126   : > { %7075 = vmatpush3.msra.mxu1 %v10458_v24  ;;  %7102 = vmatprep.mubr.f32.mxu1 %v3617_v15  ;;  %v10479_v15 = vld [vmem:[%s11108_s3 + $0xd0] sm:$0xff]  ;;  %v10687_v24 = vld [vmem:[%s11110_s5 + $0x60] sm:$0xff] }
0x1127   : > { %7076 = vmatprep.subr.mxu1 %v10465_v44  ;;  %11590 = vst [vmem:[#allocation9_spill] sm:$0xff] %v10479_v15 }
0x1128   : > { %7077 = vmatpush3.msra.mxu1 %v10465_v44  ;;  %v10486_v44 = vld [vmem:[%s11108_s3 + $0xc8] sm:$0xff] }
0x1129   : > { %7078 = vmatprep.subr.mxu1 %v10472_v1  ;;  %11591 = vst [vmem:[#allocation10_spill] sm:$0xff] %v10486_v44 }
0x112a   : > { %7079 = vmatpush3.msra.mxu1 %v10472_v1  ;;  %v10493_v1 = vld [vmem:[%s11108_s3 + $0xc0] sm:$0xff] }
0x112b   : > { %7080 = vmatprep.subr.mxu1 %v10479_v15  ;;  %11592 = vst [vmem:[#allocation11_spill] sm:$0xff] %v10493_v1 }
0x112c   : > { %7081 = vmatpush3.msra.mxu1 %v10479_v15  ;;  %v10500_v15 = vld [vmem:[%s11108_s3 + $0xb8] sm:$0xff] }
0x112d   : > { %7082 = vmatprep.subr.mxu1 %v10486_v44  ;;  %11593 = vst [vmem:[#allocation12_spill] sm:$0xff] %v10500_v15 }
0x112e   : > { %7083 = vmatpush3.msra.mxu1 %v10486_v44  ;;  %v10507_v44 = vld [vmem:[%s11108_s3 + $0xb0] sm:$0xff] }
0x112f   : > { %7084 = vmatprep.subr.mxu1 %v10493_v1  ;;  %11594 = vst [vmem:[#allocation13_spill] sm:$0xff] %v10507_v44 }
0x1130   : > { %7085 = vmatpush3.msra.mxu1 %v10493_v1  ;;  %v10514_v1 = vld [vmem:[%s11108_s3 + $0xa8] sm:$0xff] }
0x1131   : > { %7086 = vmatprep.subr.mxu1 %v10500_v15  ;;  %11595 = vst [vmem:[#allocation14_spill] sm:$0xff] %v10514_v1 }
0x1132   : > { %7087 = vmatpush3.msra.mxu1 %v10500_v15  ;;  %v10521_v15 = vld [vmem:[%s11108_s3 + $0xa0] sm:$0xff] }
0x1133   : > { %7088 = vmatprep.subr.mxu1 %v10507_v44  ;;  %11596 = vst [vmem:[#allocation15_spill] sm:$0xff] %v10521_v15 }
0x1134   : > { %7089 = vmatpush3.msra.mxu1 %v10507_v44  ;;  %v10528_v44 = vld [vmem:[%s11108_s3 + $0x98] sm:$0xff] }
0x1135   : > { %7090 = vmatprep.subr.mxu1 %v10514_v1  ;;  %11597 = vst [vmem:[#allocation16_spill] sm:$0xff] %v10528_v44 }
0x1136   : > { %7091 = vmatpush3.msra.mxu1 %v10514_v1  ;;  %v10535_v1 = vld [vmem:[%s11108_s3 + $0x90] sm:$0xff] }
0x1137   : > { %7092 = vmatprep.subr.mxu1 %v10521_v15  ;;  %11598 = vst [vmem:[#allocation17_spill] sm:$0xff] %v10535_v1 }
0x1138   : > { %7093 = vmatpush3.msra.mxu1 %v10521_v15  ;;  %v10542_v15 = vld [vmem:[%s11108_s3 + $0x88] sm:$0xff] }
0x1139   : > { %7094 = vmatprep.subr.mxu1 %v10528_v44  ;;  %11599 = vst [vmem:[#allocation18_spill] sm:$0xff] %v10542_v15 }
0x113a   : > { %7095 = vmatpush3.msra.mxu1 %v10528_v44  ;;  %v10549_v44 = vld [vmem:[%s11108_s3 + $0x80] sm:$0xff] }
0x113b   : > { %7096 = vmatprep.subr.mxu1 %v10535_v1  ;;  %11600 = vst [vmem:[#allocation19_spill] sm:$0xff] %v10549_v44 }
0x113c   : > { %7097 = vmatpush3.msra.mxu1 %v10535_v1  ;;  %v10557_v1 = vld [vmem:[%s11108_s3 + $0x178] sm:$0xff] }
0x113d   : > { %7098 = vmatprep.subr.mxu1 %v10542_v15  ;;  %11601 = vst [vmem:[#allocation20_spill] sm:$0xff] %v10557_v1 }
0x113e   : > { %7099 = vmatpush3.msra.mxu1 %v10542_v15  ;;  %v10565_v15 = vld [vmem:[%s11108_s3 + $0x170] sm:$0xff] }
0x113f   : > { %7100 = vmatprep.subr.mxu1 %v10549_v44  ;;  %11602 = vst [vmem:[#allocation21_spill] sm:$0xff] %v10565_v15 }
0x1140   : > { %7101 = vmatpush3.msra.mxu1 %v10549_v44 }
0x1141   : > { %7103 = vmatmul.mubr.f32.vlgmr.msra.gmra.mxu1 %v10380_v41  ;;  %7146 = vmatprep.subr.mxu1 %v10557_v1  ;;  %v10573_v41 = vld [vmem:[%s11108_s3 + $0x168] sm:$0xff] }
0x1142   : > { %7105 = vmatprep.mubr.f32.mxu1 %v10376_v38  ;;  %7147 = vmatpush3.msra.mxu1 %v10557_v1  ;;  %11603 = vst [vmem:[#allocation22_spill] sm:$0xff] %v10573_v41  ;;  %v10580_v38 = vld [vmem:[%s11108_s3 + $0x160] sm:$0xff] }
0x1143   : > { %7148 = vmatprep.subr.mxu1 %v10565_v15  ;;  %11604 = vst [vmem:[#allocation23_spill] sm:$0xff] %v10580_v38 }
0x1144   : > { %7149 = vmatpush3.msra.mxu1 %v10565_v15 }
0x1145   : > { %7106 = vmatmul.mubr.f32.gmra.mxu1 %v10372_v12  ;;  %7150 = vmatprep.subr.mxu1 %v10573_v41  ;;  %v10587_v12 = vld [vmem:[%s11108_s3 + $0x158] sm:$0xff] }
0x1146   : > { %7151 = vmatpush3.msra.mxu1 %v10573_v41  ;;  %11605 = vst [vmem:[#allocation24_spill] sm:$0xff] %v10587_v12  ;;  %v10594_v41 = vld [vmem:[%s11108_s3 + $0x150] sm:$0xff] }
0x1147   : > { %7152 = vmatprep.subr.mxu1 %v10580_v38  ;;  %11606 = vst [vmem:[#allocation25_spill] sm:$0xff] %v10594_v41 }
0x1148   : > { %7153 = vmatpush3.msra.mxu1 %v10580_v38  ;;  %v10601_v38 = vld [vmem:[%s11108_s3 + $0x148] sm:$0xff] }
0x1149   : > { %7154 = vmatprep.subr.mxu1 %v10587_v12  ;;  %11607 = vst [vmem:[#allocation26_spill] sm:$0xff] %v10601_v38 }
0x114a   : > { %7155 = vmatpush3.msra.mxu1 %v10587_v12  ;;  %v10608_v12 = vld [vmem:[%s11108_s3 + $0x140] sm:$0xff] }
0x114b   : > { %7156 = vmatprep.subr.mxu1 %v10594_v41  ;;  %11608 = vst [vmem:[#allocation27_spill] sm:$0xff] %v10608_v12 }
0x114c   : > { %7157 = vmatpush3.msra.mxu1 %v10594_v41  ;;  %v10615_v41 = vld [vmem:[%s11108_s3 + $0x138] sm:$0xff] }
0x114d   : > { %7158 = vmatprep.subr.mxu1 %v10601_v38  ;;  %11609 = vst [vmem:[#allocation28_spill] sm:$0xff] %v10615_v41 }
0x114e   : > { %7159 = vmatpush3.msra.mxu1 %v10601_v38  ;;  %v10622_v38 = vld [vmem:[%s11108_s3 + $0x130] sm:$0xff] }
0x114f   : > { %7160 = vmatprep.subr.mxu1 %v10608_v12  ;;  %11610 = vst [vmem:[#allocation29_spill] sm:$0xff] %v10622_v38 }
0x1150   : > { %7161 = vmatpush3.msra.mxu1 %v10608_v12  ;;  %v10629_v12 = vld [vmem:[%s11108_s3 + $0x128] sm:$0xff] }
0x1151   : > { %7162 = vmatprep.subr.mxu1 %v10615_v41  ;;  %11611 = vst [vmem:[#allocation30_spill] sm:$0xff] %v10629_v12 }
0x1152   : > { %7163 = vmatpush3.msra.mxu1 %v10615_v41  ;;  %v10636_v41 = vld [vmem:[%s11108_s3 + $0x120] sm:$0xff] }
0x1153   : > { %7164 = vmatprep.subr.mxu1 %v10622_v38  ;;  %11612 = vst [vmem:[#allocation31_spill] sm:$0xff] %v10636_v41 }
0x1154   : > { %7165 = vmatpush3.msra.mxu1 %v10622_v38  ;;  %v10643_v38 = vld [vmem:[%s11108_s3 + $0x118] sm:$0xff] }
0x1155   : > { %7166 = vmatprep.subr.mxu1 %v10629_v12  ;;  %11613 = vst [vmem:[#allocation32_spill] sm:$0xff] %v10643_v38 }
0x1156   : > { %7167 = vmatpush3.msra.mxu1 %v10629_v12  ;;  %v10650_v12 = vld [vmem:[%s11108_s3 + $0x110] sm:$0xff] }
0x1157   : > { %7168 = vmatprep.subr.mxu1 %v10636_v41  ;;  %11614 = vst [vmem:[#allocation33_spill] sm:$0xff] %v10650_v12 }
0x1158   : > { %7169 = vmatpush3.msra.mxu1 %v10636_v41  ;;  %v10657_v41 = vld [vmem:[%s11108_s3 + $0x108] sm:$0xff] }
0x1159   : > { %7170 = vmatprep.subr.mxu1 %v10643_v38  ;;  %11615 = vst [vmem:[#allocation34_spill] sm:$0xff] %v10657_v41 }
0x115a   : > { %7171 = vmatpush3.msra.mxu1 %v10643_v38  ;;  %v10664_v38 = vld [vmem:[%s11108_s3 + $0x100] sm:$0xff] }
0x115b   : > { %7172 = vmatprep.subr.mxu1 %v10650_v12  ;;  %11616 = vst [vmem:[#allocation35_spill] sm:$0xff] %v10664_v38 }
0x115c   : > { %7173 = vmatpush3.msra.mxu1 %v10650_v12 }
0x115d   : > { %7174 = vmatprep.subr.mxu1 %v10657_v41 }
0x115e   : > { %7175 = vmatpush3.msra.mxu1 %v10657_v41  ;;  %v10673_v41 = vld [vmem:[%s11110_s5 + $0x70] sm:$0xff] }
0x115f   : > { %7176 = vmatprep.subr.mxu1 %v10664_v38 }
0x1160   : > { %7177 = vmatpush3.msra.mxu1 %v10664_v38 }
0x1161   : > { %7222 = vmatprep.subr.mxu1 %v10036_v63 }
0x11d9   : > { %v7052_v12 = vpop.f32.mrf.mxu1 }
0x11db   : > { %v3687_v15 = vpop.f32.mrf.mxu1 }
0x11dc   : > { %7140 = vmatprep.mubr.f32.mxu0 %v3687_v15  ;;  %v10680_v15 = vld [vmem:[%s11110_s5 + $0x68] sm:$0xff] }
0x11dd   : > { %v7055_v1 = vpop.f32.mrf.mxu1  ;;  %7141 = vmatmul.mubr.f32.vlgmr.msra.gmra.mxu0 %v7052_v12  ;;  %11617 = vst [vmem:[#allocation36_spill] sm:$0xff] %v10680_v15 }
0x11de   : > { %7185 = vmatpush3.msra.mxu0 %v10362_v5 }
0x11df   : > { %v3697_v44 = vpop.f32.mrf.mxu1  ;;  %7186 = vmatprep.subr.mxu0 %v10673_v41 }
0x11e0   : > { %7143 = vmatprep.mubr.f32.mxu0 %v3697_v44  ;;  %7187 = vmatpush3.msra.mxu0 %v10673_v41 }
0x11e1   : > { %v7066_v38 = vpop.f32.mrf.mxu1  ;;  %7144 = vmatmul.mubr.f32.gmra.mxu0 %v7055_v1  ;;  %7188 = vmatprep.subr.mxu0 %v10680_v15  ;;  %v10694_v1 = vld [vmem:[%s11110_s5 + $0x58] sm:$0xff] }
0x11e2   : > { %7189 = vmatpush3.msra.mxu0 %v10680_v15  ;;  %11618 = vst [vmem:[#allocation37_spill] sm:$0xff] %v10694_v1 }
0x11e3   : > { %v3772_v12 = vpop.f32.mrf.mxu1  ;;  %7190 = vmatprep.subr.mxu0 %v10687_v24 }
0x11e4   : > { %7178 = vmatprep.mubr.f32.mxu1 %v3772_v12  ;;  %7191 = vmatpush3.msra.mxu0 %v10687_v24  ;;  %v10702_v12 = vld [vmem:[%s11110_s5 + $0x50] sm:$0xff] }
0x11e5   : > { %v7069_v44 = vpop.f32.mrf.mxu1  ;;  %7179 = vmatmul.mubr.f32.vlgmr.msra.gmra.mxu1 %v7066_v38  ;;  %7192 = vmatprep.subr.mxu0 %v10694_v1  ;;  %11619 = vst [vmem:[#allocation38_spill] sm:$0xff] %v10702_v12  ;;  %v10710_v38 = vld [vmem:[%s11110_s5 + $0x48] sm:$0xff] }
0x11e6   : > { %7193 = vmatpush3.msra.mxu0 %v10694_v1  ;;  %7223 = vmatpush3.msra.mxu1 %v10036_v63  ;;  %11620 = vst [vmem:[#allocation39_spill] sm:$0xff] %v10710_v38  ;;  %v10718_v63 = vld [vmem:[%s11110_s5 + $0x40] sm:$0xff] }
0x11e7   : > { %v3782_v15 = vpop.f32.mrf.mxu1  ;;  %7194 = vmatprep.subr.mxu0 %v10702_v12  ;;  %7224 = vmatprep.subr.mxu1 %v10053_v18  ;;  %11621 = vst [vmem:[#allocation40_spill] sm:$0xff] %v10718_v63 }
0x11e8   : > { %7181 = vmatprep.mubr.f32.mxu1 %v3782_v15  ;;  %7195 = vmatpush3.msra.mxu0 %v10702_v12  ;;  %v10727_v15 = vld [vmem:[%s11110_s5 + $0x38] sm:$0xff] }
0x11e9   : > { %7182 = vmatmul.mubr.f32.gmra.mxu1 %v7069_v44  ;;  %7196 = vmatprep.subr.mxu0 %v10710_v38  ;;  %11622 = vst [vmem:[#allocation41_spill] sm:$0xff] %v10727_v15 }
0x11ea   : > { %7197 = vmatpush3.msra.mxu0 %v10710_v38  ;;  %7225 = vmatpush3.msra.mxu1 %v10053_v18  ;;  %v10736_v18 = vld [vmem:[%s11110_s5 + $0x30] sm:$0xff] }
0x11eb   : > { %7198 = vmatprep.subr.mxu0 %v10718_v63  ;;  %7226 = vmatprep.subr.mxu1 %v10064_v56  ;;  %11623 = vst [vmem:[#allocation42_spill] sm:$0xff] %v10736_v18 }
0x11ec   : > { %7199 = vmatpush3.msra.mxu0 %v10718_v63  ;;  %7227 = vmatpush3.msra.mxu1 %v10064_v56  ;;  %v10745_v56 = vld [vmem:[%s11110_s5 + $0x28] sm:$0xff] }
0x11ed   : > { %7200 = vmatprep.subr.mxu0 %v10727_v15  ;;  %7228 = vmatprep.subr.mxu1 %v10073_v54  ;;  %11624 = vst [vmem:[#allocation43_spill] sm:$0xff] %v10745_v56 }
0x11ee   : > { %7201 = vmatpush3.msra.mxu0 %v10727_v15  ;;  %7229 = vmatpush3.msra.mxu1 %v10073_v54  ;;  %v10754_v54 = vld [vmem:[%s11110_s5 + $0x20] sm:$0xff] }
0x11ef   : > { %7202 = vmatprep.subr.mxu0 %v10736_v18  ;;  %7230 = vmatprep.subr.mxu1 %v10082_v20  ;;  %11625 = vst [vmem:[#allocation44_spill] sm:$0xff] %v10754_v54 }
0x11f0   : > { %7203 = vmatpush3.msra.mxu0 %v10736_v18  ;;  %7231 = vmatpush3.msra.mxu1 %v10082_v20  ;;  %v10763_v20 = vld [vmem:[%s11110_s5 + $0x18] sm:$0xff] }
0x11f1   : > { %7204 = vmatprep.subr.mxu0 %v10745_v56  ;;  %7232 = vmatprep.subr.mxu1 %v10091_v40  ;;  %11626 = vst [vmem:[#allocation45_spill] sm:$0xff] %v10763_v20 }
0x11f2   : > { %7205 = vmatpush3.msra.mxu0 %v10745_v56  ;;  %7233 = vmatpush3.msra.mxu1 %v10091_v40  ;;  %v10772_v40 = vld [vmem:[%s11110_s5 + $0x10] sm:$0xff] }
0x11f3   : > { %7206 = vmatprep.subr.mxu0 %v10754_v54  ;;  %7234 = vmatprep.subr.mxu1 %v10100_v25  ;;  %11627 = vst [vmem:[#allocation46_spill] sm:$0xff] %v10772_v40 }
0x11f4   : > { %7207 = vmatpush3.msra.mxu0 %v10754_v54  ;;  %7235 = vmatpush3.msra.mxu1 %v10100_v25  ;;  %v10781_v25 = vld [vmem:[%s11110_s5 + $0x8] sm:$0xff] }
0x11f5   : > { %7208 = vmatprep.subr.mxu0 %v10763_v20  ;;  %7236 = vmatprep.subr.mxu1 %v10109_v27  ;;  %11628 = vst [vmem:[#allocation47_spill] sm:$0xff] %v10781_v25 }
0x11f6   : > { %7209 = vmatpush3.msra.mxu0 %v10763_v20  ;;  %7237 = vmatpush3.msra.mxu1 %v10109_v27  ;;  %v10790_v27 = vld [vmem:[%s11110_s5] sm:$0xff] }
0x11f7   : > { %7210 = vmatprep.subr.mxu0 %v10772_v40  ;;  %7238 = vmatprep.subr.mxu1 %v10118_v8  ;;  %11629 = vst [vmem:[#allocation48_spill] sm:$0xff] %v10790_v27 }
0x11f8   : > { %7211 = vmatpush3.msra.mxu0 %v10772_v40  ;;  %7239 = vmatpush3.msra.mxu1 %v10118_v8 }
0x11f9   : > { %7212 = vmatprep.subr.mxu0 %v10781_v25  ;;  %7240 = vmatprep.subr.mxu1 %v10127_v9 }
0x11fa   : > { %7213 = vmatpush3.msra.mxu0 %v10781_v25  ;;  %7241 = vmatpush3.msra.mxu1 %v10127_v9 }
0x11fb   : > { %7214 = vmatprep.subr.mxu0 %v10790_v27  ;;  %7242 = vmatprep.subr.mxu1 %v10136_v48 }
0x11fc   : > { %7215 = vmatpush3.msra.mxu0 %v10790_v27  ;;  %7243 = vmatpush3.msra.mxu1 %v10136_v48 }
0x11fd   : > { %7244 = vmatprep.subr.mxu1 %v10144_v2 }
0x11fe   : > { %7245 = vmatpush3.msra.mxu1 %v10144_v2 }
0x11ff   : > { %7246 = vmatprep.subr.mxu1 %v10151_v36 }
0x1200   : > { %7247 = vmatpush3.msra.mxu1 %v10151_v36 }
0x1201   : > { %7248 = vmatprep.subr.mxu1 %v10158_v14  ;;  %v7104_v8 = vpop.f32.mrf.mxu1 }
0x1202   : > { %7249 = vmatpush3.msra.mxu1 %v10158_v14 }
0x1203   : > { %7250 = vmatprep.subr.mxu1 %v10165_v26  ;;  %v3857_v9 = vpop.f32.mrf.mxu1 }
0x1204   : > { %7251 = vmatpush3.msra.mxu1 %v10165_v26 }
0x1205   : > { %7252 = vmatprep.subr.mxu1 %v10172_v4  ;;  %v7107_v2 = vpop.f32.mrf.mxu1 }
0x1206   : > { %7253 = vmatpush3.msra.mxu1 %v10172_v4  ;;  %v10810_v4 = vld [vmem:[%s11109_s4] ss:$0 sm:$0xff] }
0x1207   : > { %7326 = vmatprep.subr.mxu1 %v10179_v57  ;;  %v3867_v36 = vpop.f32.mrf.mxu1 }
0x129d   : > { %v7142_v48 = vpop.f32.mrf.mxu0 }
0x129e   : > { %v3948_v25 = vadd.f32 %v7142_v48, %v7104_v8 }
0x129f   : > { %v3942_v44 = vpop.f32.mrf.mxu0 }
0x12a0   : > { %v3943_v14 = vadd.f32 %v3942_v44, %v3857_v9 }
0x12a1   : > { %v7145_v27 = vpop.f32.mrf.mxu0 }
0x12a2   : > { %v3958_v26 = vadd.f32 %v7145_v27, %v7107_v2 }
0x12a3   : > { %v3952_v54 = vpop.f32.mrf.mxu0 }
0x12a4   : > { %v3953_v38 = vadd.f32 %v3952_v54, %v3867_v36 }
0x12a5   : > { %v7180_v40 = vpop.f32.mrf.mxu1 }
0x12a6   : > { %v4047_v20 = vadd.f32 %v7180_v40, %v3948_v25 }
0x12a7   : > { %v4027_v56 = vpop.f32.mrf.mxu1 }
0x12a8   : > { %v4046_v18 = vadd.f32 %v4027_v56, %v3943_v14  ;;  %v4051_v15 = vadd.f32 %v10810_v4, %v4047_v20 }
0x12a9   : > { %v7183_v63 = vpop.f32.mrf.mxu1 }
0x12aa   : > { %v4050_v12 = vadd.f32 %v10810_v4, %v4046_v18  ;;  %v4049_v1 = vadd.f32 %v7183_v63, %v3958_v26  ;;  %v4055_v40 = vmax.f32 %v4051_v15, 0.0 }
0x12ab   : > { %v4037_v8 = vpop.f32.mrf.mxu1 }
0x12ac   : > { %v4054_v48 = vmax.f32 %v4050_v12, 0.0  ;;  %v4048_v9 = vadd.f32 %v4037_v8, %v3953_v38  ;;  %v4053_v25 = vadd.f32 %v10810_v4, %v4049_v1  ;;  %v10821_v12 = vld [vmem:[%s11111_s6] ss:$0 sm:$0xff] }
0x12ae   : > { %v4052_v56 = vadd.f32 %v10810_v4, %v4048_v9  ;;  %7216 = vmatprep.mubr.f32.mxu0 %v4054_v48  ;;  %v4057_v2 = vmax.f32 %v4053_v25, 0.0 }
0x12af   : > { %7217 = vmatmul.mubr.f32.vlgmr.msra.gmra.mxu0 %v4055_v40 }
0x12b0   : > { %v4056_v27 = vmax.f32 %v4052_v56, 0.0 }
0x12b2   : > { %7219 = vmatprep.mubr.f32.mxu0 %v4056_v27 }
0x12b3   : > { %7220 = vmatmul.mubr.f32.gmra.mxu0 %v4057_v2 }
0x12b4   : > { %7268 = vmatprep.mubr.msk.f32.mxu0 %vm159_vm0, %v10189_v51 }
0x136f   : > { %v7218_v54 = vpop.f32.mrf.mxu0 }
0x1370   : > { %v4130_v38 = vadd.f32 %v10821_v12, %v7218_v54 }
0x1371   : > { %v4124_v1 = vpop.f32.mrf.mxu0 }
0x1372   : > { %v4172_v63 = vmul.f32 0.13095239, %v4130_v38  ;;  %v4827_v15 = vmul.f32 0.041904762, %v4130_v38  ;;  %v4125_v18 = vadd.f32 %v10821_v12, %v4124_v1 }
0x1373   : > { %v7221_v20 = vpop.f32.mrf.mxu0 }
0x1374   : > { %v4176_v44 = vadd.f32 %v4172_v63, %v10198_v43  ;;  %v10827_v36 = vadd.f32 %v4827_v15, %v10201_v45  ;;  %v4171_v51 = vmul.f32 0.13095239, %v4125_v18  ;;  %v4826_v14 = vmul.f32 0.041904762, %v4125_v18 }
0x1375   : > { %v4140_v26 = vadd.f32 %v10821_v12, %v7221_v20  ;;  %v4134_v8 = vpop.f32.mrf.mxu0  ;;  %v11646_v20 = vld [vmem:[#allocation22_spill] sm:$0xff] }
0x1376   : > { %v4175_v48 = vadd.f32 %v4171_v51, %v10206_v52  ;;  %v10832_v9 = vadd.f32 %v4826_v14, %v10209_v35  ;;  %v4135_v40 = vadd.f32 %v10821_v12, %v4134_v8  ;;  %v4180_v27 = vmul.f32 %v4176_v44, %v8170_v30  ;;  %v11647_v44 = vld [vmem:[#allocation23_spill] sm:$0xff]  ;;  %v11648_v51 = vld [vmem:[#allocation24_spill] sm:$0xff]  ;;  %v11649_v14 = vld [vmem:[#allocation25_spill] sm:$0xff] }
0x1377   : > { %v4174_v25 = vmul.f32 0.13095239, %v4140_v26  ;;  %v4829_v56 = vmul.f32 0.041904762, %v4140_v26  ;;  %v11650_v26 = vld [vmem:[#allocation26_spill] sm:$0xff]  ;;  %v11651_v8 = vld [vmem:[#allocation27_spill] sm:$0xff] }
0x1378   : > { %v4173_v43 = vmul.f32 0.13095239, %v4135_v40  ;;  %v4828_v2 = vmul.f32 0.041904762, %v4135_v40  ;;  %v4179_v45 = vmul.f32 %v4175_v48, %v8170_v30  ;;  %v10849_v63 = vadd.f32 %v10236_v7, %v4180_v27  ;;  %v11652_v48 = vld [vmem:[#allocation28_spill] sm:$0xff]  ;;  %v11653_v40 = vld [vmem:[#allocation29_spill] sm:$0xff] }
0x1379   : > { %v4178_v54 = vadd.f32 %v4174_v25, %v10215_v6  ;;  %v10839_v38 = vadd.f32 %v4829_v56, %v10218_v58  ;;  %v11654_v25 = vld [vmem:[#allocation30_spill] sm:$0xff]  ;;  %v11655_v56 = vld [vmem:[#allocation31_spill] sm:$0xff]  ;;  %v11656_v27 = vld [vmem:[#allocation32_spill] sm:$0xff] }
0x137a   : > { %v4177_v52 = vadd.f32 %v4173_v43, %v10222_v0  ;;  %v10843_v35 = vadd.f32 %v4828_v2, %v10225_v62  ;;  %v10846_v1 = vadd.f32 %v10230_v28, %v4179_v45  ;;  %v11657_v43 = vld [vmem:[#allocation33_spill] sm:$0xff]  ;;  %v11658_v2 = vld [vmem:[#allocation34_spill] sm:$0xff]  ;;  %v11659_v45 = vld [vmem:[#allocation35_spill] sm:$0xff] }
0x137b   : > { %v4182_v18 = vmul.f32 %v4178_v54, %v8170_v30 }
0x137c   : > { %v4181_v15 = vmul.f32 %v4177_v52, %v8170_v30  ;;  %7254 = vmatprep.mubr.f32.mxu1 %v10846_v1 }
0x137d   : > { %7255 = vmatmul.mubr.f32.vlgmr.msra.gmra.mxu1 %v10849_v63  ;;  %v10861_v58 = vadd.f32 %v10251_v10, %v4182_v18 }
0x137e   : > { %v10856_v6 = vadd.f32 %v10244_v17, %v4181_v15  ;;  %7327 = vmatpush3.msra.mxu1 %v10179_v57 }
0x137f   : > { %7328 = vmatprep.subr.mxu1 %v10257_v34 }
0x1380   : > { %7257 = vmatprep.mubr.f32.mxu1 %v10856_v6  ;;  %7329 = vmatpush3.msra.mxu1 %v10257_v34 }
0x1381   : > { %7258 = vmatmul.mubr.f32.gmra.mxu1 %v10861_v58  ;;  %7330 = vmatprep.subr.mxu1 %v10264_v29 }
0x1382   : > { %7331 = vmatpush3.msra.mxu1 %v10264_v29 }
0x1383   : > { %7332 = vmatprep.subr.mxu1 %v10271_v13 }
0x1384   : > { %7333 = vmatpush3.msra.mxu1 %v10271_v13 }
0x1385   : > { %7334 = vmatprep.subr.mxu1 %v10278_v46 }
0x1386   : > { %7335 = vmatpush3.msra.mxu1 %v10278_v46 }
0x1387   : > { %7336 = vmatprep.subr.mxu1 %v10285_v22 }
0x1388   : > { %7337 = vmatpush3.msra.mxu1 %v10285_v22 }
0x1389   : > { %7338 = vmatprep.subr.mxu1 %v10292_v61 }
0x138a   : > { %7339 = vmatpush3.msra.mxu1 %v10292_v61 }
0x138b   : > { %7340 = vmatprep.subr.mxu1 %v10299_v60 }
0x138c   : > { %7341 = vmatpush3.msra.mxu1 %v10299_v60 }
0x138d   : > { %7342 = vmatprep.subr.mxu1 %v10306_v39 }
0x138e   : > { %7343 = vmatpush3.msra.mxu1 %v10306_v39 }
0x138f   : > { %7344 = vmatprep.subr.mxu1 %v10313_v47 }
0x1390   : > { %7345 = vmatpush3.msra.mxu1 %v10313_v47 }
0x1391   : > { %7346 = vmatprep.subr.mxu1 %v10320_v33 }
0x1392   : > { %7347 = vmatpush3.msra.mxu1 %v10320_v33  ;;  %v11630_v33 = vld [vmem:[#allocation6_spill] sm:$0xff] }
0x1393   : > { %7348 = vmatprep.subr.mxu1 %v10327_v19 }
0x1394   : > { %7349 = vmatpush3.msra.mxu1 %v10327_v19  ;;  %v11631_v19 = vld [vmem:[#allocation7_spill] sm:$0xff] }
0x1395   : > { %7350 = vmatprep.subr.mxu1 %v10334_v21 }
0x1396   : > { %7351 = vmatpush3.msra.mxu1 %v10334_v21  ;;  %v11632_v21 = vld [vmem:[#allocation8_spill] sm:$0xff] }
0x1397   : > { %7352 = vmatprep.subr.mxu1 %v10341_v31 }
0x1398   : > { %7353 = vmatpush3.msra.mxu1 %v10341_v31  ;;  %v11633_v31 = vld [vmem:[#allocation9_spill] sm:$0xff] }
0x1399   : > { %7354 = vmatprep.subr.mxu1 %v10348_v53 }
0x139a   : > { %7355 = vmatpush3.msra.mxu1 %v10348_v53  ;;  %v11634_v53 = vld [vmem:[#allocation10_spill] sm:$0xff] }
0x139b   : > { %7356 = vmatprep.subr.mxu1 %v10355_v3 }
0x139c   : > { %7357 = vmatpush3.msra.mxu1 %v10355_v3  ;;  %v11635_v3 = vld [vmem:[#allocation11_spill] sm:$0xff] }
0x139d   : > { %7402 = vmatprep.subr.mxu1 %v10362_v5 }
0x143d   : > { %v7256_v57 = vpop.f32.mrf.mxu1 }
0x143e   : > { %v4259_v13 = vadd.f32 %v10368_v11, %v7256_v57 }
0x143f   : > { %v4253_v0 = vpop.f32.mrf.mxu1 }
0x1440   : > { %v4254_v61 = vadd.f32 %v10368_v11, %v4253_v0  ;;  %v4273_v39 = vmax.f32 %v4259_v13, 0.0  ;;  %v11660_v0 = vld [vmem:[#allocation36_spill] sm:$0xff]  ;;  %v11663_v13 = vld [vmem:[#allocation39_spill] sm:$0xff] }
0x1441   : > { %v7259_v62 = vpop.f32.mrf.mxu1 }
0x1442   : > { %v4269_v34 = vadd.f32 %v10368_v11, %v7259_v62  ;;  %v4272_v47 = vmax.f32 %v4254_v61, 0.0  ;;  %v11667_v61 = vld [vmem:[#allocation43_spill] sm:$0xff] }
0x1443   : > { %v4263_v29 = vpop.f32.mrf.mxu1 }
0x1444   : > { %v10897_v46 = vmax.f32 %v4269_v34, 0.0  ;;  %v4264_v22 = vadd.f32 %v10368_v11, %v4263_v29  ;;  %v11636_v11 = vld [vmem:[#allocation12_spill] sm:$0xff] }
0x1446   : > { %v4274_v60 = vmax.f32 %v4264_v22, 0.0  ;;  %7260 = vmatprep.subr.mxu0 %v10897_v46  ;;  %v11666_v22 = vld [vmem:[#allocation42_spill] sm:$0xff] }
0x1447   : > { %7261 = vmatpush3.msra.mxu0 %v10897_v46 }
0x1448   : > { %7262 = vmatprep.subr.mxu0 %v4274_v60 }
0x1449   : > { %7263 = vmatpush3.msra.mxu0 %v4274_v60 }
0x144a   : > { %7264 = vmatprep.subr.mxu0 %v4273_v39 }
0x144b   : > { %7265 = vmatpush3.msra.mxu0 %v4273_v39 }
0x144c   : > { %7266 = vmatprep.subr.mxu0 %v4272_v47 }
0x144d   : > { %7267 = vmatpush3.msra.mxu0 %v4272_v47 }
0x144e   : > { %7269 = vmatmul.mubr.msk.f32.vlgmr.msra.gmra.mxu0 %vm159_vm0, %v10389_v37  ;;  %7274 = vmatprep.subr.mxu0 %v10897_v46  ;;  %v11637_v37 = vld [vmem:[#allocation13_spill] sm:$0xff] }
0x144f   : > { %7275 = vmatpush3.msra.mxu0 %v10897_v46  ;;  %7271 = vmatprep.mubr.msk.f32.mxu0 %vm159_vm0, %v10398_v42  ;;  %v11638_v42 = vld [vmem:[#allocation14_spill] sm:$0xff] }
0x1450   : > { %7276 = vmatprep.subr.mxu0 %v4274_v60 }
0x1451   : > { %7277 = vmatpush3.msra.mxu0 %v4274_v60 }
0x1452   : > { %7272 = vmatmul.mubr.msk.f32.gmra.mxu0 %vm159_vm0, %v10407_v50  ;;  %7278 = vmatprep.subr.mxu0 %v4273_v39  ;;  %v11639_v50 = vld [vmem:[#allocation15_spill] sm:$0xff] }
0x1453   : > { %7279 = vmatpush3.msra.mxu0 %v4273_v39  ;;  %7282 = vmatprep.mubr.msk.f32.mxu0 %vm159_vm0, %v10416_v16  ;;  %v11640_v16 = vld [vmem:[#allocation16_spill] sm:$0xff] }
0x1454   : > { %7280 = vmatprep.subr.mxu0 %v4272_v47 }
0x1455   : > { %7281 = vmatpush3.msra.mxu0 %v4272_v47 }
0x1456   : > { %7283 = vmatmul.mubr.msk.f32.vlgmr.msra.gmra.mxu0 %vm159_vm0, %v10423_v49  ;;  %7288 = vmatprep.subr.mxu0 %v10430_v23  ;;  %v11641_v49 = vld [vmem:[#allocation17_spill] sm:$0xff] }
0x1457   : > { %7289 = vmatpush3.msra.mxu0 %v10430_v23  ;;  %7285 = vmatprep.mubr.msk.f32.mxu0 %vm159_vm0, %v10437_v55  ;;  %v11642_v23 = vld [vmem:[#allocation18_spill] sm:$0xff]  ;;  %v11643_v55 = vld [vmem:[#allocation19_spill] sm:$0xff] }
0x1458   : > { %7290 = vmatprep.subr.mxu0 %v10444_v32 }
0x1459   : > { %7291 = vmatpush3.msra.mxu0 %v10444_v32  ;;  %v11644_v32 = vld [vmem:[#allocation20_spill] sm:$0xff] }
0x145a   : > { %7286 = vmatmul.mubr.msk.f32.gmra.mxu0 %vm159_vm0, %v10451_v59  ;;  %7292 = vmatprep.subr.mxu0 %v11630_v33  ;;  %v11645_v59 = vld [vmem:[#allocation21_spill] sm:$0xff] }
0x145b   : > { %7293 = vmatpush3.msra.mxu0 %v11630_v33  ;;  %7320 = vmatprep.mubr.f32.mxu0 %v4272_v47  ;;  %v11670_v47 = vld [vmem:[#allocation46_spill] sm:$0xff]  ;;  %v11671_v33 = vld [vmem:[#allocation47_spill] sm:$0xff] }
0x145c   : > { %7294 = vmatprep.subr.mxu0 %v11631_v19 }
0x145d   : > { %7295 = vmatpush3.msra.mxu0 %v11631_v19  ;;  %v11672_v19 = vld [vmem:[#allocation48_spill] sm:$0xff] }
0x145e   : > { %7296 = vmatprep.subr.mxu0 %v11632_v21 }
0x145f   : > { %7297 = vmatpush3.msra.mxu0 %v11632_v21 }
0x1460   : > { %7298 = vmatprep.subr.mxu0 %v11633_v31 }
0x1461   : > { %7299 = vmatpush3.msra.mxu0 %v11633_v31 }
0x1462   : > { %7300 = vmatprep.subr.mxu0 %v11634_v53 }
0x1463   : > { %7301 = vmatpush3.msra.mxu0 %v11634_v53 }
0x1464   : > { %7302 = vmatprep.subr.mxu0 %v11635_v3 }
0x1465   : > { %7303 = vmatpush3.msra.mxu0 %v11635_v3 }
0x1466   : > { %7304 = vmatprep.subr.mxu0 %v11636_v11 }
0x1467   : > { %7305 = vmatpush3.msra.mxu0 %v11636_v11 }
0x1468   : > { %7306 = vmatprep.subr.mxu0 %v11637_v37 }
0x1469   : > { %7307 = vmatpush3.msra.mxu0 %v11637_v37 }
0x146a   : > { %7308 = vmatprep.subr.mxu0 %v11638_v42 }
0x146b   : > { %7309 = vmatpush3.msra.mxu0 %v11638_v42 }
0x146c   : > { %7310 = vmatprep.subr.mxu0 %v11639_v50 }
0x146d   : > { %7311 = vmatpush3.msra.mxu0 %v11639_v50 }
0x146e   : > { %7312 = vmatprep.subr.mxu0 %v11640_v16 }
0x146f   : > { %7313 = vmatpush3.msra.mxu0 %v11640_v16 }
0x1470   : > { %7314 = vmatprep.subr.mxu0 %v11641_v49 }
0x1471   : > { %7315 = vmatpush3.msra.mxu0 %v11641_v49 }
0x1472   : > { %7316 = vmatprep.subr.mxu0 %v11642_v23 }
0x1473   : > { %7317 = vmatpush3.msra.mxu0 %v11642_v23 }
0x1474   : > { %7318 = vmatprep.subr.mxu0 %v11643_v55 }
0x1475   : > { %7319 = vmatpush3.msra.mxu0 %v11643_v55 }
0x1476   : > { %7321 = vmatmul.mubr.f32.vlgmr.msra.gmra.mxu0 %v4273_v39  ;;  %7364 = vmatprep.subr.mxu0 %v11644_v32  ;;  %v11669_v39 = vld [vmem:[#allocation45_spill] sm:$0xff] }
0x1477   : > { %7323 = vmatprep.mubr.f32.mxu0 %v4274_v60  ;;  %7365 = vmatpush3.msra.mxu0 %v11644_v32  ;;  %v11668_v60 = vld [vmem:[#allocation44_spill] sm:$0xff] }
0x1478   : > { %7366 = vmatprep.subr.mxu0 %v11645_v59 }
0x1479   : > { %7367 = vmatpush3.msra.mxu0 %v11645_v59 }
0x147a   : > { %7324 = vmatmul.mubr.f32.gmra.mxu0 %v10897_v46  ;;  %7368 = vmatprep.subr.mxu0 %v11646_v20  ;;  %v11664_v46 = vld [vmem:[#allocation40_spill] sm:$0xff] }
0x147b   : > { %7369 = vmatpush3.msra.mxu0 %v11646_v20 }
0x147c   : > { %7370 = vmatprep.subr.mxu0 %v11647_v44 }
0x147d   : > { %7371 = vmatpush3.msra.mxu0 %v11647_v44 }
0x147e   : > { %7372 = vmatprep.subr.mxu0 %v11648_v51 }
0x147f   : > { %7373 = vmatpush3.msra.mxu0 %v11648_v51 }
0x1480   : > { %7374 = vmatprep.subr.mxu0 %v11649_v14 }
0x1481   : > { %7375 = vmatpush3.msra.mxu0 %v11649_v14 }
0x1482   : > { %7376 = vmatprep.subr.mxu0 %v11650_v26 }
0x1483   : > { %7377 = vmatpush3.msra.mxu0 %v11650_v26 }
0x1484   : > { %7378 = vmatprep.subr.mxu0 %v11651_v8 }
0x1485   : > { %7379 = vmatpush3.msra.mxu0 %v11651_v8 }
0x1486   : > { %7380 = vmatprep.subr.mxu0 %v11652_v48 }
0x1487   : > { %7381 = vmatpush3.msra.mxu0 %v11652_v48 }
0x1488   : > { %7382 = vmatprep.subr.mxu0 %v11653_v40 }
0x1489   : > { %7383 = vmatpush3.msra.mxu0 %v11653_v40 }
0x148a   : > { %7384 = vmatprep.subr.mxu0 %v11654_v25 }
0x148b   : > { %7385 = vmatpush3.msra.mxu0 %v11654_v25 }
0x148c   : > { %7386 = vmatprep.subr.mxu0 %v11655_v56 }
0x148d   : > { %7387 = vmatpush3.msra.mxu0 %v11655_v56 }
0x148e   : > { %7388 = vmatprep.subr.mxu0 %v11656_v27 }
0x148f   : > { %7389 = vmatpush3.msra.mxu0 %v11656_v27 }
0x1490   : > { %7390 = vmatprep.subr.mxu0 %v11657_v43 }
0x1491   : > { %7391 = vmatpush3.msra.mxu0 %v11657_v43 }
0x1492   : > { %7392 = vmatprep.subr.mxu0 %v11658_v2 }
0x1493   : > { %7393 = vmatpush3.msra.mxu0 %v11658_v2 }
0x1494   : > { %7394 = vmatprep.subr.mxu0 %v11659_v45 }
0x1495   : > { %7395 = vmatpush3.msra.mxu0 %v11659_v45 }
0x150e   : > { %v7270_v54 = vpop.f32.mrf.mxu0 }
0x1510   : > { %v4342_v52 = vpop.f32.mrf.mxu0 }
0x1511   : > { %7358 = vmatprep.mubr.f32.mxu1 %v4342_v52  ;;  %v4851_v52 = vand.u32 2147483647, %v10849_v63 }
0x1512   : > { %v7273_v15 = vpop.f32.mrf.mxu0  ;;  %7359 = vmatmul.mubr.f32.vlgmr.msra.gmra.mxu1 %v7270_v54  ;;  %v4847_v54 = vand.u32 2147483647, %v10236_v7 }
0x1513   : > { %7403 = vmatpush3.msra.mxu1 %v10362_v5  ;;  %v11661_v5 = vld [vmem:[#allocation37_spill] sm:$0xff] }
0x1514   : > { %v4352_v18 = vpop.f32.mrf.mxu0  ;;  %7404 = vmatprep.subr.mxu1 %v10673_v41 }
0x1515   : > { %7361 = vmatprep.mubr.f32.mxu1 %v4352_v18  ;;  %7405 = vmatpush3.msra.mxu1 %v10673_v41  ;;  %v11662_v41 = vld [vmem:[#allocation38_spill] sm:$0xff]  ;;  %v4850_v18 = vand.u32 2147483647, %v10846_v1 }
0x1516   : > { %v7284_v57 = vpop.f32.mrf.mxu0  ;;  %7362 = vmatmul.mubr.f32.gmra.mxu1 %v7273_v15  ;;  %7406 = vmatprep.subr.mxu1 %v11660_v0  ;;  %v4846_v15 = vand.u32 2147483647, %v10230_v28 }
0x1517   : > { %7407 = vmatpush3.msra.mxu1 %v11660_v0  ;;  %v4849_v0 = vand.u32 2147483647, %v10251_v10 }
0x1518   : > { %v4427_v62 = vpop.f32.mrf.mxu0  ;;  %7408 = vmatprep.subr.mxu1 %v10687_v24 }
0x1519   : > { %7396 = vmatprep.mubr.f32.mxu0 %v4427_v62  ;;  %7409 = vmatpush3.msra.mxu1 %v10687_v24  ;;  %v11665_v24 = vld [vmem:[#allocation41_spill] sm:$0xff]  ;;  %v4853_v62 = vand.u32 2147483647, %v10861_v58 }
0x151a   : > { %v7287_v34 = vpop.f32.mrf.mxu0  ;;  %7397 = vmatmul.mubr.f32.vlgmr.msra.gmra.mxu0 %v7284_v57  ;;  %7410 = vmatprep.subr.mxu1 %v11661_v5  ;;  %v4855_v57 = vmax.f32.f32 %v4847_v54, %v4851_v52 }
0x151b   : > { %7411 = vmatpush3.msra.mxu1 %v11661_v5  ;;  %v4852_v5 = vand.u32 2147483647, %v10856_v6 }
0x151c   : > { %v4437_v29 = vpop.f32.mrf.mxu0  ;;  %7412 = vmatprep.subr.mxu1 %v11662_v41 }
0x151d   : > { %7399 = vmatprep.mubr.f32.mxu0 %v4437_v29  ;;  %7413 = vmatpush3.msra.mxu1 %v11662_v41  ;;  %v4859_v29 = vmul.f32 0.001, %v4855_v57  ;;  %v4857_v41 = vmax.f32.f32 %v4849_v0, %v4853_v62  ;;  %v7680_v0 = vld [vmem:[%s11114_s9] sm:$0xff] }
0x151e   : > { %7400 = vmatmul.mubr.f32.gmra.mxu0 %v7287_v34  ;;  %7414 = vmatprep.subr.mxu1 %v11663_v13  ;;  %v4848_v34 = vand.u32 2147483647, %v10244_v17  ;;  %v4904_v62 = vsub.f32 %v10846_v1, %v7680_v0  ;;  %v7685_v1 = vld [vmem:[#allocation2 + $0x8] sm:$0xff] }
0x151f   : > { %7415 = vmatpush3.msra.mxu1 %v11663_v13 }
0x1520   : > { %7416 = vmatprep.subr.mxu1 %v11664_v46  ;;  %v4856_v7 = vmax.f32.f32 %v4848_v34, %v4852_v5  ;;  %v7682_v5 = vld [vmem:[%s11114_s9 + $0x18] sm:$0xff] }
0x1521   : > { %7417 = vmatpush3.msra.mxu1 %v11664_v46  ;;  %v4863_v46 = vadd.f32 0.001, %v4859_v29  ;;  %v7683_v29 = vld [vmem:[#allocation2] sm:$0xff] }
0x1522   : > { %7418 = vmatprep.subr.mxu1 %v11665_v24  ;;  %v4860_v28 = vmul.f32 0.001, %v4856_v7 }
0x1523   : > { %7419 = vmatpush3.msra.mxu1 %v11665_v24  ;;  %v4861_v24 = vmul.f32 0.001, %v4857_v41  ;;  %7473 = vrcp.f32 %v4863_v46 }
0x1524   : > { %7420 = vmatprep.subr.mxu1 %v11666_v22 }
0x1525   : > { %7421 = vmatpush3.msra.mxu1 %v11666_v22 }
0x1526   : > { %7422 = vmatprep.subr.mxu1 %v11667_v61 }
0x1527   : > { %7423 = vmatpush3.msra.mxu1 %v11667_v61  ;;  %v4865_v61 = vadd.f32 0.001, %v4861_v24  ;;  %v7686_v24 = vld [vmem:[#allocation2 + $0x18] sm:$0xff] }
0x1528   : > { %7424 = vmatprep.subr.mxu1 %v11668_v60 }
0x1529   : > { %7425 = vmatpush3.msra.mxu1 %v11668_v60  ;;  %v4864_v60 = vadd.f32 0.001, %v4860_v28 }
0x152a   : > { %7426 = vmatprep.subr.mxu1 %v11669_v39 }
0x152b   : > { %7427 = vmatpush3.msra.mxu1 %v11669_v39 }
0x152c   : > { %7428 = vmatprep.subr.mxu1 %v11670_v47 }
0x152d   : > { %7429 = vmatpush3.msra.mxu1 %v11670_v47 }
0x152e   : > { %7430 = vmatprep.subr.mxu1 %v11671_v33 }
0x152f   : > { %7431 = vmatpush3.msra.mxu1 %v11671_v33 }
0x1530   : > { %7432 = vmatprep.subr.mxu1 %v11672_v19 }
0x1531   : > { %7433 = vmatpush3.msra.mxu1 %v11672_v19 }
0x1536   : > { %v7322_v21 = vpop.f32.mrf.mxu0 }
0x1538   : > { %v4512_v31 = vpop.f32.mrf.mxu0 }
0x153a   : > { %v7325_v3 = vpop.f32.mrf.mxu0 }
0x153c   : > { %v4522_v37 = vpop.f32.mrf.mxu0 }
0x15d2   : > { %v7360_v53 = vpop.f32.mrf.mxu1 }
0x15d3   : > { %v4603_v50 = vadd.f32 %v7360_v53, %v7322_v21 }
0x15d4   : > { %v4597_v11 = vpop.f32.mrf.mxu1 }
0x15d5   : > { %v4598_v49 = vadd.f32 %v4597_v11, %v4512_v31 }
0x15d6   : > { %v7363_v42 = vpop.f32.mrf.mxu1 }
0x15d7   : > { %v4613_v59 = vadd.f32 %v7363_v42, %v7325_v3 }
0x15d8   : > { %v4607_v55 = vpop.f32.mrf.mxu1 }
0x15d9   : > { %v4608_v14 = vadd.f32 %v4607_v55, %v4522_v37 }
0x15da   : > { %v7398_v16 = vpop.f32.mrf.mxu0 }
0x15db   : > { %v4702_v23 = vadd.f32 %v7398_v16, %v4603_v50  ;;  %v7474_v50 = vpop.eup %7473 }
0x15dc   : > { %v4682_v32 = vpop.f32.mrf.mxu0 }
0x15dd   : > { %v4701_v20 = vadd.f32 %v4682_v32, %v4598_v49  ;;  %v4706_v44 = vadd.f32 %v10810_v4, %v4702_v23 }
0x15de   : > { %v7401_v51 = vpop.f32.mrf.mxu0 }
0x15df   : > { %v4705_v26 = vadd.f32 %v10810_v4, %v4701_v20  ;;  %v4704_v8 = vadd.f32 %v7401_v51, %v4613_v59  ;;  %v4710_v56 = vmax.f32 %v4706_v44, 0.0 }
0x15e0   : > { %v4692_v48 = vpop.f32.mrf.mxu0 }
0x15e1   : > { %v4709_v40 = vmax.f32 %v4705_v26, 0.0  ;;  %v4703_v25 = vadd.f32 %v4692_v48, %v4608_v14  ;;  %v4708_v27 = vadd.f32 %v10810_v4, %v4704_v8 }
0x15e3   : > { %v4707_v43 = vadd.f32 %v10810_v4, %v4703_v25  ;;  %7434 = vmatprep.mubr.f32.mxu1 %v4709_v40  ;;  %v4712_v45 = vmax.f32 %v4708_v27, 0.0  ;;  %v4854_v4 = vmax.f32.f32 %v4846_v15, %v4850_v18  ;;  %v7679_v18 = vld [vmem:[%s11114_s9 + $0x8] sm:$0xff] }
0x15e4   : > { %7435 = vmatmul.mubr.f32.vlgmr.msra.gmra.mxu1 %v4710_v56  ;;  %v4905_v57 = vsub.f32 %v10849_v63, %v7679_v18  ;;  %v4907_v63 = vsub.f32 %v10861_v58, %v7682_v5 }
0x15e5   : > { %v4711_v2 = vmax.f32 %v4707_v43, 0.0  ;;  %v4858_v13 = vmul.f32 0.001, %v4854_v4  ;;  %v7681_v4 = vld [vmem:[%s11114_s9 + $0x10] sm:$0xff] }
0x15e6   : > { %v4906_v34 = vsub.f32 %v10856_v6, %v7681_v4 }
0x15e7   : > { %7437 = vmatprep.mubr.f32.mxu1 %v4711_v2  ;;  %v4862_v22 = vadd.f32 0.001, %v4858_v13  ;;  %v7684_v13 = vld [vmem:[#allocation2 + $0x10] sm:$0xff] }
0x15e8   : > { %7438 = vmatmul.mubr.f32.gmra.mxu1 %v4712_v45 }
0x15e9   : > { %7475 = vrcp.f32 %v4862_v22 }
0x15ea   : > { %7477 = vrcp.f32 %v4865_v61 }
0x15eb   : > { %7479 = vrcp.f32 %v4864_v60 }
0x15f6   : > { %v7476_v55 = vpop.eup %7475 }
0x15f7   : > { %v7478_v44 = vpop.eup %7477 }
0x15f8   : > { %v7480_v8 = vpop.eup %7479 }
0x16a4   : > { %v7436_v10 = vpop.f32.mrf.mxu1 }
0x16a5   : > { %v11028_v39 = vadd.f32 %v10821_v12, %v7436_v10 }
0x16a6   : > { %v4779_v17 = vpop.f32.mrf.mxu1 }
0x16a7   : > { %v4835_v47 = vmul.f32 -0.025, %v11028_v39  ;;  %v11032_v33 = vadd.f32 %v10821_v12, %v4779_v17  ;;  %v4922_v41 = vsub.f32 %v11028_v39, %v7683_v29 }
0x16a8   : > { %v7439_v19 = vpop.f32.mrf.mxu1 }
0x16a9   : > { %v4839_v21 = vadd.f32 %v4835_v47, %v10827_v36  ;;  %v4834_v31 = vmul.f32 -0.025, %v11032_v33  ;;  %v11037_v53 = vadd.f32 %v10821_v12, %v7439_v19  ;;  %v4921_v7 = vsub.f32 %v11032_v33, %v7684_v13 }
0x16aa   : > { %v4789_v3 = vpop.f32.mrf.mxu1 }
0x16ab   : > { %v4843_v11 = vmul.f32 %v4839_v21, %v8170_v30  ;;  %v4838_v37 = vadd.f32 %v4834_v31, %v10832_v9  ;;  %v4837_v42 = vmul.f32 -0.025, %v11037_v53  ;;  %v11043_v16 = vadd.f32 %v10821_v12, %v4789_v3 }
0x16ac   : > { %v4924_v46 = vsub.f32 %v11037_v53, %v7685_v1 }
0x16ad   : > { %v4842_v49 = vmul.f32 %v4838_v37, %v8170_v30  ;;  %v4841_v36 = vadd.f32 %v4837_v42, %v10839_v38  ;;  %v4869_v23 = vmul.f32 %v7474_v50, %v4843_v11  ;;  %v4836_v32 = vmul.f32 -0.025, %v11043_v16 }
0x16ae   : > { %v4923_v22 = vsub.f32 %v11043_v16, %v7686_v24 }
0x16af   : > { %v4845_v59 = vmul.f32 %v4841_v36, %v8170_v30  ;;  %v4867_v20 = vmul.f32 %v7476_v55, %v4842_v49  ;;  %v4840_v9 = vadd.f32 %v4836_v32, %v10843_v35  ;;  %v4875_v26 = vmul.f32 %v4869_v23, %v4869_v23 }
0x16b1   : > { %v4873_v51 = vmul.f32 %v7478_v44, %v4845_v59  ;;  %v4874_v14 = vmul.f32 %v4867_v20, %v4867_v20  ;;  %v4844_v12 = vmul.f32 %v4840_v9, %v8170_v30 }
0x16b3   : > { %v4878_v48 = vadd.f32 %v4875_v26, %v4874_v14  ;;  %v4871_v40 = vmul.f32 %v7480_v8, %v4844_v12  ;;  %v4877_v25 = vmul.f32 %v4873_v51, %v4873_v51 }
0x16b5   : > { %v4876_v38 = vmul.f32 %v4871_v40, %v4871_v40 }
0x16b7   : > { %v4879_v56 = vadd.f32 %v4878_v48, %v4876_v38 }
0x16b9   : > { %v4880_v27 = vadd.f32 %v4879_v56, %v4877_v25 }
0x16bb   : > { %4881 = vadd.xlane.f32.xlu0 %v4880_v27 }
0x1744   : > { %v4882_v43 = vpop.xlane.xlu0 %4881 }
0x1745   : > { %v4883_v2 = vrot.slane %v4882_v43, 4 }
0x1747   : > { %v4884_v45 = vadd.f32 %v4883_v2, %v4882_v43 }
0x1749   : > { %v4885_v54 = vrot.slane %v4884_v45, 2 }
0x174b   : > { %v4886_v52 = vadd.f32 %v4885_v54, %v4884_v45 }
0x174d   : > { %v4887_v35 = vrot.slane %v4886_v52, 1 }
0x174f   : > { %v4888_v15 = vadd.f32 %v4887_v35, %v4886_v52 }
0x1751   : > { %7440 = vpush %v4888_v15 }
0x1782   : > { %s7441_s20 = spop %7440 }
0x1783   : > { %s4890_s0 = smul.f32 0.00024414063, %s7441_s20 }
0x1785   : > { %p4891_p0 = scmp.le.f32.partialorder %s4890_s0, 1.0  ;;  %s4892_s23 = smax.f32 %s7733_s21, %s4890_s0 }
0x1786   : > { %v4893_v30 = vstv %s4892_s23 }
0x1787   : > { %7481 = vlog2.f32 %v4893_v30  ;;  %s4903_s27 = scalar_select %p4891_p0, 1.0, 0.0 }
0x1789   : > { %v4908_v6 = vstv %s4903_s27  ;;  %s4937_s13 = smul.f32 %s4903_s27, %s8160_s14 }
0x178a   : > { %v4909_v28 = vmul.f32 %v4908_v6, %v4904_v62  ;;  %v4910_v61 = vmul.f32 %v4908_v6, %v4905_v57  ;;  %v4911_v60 = vmul.f32 %v4908_v6, %v4906_v34  ;;  %v4912_v10 = vmul.f32 %v4908_v6, %v4907_v63 }
0x178b   : > { %v4925_v58 = vmul.f32 %v4921_v7, %v4908_v6  ;;  %v4926_v17 = vmul.f32 %v4922_v41, %v4908_v6  ;;  %v4927_v47 = vmul.f32 %v4923_v22, %v4908_v6  ;;  %v4928_v39 = vmul.f32 %v4924_v46, %v4908_v6  ;;  %s11076_s24 = sadd.f32 %s7731_s24, %s4937_s13  }
0x178c   : > { %v4913_v19 = vadd.f32 %v7680_v0, %v4909_v28  ;;  %v4914_v33 = vadd.f32 %v7679_v18, %v4910_v61  ;;  %v4915_v21 = vadd.f32 %v7681_v4, %v4911_v60  ;;  %v4916_v31 = vadd.f32 %v7682_v5, %v4912_v10 }
0x178d   : > { %v4929_v53 = vadd.f32 %v7684_v13, %v4925_v58  ;;  %v4930_v3 = vadd.f32 %v7683_v29, %v4926_v17  ;;  %v4931_v11 = vadd.f32 %v7686_v24, %v4927_v47  ;;  %v4932_v37 = vadd.f32 %v7685_v1, %v4928_v39  ;;  %p798_p1 = scmp.lt.f32.partialorder %s11076_s24, 0.9999999 }
0x178e   : > { %4917 = vst [vmem:[%s11114_s9] sm:$0xff] %v4913_v19  ;;  %4918 = vst [vmem:[%s11114_s9 + $0x8] sm:$0xff] %v4914_v33 }
0x178f   : > { %4919 = vst [vmem:[%s11114_s9 + $0x10] sm:$0xff] %v4915_v21  ;;  %4920 = vst [vmem:[%s11114_s9 + $0x18] sm:$0xff] %v4916_v31  ;;  %p800_p3 = pnand %p799_p2, %p798_p1 }
0x1790   : > { %4933 = vst [vmem:[#allocation2 + $0x10] sm:$0xff] %v4929_v53  ;;  %4934 = vst [vmem:[#allocation2] sm:$0xff] %v4930_v3  ;;  %v4942_v55 = vstv (%p800_p3), %s11673_s19  ;;  %vm4943_vm1 = vcmask (%p800_p3), 0  }
0x1791   : > { %4935 = vst [vmem:[#allocation2 + $0x18] sm:$0xff] %v4931_v11  ;;  %4936 = vst [vmem:[#allocation2 + $0x8] sm:$0xff] %v4932_v37 }
0x1792   :  { %4944 = vst.msk [vmem:[#allocation3] sm:$0x1] (%p800_p3), %vm4943_vm1, %v4942_v55 }
0x1794   : > { %v7482_v42 = vpop.eup %7481 }
0x1795   : > { %v4895_v50 = vmul.f32 0.6931472, %v7482_v42 }
0x1797   : > { %v4896_v16 = vmul.f32 -0.1, %v4895_v50 }
0x1799   : > { %v4897_v49 = vmul.f32 1.442695, %v4896_v16 }
0x179b   : > { %7483 = vpow2.f32 %v4897_v49 }
0x17a8   : > { %v7484_v36 = vpop.eup %7483 }
0x17a9   : > { %v4899_v23 = vmul.f32 0.9, %v7484_v36 }
0x17ab   : > { %7442 = vpush %v4899_v23 }
0x17dc   : > { %s7443_s25 = spop %7442 }
0x17dd   : > { %s4901_s27 = smax.f32 %s7734_s26, %s7443_s25  ;;  %803 = sbr.rel (!%p800_p3) target bundleno = 851 (0x353), region = 73 }
0x17de   : > { %s4902_s29 = smin.f32 %s7735_s28, %s4901_s27 }
0x17df   : > { %s4939_s22 = smul.f32 %s4902_s29, %s8160_s14  ;;  %s7737_s14 = smov (%p800_p3), [#allocation3]  }
0x17e0   :  { %s4953_s11 = sshll.u32 (%p800_p3), %s7737_s14, 4  ;;  %s4954_s11 = int_to_ptr.vmem [resolvable:$true] %s4953_s11 }
0x17e1   : > { %s4940_s23 = smax.f32 %s7736_s30, %s4939_s22   ;;  %s11674_s22 = smov %s11673_s19 }
0x17e2   :  { %s7687_s12 = scalar_lea.vmem %s4954_s11, 16  ;;  %s7691_s13 = scalar_lea.vmem %s4954_s11, 32 }
0x17e3   :  { %p7688_p4 = scmp.ne.s32.totalorder %s4954_s11, %s7687_s12  ;;  %p7692_p5 = scmp.lt.s32.totalorder %s4954_s11, %s4954_s11 }
0x17e4   :  { %p7693_p6 = scmp.lt.s32.totalorder %s7691_s13, %s7687_s12 }
0x17e6   :  { %p7694_p7 = por %p7693_p6, %p7692_p5 }
0x17e8   :  { %p7695_p8 = pnand %p7694_p7, %p7688_p4 }
0x17ea   :  { %7698 = shalt.err (!%p7695_p8)
}
0x17eb   :  { %4956 = dma.vmem_to_hbm [thread:$0]  %s4954_s11, 16, %s11115_s10, [#allocation4]  }
0x17ec   :  { %7719 = dma.done.wait [#allocation4], 16  }
0x17ed   :  { %7720 = vsyncadd [#allocation4], 4294967280 }
0x17ee   :  { %4962 = vsyncpa [#allocation4], 1 }

</bundles_post_ra>
